<compile_context>
chip_gen: v7x
topology: tpu7x:2x2x1
jax: 0.10.0
libtpu: 0.0.40
codegen_flags: <defaults>
</compile_context>

<pallas_src>
import functools

import jax
import jax.numpy as jnp
import numpy as np
from jax import lax
from jax.experimental import pallas as pl
from jax.experimental.pallas import tpu as pltpu

NEG_SLOPE = 0.01  # PyTorch nn.LeakyReLU default


def _leaky_relu(x):
    return jnp.where(x >= 0, x, NEG_SLOPE * x)


def enhancement_block_kernel(x_ref, w_ref, b_ref, o_ref, p_ref, *, H, W, C):
    # x_ref: (1, C, HW)   feature map, CHW layout flattened over (y, x)
    # w_ref: (6, C, 9*C)  per-conv weights, K ordered as (ky, kx, cin)
    # b_ref: (6, C, 1)    per-conv biases (lane-broadcast)
    # o_ref: (1, C, HW)
    # p_ref: (9*C, HW)    transposed-im2col scratch (rows = (tap, cin), cols = pixels)
    HW = H * W

    # Boundary masks, built once per grid step and reused by all 6 convs.
    # Shapes (1, HW); the selects broadcast them over the C sublanes.
    jj = lax.broadcasted_iota(jnp.int32, (1, HW), 1)    # flat pixel index y*W + x
    xx = jj % W
    my = (jj >= W, None, jj < (H - 1) * W)              # ky = 0, 1, 2  (y in range)
    mx = (xx >= 1, None, xx < (W - 1))                  # kx = 0, 1, 2  (x in range)
    tap_masks = []
    for ky in range(3):
        for kx in range(3):
            m = my[ky]
            if mx[kx] is not None:
                m = mx[kx] if m is None else jnp.logical_and(m, mx[kx])
            tap_masks.append(m)                         # center tap (1,1) -> None

    def conv3x3(g, idx):
        # g: (C, HW) f32.  Build the transposed im2col buffer: for tap t=(ky,kx),
        # rows [t*C:(t+1)*C] hold the feature map shifted by (ky-1, kx-1), with
        # out-of-image pixels zeroed.  Shift = lane roll by (ky-1)*W + (kx-1).
        for t in range(9):
            ky, kx = t // 3, t % 3
            s = (ky - 1) * W + (kx - 1)
            tap = g if s == 0 else pltpu.roll(g, shift=(-s) % HW, axis=1)
            m = tap_masks[t]
            if m is not None:
                tap = jnp.where(m, tap, 0.0)
            p_ref[t * C:(t + 1) * C, :] = tap            # aligned slab store
        acc = jnp.dot(w_ref[idx], p_ref[...],
                      preferred_element_type=jnp.float32)  # (C, HW), K = 9*C
        return acc + b_ref[idx]                            # (C, 1) lane-broadcast

    x0 = x_ref[0].astype(jnp.float32)     # (C, HW)
    cur = x0
    for rb in range(3):                   # RB1, RB2, RB3
        t1 = _leaky_relu(conv3x3(cur, 2 * rb))
        t2 = _leaky_relu(conv3x3(t1, 2 * rb + 1))
        cur = t2 + cur                    # residual add inside each block
    o_ref[0] = (cur + x0).astype(o_ref.dtype)   # outer skip of Enhancement_Block


def enhancement_block(x_nchw, weights_oihw, biases):
    """x_nchw: (N, C, H, W); weights_oihw: (6, Cout, Cin, 3, 3) (PyTorch layout);
    biases: (6, C)."""
    N, C, H, W = x_nchw.shape
    HW = H * W
    assert C % 8 == 0 and HW % 128 == 0, "expect sublane/lane aligned shapes"

    # NCHW flattens directly to the kernel's lane-dense (C, H*W) layout.
    x = x_nchw.reshape(N, C, HW)
    # Kernel weight layout (6, Cout, 9*Cin) with K ordered (ky, kx, cin) to match
    # the im2col row ordering built inside the kernel.
    w = jnp.transpose(weights_oihw, (0, 1, 3, 4, 2)).reshape(6, C, 9 * C)
    b = biases.reshape(6, C, 1)

    kernel = functools.partial(enhancement_block_kernel, H=H, W=W, C=C)
    out = pl.pallas_call(
        kernel,
        out_shape=jax.ShapeDtypeStruct((N, C, HW), x.dtype),
        grid_spec=pltpu.PrefetchScalarGridSpec(
            num_scalar_prefetch=0,
            grid=(N,),
            in_specs=[
                pl.BlockSpec((1, C, HW), lambda n: (n, 0, 0)),
                pl.BlockSpec((6, C, 9 * C), lambda n: (0, 0, 0)),   # resident weights
                pl.BlockSpec((6, C, 1), lambda n: (0, 0, 0)),        # resident biases
            ],
            out_specs=pl.BlockSpec((1, C, HW), lambda n: (n, 0, 0)),
            scratch_shapes=[pltpu.VMEM((9 * C, HW), jnp.float32)],   # shared im2col
        ),
        compiler_params=pltpu.CompilerParams(
            dimension_semantics=("parallel",)),
    )(x, w, b)
    return out.reshape(N, C, H, W)


def ref_forward(x, weights, biases):
    """Pure-JAX reference (lax.conv), NCHW / OIHW, identical semantics."""
    def conv(z, w, b):
        y = lax.conv_general_dilated(
            z, w, window_strides=(1, 1), padding="SAME",
            dimension_numbers=("NCHW", "OIHW", "NCHW"))
        return y + b.reshape(1, -1, 1, 1)

    cur = x
    for rb in range(3):
        t = _leaky_relu(conv(cur, weights[2 * rb], biases[2 * rb]))
        t = _leaky_relu(conv(t, weights[2 * rb + 1], biases[2 * rb + 1]))
        cur = t + cur
    return cur + x


if __name__ == "__main__":
    C = 32          # fixed by the module (ResidualBlock(32, 32))
    N, H, W = 2, 16, 16

    key = jax.random.PRNGKey(0)
    kx, kw, kb = jax.random.split(key, 3)

    # Deterministic synthetic parameters (6 convs: conv1/conv2 for each RB),
    # in PyTorch conv layout (Cout, Cin, KH, KW).
    weights = 0.05 * jax.random.normal(kw, (6, C, C, 3, 3), dtype=jnp.float32)
    biases = 0.05 * jax.random.normal(kb, (6, C), dtype=jnp.float32)
    x = jax.random.normal(kx, (N, C, H, W), dtype=jnp.float32)

    out = jax.block_until_ready(enhancement_block(x, weights, biases))
    ref = jax.block_until_ready(ref_forward(x, weights, biases))

    assert out.shape == (N, C, H, W)
    np.testing.assert_allclose(np.asarray(out), np.asarray(ref),
                               rtol=1e-4, atol=1e-4)
    print("KERNEL_OK")
</pallas_src>

<mosaic_0001>
module attributes {stable_mosaic.version = 11 : i64} {
  func.func @enhancement_block_kernel(%arg0: i32, %arg1: memref<1x32x256xf32, #tpu.memory_space<vmem>>, %arg2: memref<6x32x288xf32, #tpu.memory_space<vmem>>, %arg3: memref<6x32x1xf32, #tpu.memory_space<vmem>>, %arg4: memref<1x32x256xf32, #tpu.memory_space<vmem>>, %arg5: memref<288x256xf32, #tpu.memory_space<vmem>>) attributes {dimension_semantics = [#tpu.dimension_semantics<parallel>], iteration_bounds = array<i64: 2>, scalar_prefetch = 0 : i64, scratch_operands = 1 : i64, tpu.core_type = #tpu.core_type<tc>, window_params = [{transform_indices = @transform_0, window_bounds = array<i64: 1, 32, 256>}, {pipeline_mode = #tpu.pipeline_mode<synchronous>, transform_indices = @transform_1, window_bounds = array<i64: 6, 32, 288>}, {pipeline_mode = #tpu.pipeline_mode<synchronous>, transform_indices = @transform_2, window_bounds = array<i64: 6, 32, 1>}, {transform_indices = @transform_3, window_bounds = array<i64: 1, 32, 256>}]} {
    %0 = tpu.iota {dimensions = array<i32: 1>} : vector<1x256xi32>
    %c16_i32 = arith.constant 16 : i32
    %c0_i32 = arith.constant 0 : i32
    %1 = arith.cmpi eq, %c16_i32, %c0_i32 : i32
    %c1_i32 = arith.constant 1 : i32
    %2 = arith.select %1, %c1_i32, %c16_i32 : i32
    %3 = vector.broadcast %2 : i32 to vector<1x256xi32>
    %4 = arith.remsi %0, %3 : vector<1x256xi32>
    %c0_i32_0 = arith.constant 0 : i32
    %5 = vector.broadcast %c0_i32_0 : i32 to vector<1x256xi32>
    %6 = arith.cmpi ne, %4, %5 : vector<1x256xi32>
    %c0_i32_1 = arith.constant 0 : i32
    %7 = vector.broadcast %c0_i32_1 : i32 to vector<1x256xi32>
    %8 = arith.cmpi slt, %4, %7 : vector<1x256xi32>
    %c0_i32_2 = arith.constant 0 : i32
    %9 = arith.cmpi slt, %2, %c0_i32_2 : i32
    %10 = vector.broadcast %9 : i1 to vector<1x256xi1>
    %11 = vector.broadcast %10 : vector<1x256xi1> to vector<1x256xi1>
    %12 = arith.xori %8, %11 : vector<1x256xi1>
    %13 = arith.andi %12, %6 : vector<1x256xi1>
    %14 = vector.broadcast %2 : i32 to vector<1x256xi32>
    %15 = arith.addi %4, %14 : vector<1x256xi32>
    %16 = arith.select %13, %15, %4 : vector<1x256xi1>, vector<1x256xi32>
    %c16_i32_3 = arith.constant 16 : i32
    %17 = vector.broadcast %c16_i32_3 : i32 to vector<1x256xi32>
    %18 = arith.cmpi sge, %0, %17 : vector<1x256xi32>
    %c240_i32 = arith.constant 240 : i32
    %19 = vector.broadcast %c240_i32 : i32 to vector<1x256xi32>
    %20 = arith.cmpi slt, %0, %19 : vector<1x256xi32>
    %c1_i32_4 = arith.constant 1 : i32
    %21 = vector.broadcast %c1_i32_4 : i32 to vector<1x256xi32>
    %22 = arith.cmpi sge, %16, %21 : vector<1x256xi32>
    %c15_i32 = arith.constant 15 : i32
    %23 = vector.broadcast %c15_i32 : i32 to vector<1x256xi32>
    %24 = arith.cmpi slt, %16, %23 : vector<1x256xi32>
    %25 = arith.andi %18, %22 : vector<1x256xi1>
    %26 = arith.andi %18, %24 : vector<1x256xi1>
    %27 = arith.andi %20, %22 : vector<1x256xi1>
    %28 = arith.andi %20, %24 : vector<1x256xi1>
    %c0 = arith.constant 0 : index
    %c0_5 = arith.constant 0 : index
    %c0_6 = arith.constant 0 : index
    %29 = vector.load %arg1[%c0, %c0_5, %c0_6] : memref<1x32x256xf32, #tpu.memory_space<vmem>>, vector<1x32x256xf32>
    %30 = vector.shape_cast %29 : vector<1x32x256xf32> to vector<32x256xf32>
    %c17_i32 = arith.constant 17 : i32
    %31 = tpu.dynamic_rotate %30 by %c17_i32 dim 1 : vector<32x256xf32>, i32 -> vector<32x256xf32>
    %cst = arith.constant 0.000000e+00 : f32
    %32 = vector.shape_cast %25 : vector<1x256xi1> to vector<1x256xi1>
    %33 = vector.broadcast %32 : vector<1x256xi1> to vector<32x256xi1>
    %34 = vector.broadcast %cst : f32 to vector<32x256xf32>
    %35 = arith.select %33, %31, %34 : vector<32x256xi1>, vector<32x256xf32>
    %c0_7 = arith.constant 0 : index
    %c0_8 = arith.constant 0 : index
    %36 = vector.load %arg5[%c0_7, %c0_8] : memref<288x256xf32, #tpu.memory_space<vmem>>, vector<32x256xf32>
    tpu.vector_store %arg5[%c0_7, %c0_8], %35 {strides = array<i32>} : memref<288x256xf32, #tpu.memory_space<vmem>>, vector<32x256xf32>,
    %c16_i32_9 = arith.constant 16 : i32
    %37 = tpu.dynamic_rotate %30 by %c16_i32_9 dim 1 : vector<32x256xf32>, i32 -> vector<32x256xf32>
    %cst_10 = arith.constant 0.000000e+00 : f32
    %38 = vector.shape_cast %18 : vector<1x256xi1> to vector<1x256xi1>
    %39 = vector.broadcast %38 : vector<1x256xi1> to vector<32x256xi1>
    %40 = vector.broadcast %cst_10 : f32 to vector<32x256xf32>
    %41 = arith.select %39, %37, %40 : vector<32x256xi1>, vector<32x256xf32>
    %c32 = arith.constant 32 : index
    %c0_11 = arith.constant 0 : index
    %42 = vector.load %arg5[%c32, %c0_11] : memref<288x256xf32, #tpu.memory_space<vmem>>, vector<32x256xf32>
    tpu.vector_store %arg5[%c32, %c0_11], %41 {strides = array<i32>} : memref<288x256xf32, #tpu.memory_space<vmem>>, vector<32x256xf32>,
    %c15_i32_12 = arith.constant 15 : i32
    %43 = tpu.dynamic_rotate %30 by %c15_i32_12 dim 1 : vector<32x256xf32>, i32 -> vector<32x256xf32>
    %cst_13 = arith.constant 0.000000e+00 : f32
    %44 = vector.shape_cast %26 : vector<1x256xi1> to vector<1x256xi1>
    %45 = vector.broadcast %44 : vector<1x256xi1> to vector<32x256xi1>
    %46 = vector.broadcast %cst_13 : f32 to vector<32x256xf32>
    %47 = arith.select %45, %43, %46 : vector<32x256xi1>, vector<32x256xf32>
    %c64 = arith.constant 64 : index
    %c0_14 = arith.constant 0 : index
    %48 = vector.load %arg5[%c64, %c0_14] : memref<288x256xf32, #tpu.memory_space<vmem>>, vector<32x256xf32>
    tpu.vector_store %arg5[%c64, %c0_14], %47 {strides = array<i32>} : memref<288x256xf32, #tpu.memory_space<vmem>>, vector<32x256xf32>,
    %c1_i32_15 = arith.constant 1 : i32
    %49 = tpu.dynamic_rotate %30 by %c1_i32_15 dim 1 : vector<32x256xf32>, i32 -> vector<32x256xf32>
    %cst_16 = arith.constant 0.000000e+00 : f32
    %50 = vector.shape_cast %22 : vector<1x256xi1> to vector<1x256xi1>
    %51 = vector.broadcast %50 : vector<1x256xi1> to vector<32x256xi1>
    %52 = vector.broadcast %cst_16 : f32 to vector<32x256xf32>
    %53 = arith.select %51, %49, %52 : vector<32x256xi1>, vector<32x256xf32>
    %c96 = arith.constant 96 : index
    %c0_17 = arith.constant 0 : index
    %54 = vector.load %arg5[%c96, %c0_17] : memref<288x256xf32, #tpu.memory_space<vmem>>, vector<32x256xf32>
    tpu.vector_store %arg5[%c96, %c0_17], %53 {strides = array<i32>} : memref<288x256xf32, #tpu.memory_space<vmem>>, vector<32x256xf32>,
    %c128 = arith.constant 128 : index
    %c0_18 = arith.constant 0 : index
    %55 = vector.load %arg5[%c128, %c0_18] : memref<288x256xf32, #tpu.memory_space<vmem>>, vector<32x256xf32>
    tpu.vector_store %arg5[%c128, %c0_18], %30 {strides = array<i32>} : memref<288x256xf32, #tpu.memory_space<vmem>>, vector<32x256xf32>,
    %c255_i32 = arith.constant 255 : i32
    %56 = tpu.dynamic_rotate %30 by %c255_i32 dim 1 : vector<32x256xf32>, i32 -> vector<32x256xf32>
    %cst_19 = arith.constant 0.000000e+00 : f32
    %57 = vector.shape_cast %24 : vector<1x256xi1> to vector<1x256xi1>
    %58 = vector.broadcast %57 : vector<1x256xi1> to vector<32x256xi1>
    %59 = vector.broadcast %cst_19 : f32 to vector<32x256xf32>
    %60 = arith.select %58, %56, %59 : vector<32x256xi1>, vector<32x256xf32>
    %c160 = arith.constant 160 : index
    %c0_20 = arith.constant 0 : index
    %61 = vector.load %arg5[%c160, %c0_20] : memref<288x256xf32, #tpu.memory_space<vmem>>, vector<32x256xf32>
    tpu.vector_store %arg5[%c160, %c0_20], %60 {strides = array<i32>} : memref<288x256xf32, #tpu.memory_space<vmem>>, vector<32x256xf32>,
    %c241_i32 = arith.constant 241 : i32
    %62 = tpu.dynamic_rotate %30 by %c241_i32 dim 1 : vector<32x256xf32>, i32 -> vector<32x256xf32>
    %cst_21 = arith.constant 0.000000e+00 : f32
    %63 = vector.shape_cast %27 : vector<1x256xi1> to vector<1x256xi1>
    %64 = vector.broadcast %63 : vector<1x256xi1> to vector<32x256xi1>
    %65 = vector.broadcast %cst_21 : f32 to vector<32x256xf32>
    %66 = arith.select %64, %62, %65 : vector<32x256xi1>, vector<32x256xf32>
    %c192 = arith.constant 192 : index
    %c0_22 = arith.constant 0 : index
    %67 = vector.load %arg5[%c192, %c0_22] : memref<288x256xf32, #tpu.memory_space<vmem>>, vector<32x256xf32>
    tpu.vector_store %arg5[%c192, %c0_22], %66 {strides = array<i32>} : memref<288x256xf32, #tpu.memory_space<vmem>>, vector<32x256xf32>,
    %c240_i32_23 = arith.constant 240 : i32
    %68 = tpu.dynamic_rotate %30 by %c240_i32_23 dim 1 : vector<32x256xf32>, i32 -> vector<32x256xf32>
    %cst_24 = arith.constant 0.000000e+00 : f32
    %69 = vector.shape_cast %20 : vector<1x256xi1> to vector<1x256xi1>
    %70 = vector.broadcast %69 : vector<1x256xi1> to vector<32x256xi1>
    %71 = vector.broadcast %cst_24 : f32 to vector<32x256xf32>
    %72 = arith.select %70, %68, %71 : vector<32x256xi1>, vector<32x256xf32>
    %c224 = arith.constant 224 : index
    %c0_25 = arith.constant 0 : index
    %73 = vector.load %arg5[%c224, %c0_25] : memref<288x256xf32, #tpu.memory_space<vmem>>, vector<32x256xf32>
    tpu.vector_store %arg5[%c224, %c0_25], %72 {strides = array<i32>} : memref<288x256xf32, #tpu.memory_space<vmem>>, vector<32x256xf32>,
    %c239_i32 = arith.constant 239 : i32
    %74 = tpu.dynamic_rotate %30 by %c239_i32 dim 1 : vector<32x256xf32>, i32 -> vector<32x256xf32>
    %cst_26 = arith.constant 0.000000e+00 : f32
    %75 = vector.shape_cast %28 : vector<1x256xi1> to vector<1x256xi1>
    %76 = vector.broadcast %75 : vector<1x256xi1> to vector<32x256xi1>
    %77 = vector.broadcast %cst_26 : f32 to vector<32x256xf32>
    %78 = arith.select %76, %74, %77 : vector<32x256xi1>, vector<32x256xf32>
    %c256 = arith.constant 256 : index
    %c0_27 = arith.constant 0 : index
    %79 = vector.load %arg5[%c256, %c0_27] : memref<288x256xf32, #tpu.memory_space<vmem>>, vector<32x256xf32>
    tpu.vector_store %arg5[%c256, %c0_27], %78 {strides = array<i32>} : memref<288x256xf32, #tpu.memory_space<vmem>>, vector<32x256xf32>,
    %c0_28 = arith.constant 0 : index
    %c0_29 = arith.constant 0 : index
    %c0_30 = arith.constant 0 : index
    %80 = vector.load %arg2[%c0_28, %c0_29, %c0_30] : memref<6x32x288xf32, #tpu.memory_space<vmem>>, vector<1x32x288xf32>
    %81 = vector.shape_cast %80 : vector<1x32x288xf32> to vector<32x288xf32>
    %c0_31 = arith.constant 0 : index
    %c0_32 = arith.constant 0 : index
    %82 = vector.load %arg5[%c0_31, %c0_32] : memref<288x256xf32, #tpu.memory_space<vmem>>, vector<288x256xf32>
    %cst_33 = arith.constant dense<0.000000e+00> : vector<32x256xf32>
    %83 = tpu.matmul %81, %82, %cst_33 {dimension_numbers = #tpu.dot_dimension_numbers<[1], [0], [0], [1], [0, 0, 1, 1], [], []>} : vector<32x288xf32>, vector<288x256xf32>, vector<32x256xf32> -> vector<32x256xf32>
    %c0_34 = arith.constant 0 : index
    %c0_35 = arith.constant 0 : index
    %c0_36 = arith.constant 0 : index
    %84 = vector.load %arg3[%c0_34, %c0_35, %c0_36] : memref<6x32x1xf32, #tpu.memory_space<vmem>>, vector<1x32x1xf32>
    %85 = vector.shape_cast %84 : vector<1x32x1xf32> to vector<32x1xf32>
    %86 = vector.broadcast %85 : vector<32x1xf32> to vector<32x256xf32>
    %87 = arith.addf %83, %86 : vector<32x256xf32>
    %cst_37 = arith.constant 0.000000e+00 : f32
    %88 = vector.broadcast %cst_37 : f32 to vector<32x256xf32>
    %89 = arith.cmpf oge, %87, %88 : vector<32x256xf32>
    %cst_38 = arith.constant 0.00999999977 : f32
    %90 = vector.broadcast %cst_38 : f32 to vector<32x256xf32>
    %91 = arith.mulf %90, %87 : vector<32x256xf32>
    %92 = arith.select %89, %87, %91 : vector<32x256xi1>, vector<32x256xf32>
    %c17_i32_39 = arith.constant 17 : i32
    %93 = tpu.dynamic_rotate %92 by %c17_i32_39 dim 1 : vector<32x256xf32>, i32 -> vector<32x256xf32>
    %cst_40 = arith.constant 0.000000e+00 : f32
    %94 = vector.shape_cast %25 : vector<1x256xi1> to vector<1x256xi1>
    %95 = vector.broadcast %94 : vector<1x256xi1> to vector<32x256xi1>
    %96 = vector.broadcast %cst_40 : f32 to vector<32x256xf32>
    %97 = arith.select %95, %93, %96 : vector<32x256xi1>, vector<32x256xf32>
    %c0_41 = arith.constant 0 : index
    %c0_42 = arith.constant 0 : index
    %98 = vector.load %arg5[%c0_41, %c0_42] : memref<288x256xf32, #tpu.memory_space<vmem>>, vector<32x256xf32>
    tpu.vector_store %arg5[%c0_41, %c0_42], %97 {strides = array<i32>} : memref<288x256xf32, #tpu.memory_space<vmem>>, vector<32x256xf32>,
    %c16_i32_43 = arith.constant 16 : i32
    %99 = tpu.dynamic_rotate %92 by %c16_i32_43 dim 1 : vector<32x256xf32>, i32 -> vector<32x256xf32>
    %cst_44 = arith.constant 0.000000e+00 : f32
    %100 = vector.shape_cast %18 : vector<1x256xi1> to vector<1x256xi1>
    %101 = vector.broadcast %100 : vector<1x256xi1> to vector<32x256xi1>
    %102 = vector.broadcast %cst_44 : f32 to vector<32x256xf32>
    %103 = arith.select %101, %99, %102 : vector<32x256xi1>, vector<32x256xf32>
    %c32_45 = arith.constant 32 : index
    %c0_46 = arith.constant 0 : index
    %104 = vector.load %arg5[%c32_45, %c0_46] : memref<288x256xf32, #tpu.memory_space<vmem>>, vector<32x256xf32>
    tpu.vector_store %arg5[%c32_45, %c0_46], %103 {strides = array<i32>} : memref<288x256xf32, #tpu.memory_space<vmem>>, vector<32x256xf32>,
    %c15_i32_47 = arith.constant 15 : i32
    %105 = tpu.dynamic_rotate %92 by %c15_i32_47 dim 1 : vector<32x256xf32>, i32 -> vector<32x256xf32>
    %cst_48 = arith.constant 0.000000e+00 : f32
    %106 = vector.shape_cast %26 : vector<1x256xi1> to vector<1x256xi1>
    %107 = vector.broadcast %106 : vector<1x256xi1> to vector<32x256xi1>
    %108 = vector.broadcast %cst_48 : f32 to vector<32x256xf32>
    %109 = arith.select %107, %105, %108 : vector<32x256xi1>, vector<32x256xf32>
    %c64_49 = arith.constant 64 : index
    %c0_50 = arith.constant 0 : index
    %110 = vector.load %arg5[%c64_49, %c0_50] : memref<288x256xf32, #tpu.memory_space<vmem>>, vector<32x256xf32>
    tpu.vector_store %arg5[%c64_49, %c0_50], %109 {strides = array<i32>} : memref<288x256xf32, #tpu.memory_space<vmem>>, vector<32x256xf32>,
    %c1_i32_51 = arith.constant 1 : i32
    %111 = tpu.dynamic_rotate %92 by %c1_i32_51 dim 1 : vector<32x256xf32>, i32 -> vector<32x256xf32>
    %cst_52 = arith.constant 0.000000e+00 : f32
    %112 = vector.shape_cast %22 : vector<1x256xi1> to vector<1x256xi1>
    %113 = vector.broadcast %112 : vector<1x256xi1> to vector<32x256xi1>
    %114 = vector.broadcast %cst_52 : f32 to vector<32x256xf32>
    %115 = arith.select %113, %111, %114 : vector<32x256xi1>, vector<32x256xf32>
    %c96_53 = arith.constant 96 : index
    %c0_54 = arith.constant 0 : index
    %116 = vector.load %arg5[%c96_53, %c0_54] : memref<288x256xf32, #tpu.memory_space<vmem>>, vector<32x256xf32>
    tpu.vector_store %arg5[%c96_53, %c0_54], %115 {strides = array<i32>} : memref<288x256xf32, #tpu.memory_space<vmem>>, vector<32x256xf32>,
    %c128_55 = arith.constant 128 : index
    %c0_56 = arith.constant 0 : index
    %117 = vector.load %arg5[%c128_55, %c0_56] : memref<288x256xf32, #tpu.memory_space<vmem>>, vector<32x256xf32>
    tpu.vector_store %arg5[%c128_55, %c0_56], %92 {strides = array<i32>} : memref<288x256xf32, #tpu.memory_space<vmem>>, vector<32x256xf32>,
    %c255_i32_57 = arith.constant 255 : i32
    %118 = tpu.dynamic_rotate %92 by %c255_i32_57 dim 1 : vector<32x256xf32>, i32 -> vector<32x256xf32>
    %cst_58 = arith.constant 0.000000e+00 : f32
    %119 = vector.shape_cast %24 : vector<1x256xi1> to vector<1x256xi1>
    %120 = vector.broadcast %119 : vector<1x256xi1> to vector<32x256xi1>
    %121 = vector.broadcast %cst_58 : f32 to vector<32x256xf32>
    %122 = arith.select %120, %118, %121 : vector<32x256xi1>, vector<32x256xf32>
    %c160_59 = arith.constant 160 : index
    %c0_60 = arith.constant 0 : index
    %123 = vector.load %arg5[%c160_59, %c0_60] : memref<288x256xf32, #tpu.memory_space<vmem>>, vector<32x256xf32>
    tpu.vector_store %arg5[%c160_59, %c0_60], %122 {strides = array<i32>} : memref<288x256xf32, #tpu.memory_space<vmem>>, vector<32x256xf32>,
    %c241_i32_61 = arith.constant 241 : i32
    %124 = tpu.dynamic_rotate %92 by %c241_i32_61 dim 1 : vector<32x256xf32>, i32 -> vector<32x256xf32>
    %cst_62 = arith.constant 0.000000e+00 : f32
    %125 = vector.shape_cast %27 : vector<1x256xi1> to vector<1x256xi1>
    %126 = vector.broadcast %125 : vector<1x256xi1> to vector<32x256xi1>
    %127 = vector.broadcast %cst_62 : f32 to vector<32x256xf32>
    %128 = arith.select %126, %124, %127 : vector<32x256xi1>, vector<32x256xf32>
    %c192_63 = arith.constant 192 : index
    %c0_64 = arith.constant 0 : index
    %129 = vector.load %arg5[%c192_63, %c0_64] : memref<288x256xf32, #tpu.memory_space<vmem>>, vector<32x256xf32>
    tpu.vector_store %arg5[%c192_63, %c0_64], %128 {strides = array<i32>} : memref<288x256xf32, #tpu.memory_space<vmem>>, vector<32x256xf32>,
    %c240_i32_65 = arith.constant 240 : i32
    %130 = tpu.dynamic_rotate %92 by %c240_i32_65 dim 1 : vector<32x256xf32>, i32 -> vector<32x256xf32>
    %cst_66 = arith.constant 0.000000e+00 : f32
    %131 = vector.shape_cast %20 : vector<1x256xi1> to vector<1x256xi1>
    %132 = vector.broadcast %131 : vector<1x256xi1> to vector<32x256xi1>
    %133 = vector.broadcast %cst_66 : f32 to vector<32x256xf32>
    %134 = arith.select %132, %130, %133 : vector<32x256xi1>, vector<32x256xf32>
    %c224_67 = arith.constant 224 : index
    %c0_68 = arith.constant 0 : index
    %135 = vector.load %arg5[%c224_67, %c0_68] : memref<288x256xf32, #tpu.memory_space<vmem>>, vector<32x256xf32>
    tpu.vector_store %arg5[%c224_67, %c0_68], %134 {strides = array<i32>} : memref<288x256xf32, #tpu.memory_space<vmem>>, vector<32x256xf32>,
    %c239_i32_69 = arith.constant 239 : i32
    %136 = tpu.dynamic_rotate %92 by %c239_i32_69 dim 1 : vector<32x256xf32>, i32 -> vector<32x256xf32>
    %cst_70 = arith.constant 0.000000e+00 : f32
    %137 = vector.shape_cast %28 : vector<1x256xi1> to vector<1x256xi1>
    %138 = vector.broadcast %137 : vector<1x256xi1> to vector<32x256xi1>
    %139 = vector.broadcast %cst_70 : f32 to vector<32x256xf32>
    %140 = arith.select %138, %136, %139 : vector<32x256xi1>, vector<32x256xf32>
    %c256_71 = arith.constant 256 : index
    %c0_72 = arith.constant 0 : index
    %141 = vector.load %arg5[%c256_71, %c0_72] : memref<288x256xf32, #tpu.memory_space<vmem>>, vector<32x256xf32>
    tpu.vector_store %arg5[%c256_71, %c0_72], %140 {strides = array<i32>} : memref<288x256xf32, #tpu.memory_space<vmem>>, vector<32x256xf32>,
    %c1 = arith.constant 1 : index
    %c0_73 = arith.constant 0 : index
    %c0_74 = arith.constant 0 : index
    %142 = vector.load %arg2[%c1, %c0_73, %c0_74] : memref<6x32x288xf32, #tpu.memory_space<vmem>>, vector<1x32x288xf32>
    %143 = vector.shape_cast %142 : vector<1x32x288xf32> to vector<32x288xf32>
    %c0_75 = arith.constant 0 : index
    %c0_76 = arith.constant 0 : index
    %144 = vector.load %arg5[%c0_75, %c0_76] : memref<288x256xf32, #tpu.memory_space<vmem>>, vector<288x256xf32>
    %cst_77 = arith.constant dense<0.000000e+00> : vector<32x256xf32>
    %145 = tpu.matmul %143, %144, %cst_77 {dimension_numbers = #tpu.dot_dimension_numbers<[1], [0], [0], [1], [0, 0, 1, 1], [], []>} : vector<32x288xf32>, vector<288x256xf32>, vector<32x256xf32> -> vector<32x256xf32>
    %c1_78 = arith.constant 1 : index
    %c0_79 = arith.constant 0 : index
    %c0_80 = arith.constant 0 : index
    %146 = vector.load %arg3[%c1_78, %c0_79, %c0_80] : memref<6x32x1xf32, #tpu.memory_space<vmem>>, vector<1x32x1xf32>
    %147 = vector.shape_cast %146 : vector<1x32x1xf32> to vector<32x1xf32>
    %148 = vector.broadcast %147 : vector<32x1xf32> to vector<32x256xf32>
    %149 = arith.addf %145, %148 : vector<32x256xf32>
    %cst_81 = arith.constant 0.000000e+00 : f32
    %150 = vector.broadcast %cst_81 : f32 to vector<32x256xf32>
    %151 = arith.cmpf oge, %149, %150 : vector<32x256xf32>
    %cst_82 = arith.constant 0.00999999977 : f32
    %152 = vector.broadcast %cst_82 : f32 to vector<32x256xf32>
    %153 = arith.mulf %152, %149 : vector<32x256xf32>
    %154 = arith.select %151, %149, %153 : vector<32x256xi1>, vector<32x256xf32>
    %155 = arith.addf %154, %30 : vector<32x256xf32>
    %c17_i32_83 = arith.constant 17 : i32
    %156 = tpu.dynamic_rotate %155 by %c17_i32_83 dim 1 : vector<32x256xf32>, i32 -> vector<32x256xf32>
    %cst_84 = arith.constant 0.000000e+00 : f32
    %157 = vector.shape_cast %25 : vector<1x256xi1> to vector<1x256xi1>
    %158 = vector.broadcast %157 : vector<1x256xi1> to vector<32x256xi1>
    %159 = vector.broadcast %cst_84 : f32 to vector<32x256xf32>
    %160 = arith.select %158, %156, %159 : vector<32x256xi1>, vector<32x256xf32>
    %c0_85 = arith.constant 0 : index
    %c0_86 = arith.constant 0 : index
    %161 = vector.load %arg5[%c0_85, %c0_86] : memref<288x256xf32, #tpu.memory_space<vmem>>, vector<32x256xf32>
    tpu.vector_store %arg5[%c0_85, %c0_86], %160 {strides = array<i32>} : memref<288x256xf32, #tpu.memory_space<vmem>>, vector<32x256xf32>,
    %c16_i32_87 = arith.constant 16 : i32
    %162 = tpu.dynamic_rotate %155 by %c16_i32_87 dim 1 : vector<32x256xf32>, i32 -> vector<32x256xf32>
    %cst_88 = arith.constant 0.000000e+00 : f32
    %163 = vector.shape_cast %18 : vector<1x256xi1> to vector<1x256xi1>
    %164 = vector.broadcast %163 : vector<1x256xi1> to vector<32x256xi1>
    %165 = vector.broadcast %cst_88 : f32 to vector<32x256xf32>
    %166 = arith.select %164, %162, %165 : vector<32x256xi1>, vector<32x256xf32>
    %c32_89 = arith.constant 32 : index
    %c0_90 = arith.constant 0 : index
    %167 = vector.load %arg5[%c32_89, %c0_90] : memref<288x256xf32, #tpu.memory_space<vmem>>, vector<32x256xf32>
    tpu.vector_store %arg5[%c32_89, %c0_90], %166 {strides = array<i32>} : memref<288x256xf32, #tpu.memory_space<vmem>>, vector<32x256xf32>,
    %c15_i32_91 = arith.constant 15 : i32
    %168 = tpu.dynamic_rotate %155 by %c15_i32_91 dim 1 : vector<32x256xf32>, i32 -> vector<32x256xf32>
    %cst_92 = arith.constant 0.000000e+00 : f32
    %169 = vector.shape_cast %26 : vector<1x256xi1> to vector<1x256xi1>
    %170 = vector.broadcast %169 : vector<1x256xi1> to vector<32x256xi1>
    %171 = vector.broadcast %cst_92 : f32 to vector<32x256xf32>
    %172 = arith.select %170, %168, %171 : vector<32x256xi1>, vector<32x256xf32>
    %c64_93 = arith.constant 64 : index
    %c0_94 = arith.constant 0 : index
    %173 = vector.load %arg5[%c64_93, %c0_94] : memref<288x256xf32, #tpu.memory_space<vmem>>, vector<32x256xf32>
    tpu.vector_store %arg5[%c64_93, %c0_94], %172 {strides = array<i32>} : memref<288x256xf32, #tpu.memory_space<vmem>>, vector<32x256xf32>,
    %c1_i32_95 = arith.constant 1 : i32
    %174 = tpu.dynamic_rotate %155 by %c1_i32_95 dim 1 : vector<32x256xf32>, i32 -> vector<32x256xf32>
    %cst_96 = arith.constant 0.000000e+00 : f32
    %175 = vector.shape_cast %22 : vector<1x256xi1> to vector<1x256xi1>
    %176 = vector.broadcast %175 : vector<1x256xi1> to vector<32x256xi1>
    %177 = vector.broadcast %cst_96 : f32 to vector<32x256xf32>
    %178 = arith.select %176, %174, %177 : vector<32x256xi1>, vector<32x256xf32>
    %c96_97 = arith.constant 96 : index
    %c0_98 = arith.constant 0 : index
    %179 = vector.load %arg5[%c96_97, %c0_98] : memref<288x256xf32, #tpu.memory_space<vmem>>, vector<32x256xf32>
    tpu.vector_store %arg5[%c96_97, %c0_98], %178 {strides = array<i32>} : memref<288x256xf32, #tpu.memory_space<vmem>>, vector<32x256xf32>,
    %c128_99 = arith.constant 128 : index
    %c0_100 = arith.constant 0 : index
    %180 = vector.load %arg5[%c128_99, %c0_100] : memref<288x256xf32, #tpu.memory_space<vmem>>, vector<32x256xf32>
    tpu.vector_store %arg5[%c128_99, %c0_100], %155 {strides = array<i32>} : memref<288x256xf32, #tpu.memory_space<vmem>>, vector<32x256xf32>,
    %c255_i32_101 = arith.constant 255 : i32
    %181 = tpu.dynamic_rotate %155 by %c255_i32_101 dim 1 : vector<32x256xf32>, i32 -> vector<32x256xf32>
    %cst_102 = arith.constant 0.000000e+00 : f32
    %182 = vector.shape_cast %24 : vector<1x256xi1> to vector<1x256xi1>
    %183 = vector.broadcast %182 : vector<1x256xi1> to vector<32x256xi1>
    %184 = vector.broadcast %cst_102 : f32 to vector<32x256xf32>
    %185 = arith.select %183, %181, %184 : vector<32x256xi1>, vector<32x256xf32>
    %c160_103 = arith.constant 160 : index
    %c0_104 = arith.constant 0 : index
    %186 = vector.load %arg5[%c160_103, %c0_104] : memref<288x256xf32, #tpu.memory_space<vmem>>, vector<32x256xf32>
    tpu.vector_store %arg5[%c160_103, %c0_104], %185 {strides = array<i32>} : memref<288x256xf32, #tpu.memory_space<vmem>>, vector<32x256xf32>,
    %c241_i32_105 = arith.constant 241 : i32
    %187 = tpu.dynamic_rotate %155 by %c241_i32_105 dim 1 : vector<32x256xf32>, i32 -> vector<32x256xf32>
    %cst_106 = arith.constant 0.000000e+00 : f32
    %188 = vector.shape_cast %27 : vector<1x256xi1> to vector<1x256xi1>
    %189 = vector.broadcast %188 : vector<1x256xi1> to vector<32x256xi1>
    %190 = vector.broadcast %cst_106 : f32 to vector<32x256xf32>
    %191 = arith.select %189, %187, %190 : vector<32x256xi1>, vector<32x256xf32>
    %c192_107 = arith.constant 192 : index
    %c0_108 = arith.constant 0 : index
    %192 = vector.load %arg5[%c192_107, %c0_108] : memref<288x256xf32, #tpu.memory_space<vmem>>, vector<32x256xf32>
    tpu.vector_store %arg5[%c192_107, %c0_108], %191 {strides = array<i32>} : memref<288x256xf32, #tpu.memory_space<vmem>>, vector<32x256xf32>,
    %c240_i32_109 = arith.constant 240 : i32
    %193 = tpu.dynamic_rotate %155 by %c240_i32_109 dim 1 : vector<32x256xf32>, i32 -> vector<32x256xf32>
    %cst_110 = arith.constant 0.000000e+00 : f32
    %194 = vector.shape_cast %20 : vector<1x256xi1> to vector<1x256xi1>
    %195 = vector.broadcast %194 : vector<1x256xi1> to vector<32x256xi1>
    %196 = vector.broadcast %cst_110 : f32 to vector<32x256xf32>
    %197 = arith.select %195, %193, %196 : vector<32x256xi1>, vector<32x256xf32>
    %c224_111 = arith.constant 224 : index
    %c0_112 = arith.constant 0 : index
    %198 = vector.load %arg5[%c224_111, %c0_112] : memref<288x256xf32, #tpu.memory_space<vmem>>, vector<32x256xf32>
    tpu.vector_store %arg5[%c224_111, %c0_112], %197 {strides = array<i32>} : memref<288x256xf32, #tpu.memory_space<vmem>>, vector<32x256xf32>,
    %c239_i32_113 = arith.constant 239 : i32
    %199 = tpu.dynamic_rotate %155 by %c239_i32_113 dim 1 : vector<32x256xf32>, i32 -> vector<32x256xf32>
    %cst_114 = arith.constant 0.000000e+00 : f32
    %200 = vector.shape_cast %28 : vector<1x256xi1> to vector<1x256xi1>
    %201 = vector.broadcast %200 : vector<1x256xi1> to vector<32x256xi1>
    %202 = vector.broadcast %cst_114 : f32 to vector<32x256xf32>
    %203 = arith.select %201, %199, %202 : vector<32x256xi1>, vector<32x256xf32>
    %c256_115 = arith.constant 256 : index
    %c0_116 = arith.constant 0 : index
    %204 = vector.load %arg5[%c256_115, %c0_116] : memref<288x256xf32, #tpu.memory_space<vmem>>, vector<32x256xf32>
    tpu.vector_store %arg5[%c256_115, %c0_116], %203 {strides = array<i32>} : memref<288x256xf32, #tpu.memory_space<vmem>>, vector<32x256xf32>,
    %c2 = arith.constant 2 : index
    %c0_117 = arith.constant 0 : index
    %c0_118 = arith.constant 0 : index
    %205 = vector.load %arg2[%c2, %c0_117, %c0_118] : memref<6x32x288xf32, #tpu.memory_space<vmem>>, vector<1x32x288xf32>
    %206 = vector.shape_cast %205 : vector<1x32x288xf32> to vector<32x288xf32>
    %c0_119 = arith.constant 0 : index
    %c0_120 = arith.constant 0 : index
    %207 = vector.load %arg5[%c0_119, %c0_120] : memref<288x256xf32, #tpu.memory_space<vmem>>, vector<288x256xf32>
    %cst_121 = arith.constant dense<0.000000e+00> : vector<32x256xf32>
    %208 = tpu.matmul %206, %207, %cst_121 {dimension_numbers = #tpu.dot_dimension_numbers<[1], [0], [0], [1], [0, 0, 1, 1], [], []>} : vector<32x288xf32>, vector<288x256xf32>, vector<32x256xf32> -> vector<32x256xf32>
    %c2_122 = arith.constant 2 : index
    %c0_123 = arith.constant 0 : index
    %c0_124 = arith.constant 0 : index
    %209 = vector.load %arg3[%c2_122, %c0_123, %c0_124] : memref<6x32x1xf32, #tpu.memory_space<vmem>>, vector<1x32x1xf32>
    %210 = vector.shape_cast %209 : vector<1x32x1xf32> to vector<32x1xf32>
    %211 = vector.broadcast %210 : vector<32x1xf32> to vector<32x256xf32>
    %212 = arith.addf %208, %211 : vector<32x256xf32>
    %cst_125 = arith.constant 0.000000e+00 : f32
    %213 = vector.broadcast %cst_125 : f32 to vector<32x256xf32>
    %214 = arith.cmpf oge, %212, %213 : vector<32x256xf32>
    %cst_126 = arith.constant 0.00999999977 : f32
    %215 = vector.broadcast %cst_126 : f32 to vector<32x256xf32>
    %216 = arith.mulf %215, %212 : vector<32x256xf32>
    %217 = arith.select %214, %212, %216 : vector<32x256xi1>, vector<32x256xf32>
    %c17_i32_127 = arith.constant 17 : i32
    %218 = tpu.dynamic_rotate %217 by %c17_i32_127 dim 1 : vector<32x256xf32>, i32 -> vector<32x256xf32>
    %cst_128 = arith.constant 0.000000e+00 : f32
    %219 = vector.shape_cast %25 : vector<1x256xi1> to vector<1x256xi1>
    %220 = vector.broadcast %219 : vector<1x256xi1> to vector<32x256xi1>
    %221 = vector.broadcast %cst_128 : f32 to vector<32x256xf32>
    %222 = arith.select %220, %218, %221 : vector<32x256xi1>, vector<32x256xf32>
    %c0_129 = arith.constant 0 : index
    %c0_130 = arith.constant 0 : index
    %223 = vector.load %arg5[%c0_129, %c0_130] : memref<288x256xf32, #tpu.memory_space<vmem>>, vector<32x256xf32>
    tpu.vector_store %arg5[%c0_129, %c0_130], %222 {strides = array<i32>} : memref<288x256xf32, #tpu.memory_space<vmem>>, vector<32x256xf32>,
    %c16_i32_131 = arith.constant 16 : i32
    %224 = tpu.dynamic_rotate %217 by %c16_i32_131 dim 1 : vector<32x256xf32>, i32 -> vector<32x256xf32>
    %cst_132 = arith.constant 0.000000e+00 : f32
    %225 = vector.shape_cast %18 : vector<1x256xi1> to vector<1x256xi1>
    %226 = vector.broadcast %225 : vector<1x256xi1> to vector<32x256xi1>
    %227 = vector.broadcast %cst_132 : f32 to vector<32x256xf32>
    %228 = arith.select %226, %224, %227 : vector<32x256xi1>, vector<32x256xf32>
    %c32_133 = arith.constant 32 : index
    %c0_134 = arith.constant 0 : index
    %229 = vector.load %arg5[%c32_133, %c0_134] : memref<288x256xf32, #tpu.memory_space<vmem>>, vector<32x256xf32>
    tpu.vector_store %arg5[%c32_133, %c0_134], %228 {strides = array<i32>} : memref<288x256xf32, #tpu.memory_space<vmem>>, vector<32x256xf32>,
    %c15_i32_135 = arith.constant 15 : i32
    %230 = tpu.dynamic_rotate %217 by %c15_i32_135 dim 1 : vector<32x256xf32>, i32 -> vector<32x256xf32>
    %cst_136 = arith.constant 0.000000e+00 : f32
    %231 = vector.shape_cast %26 : vector<1x256xi1> to vector<1x256xi1>
    %232 = vector.broadcast %231 : vector<1x256xi1> to vector<32x256xi1>
    %233 = vector.broadcast %cst_136 : f32 to vector<32x256xf32>
    %234 = arith.select %232, %230, %233 : vector<32x256xi1>, vector<32x256xf32>
    %c64_137 = arith.constant 64 : index
    %c0_138 = arith.constant 0 : index
    %235 = vector.load %arg5[%c64_137, %c0_138] : memref<288x256xf32, #tpu.memory_space<vmem>>, vector<32x256xf32>
    tpu.vector_store %arg5[%c64_137, %c0_138], %234 {strides = array<i32>} : memref<288x256xf32, #tpu.memory_space<vmem>>, vector<32x256xf32>,
    %c1_i32_139 = arith.constant 1 : i32
    %236 = tpu.dynamic_rotate %217 by %c1_i32_139 dim 1 : vector<32x256xf32>, i32 -> vector<32x256xf32>
    %cst_140 = arith.constant 0.000000e+00 : f32
    %237 = vector.shape_cast %22 : vector<1x256xi1> to vector<1x256xi1>
    %238 = vector.broadcast %237 : vector<1x256xi1> to vector<32x256xi1>
    %239 = vector.broadcast %cst_140 : f32 to vector<32x256xf32>
    %240 = arith.select %238, %236, %239 : vector<32x256xi1>, vector<32x256xf32>
    %c96_141 = arith.constant 96 : index
    %c0_142 = arith.constant 0 : index
    %241 = vector.load %arg5[%c96_141, %c0_142] : memref<288x256xf32, #tpu.memory_space<vmem>>, vector<32x256xf32>
    tpu.vector_store %arg5[%c96_141, %c0_142], %240 {strides = array<i32>} : memref<288x256xf32, #tpu.memory_space<vmem>>, vector<32x256xf32>,
    %c128_143 = arith.constant 128 : index
    %c0_144 = arith.constant 0 : index
    %242 = vector.load %arg5[%c128_143, %c0_144] : memref<288x256xf32, #tpu.memory_space<vmem>>, vector<32x256xf32>
    tpu.vector_store %arg5[%c128_143, %c0_144], %217 {strides = array<i32>} : memref<288x256xf32, #tpu.memory_space<vmem>>, vector<32x256xf32>,
    %c255_i32_145 = arith.constant 255 : i32
    %243 = tpu.dynamic_rotate %217 by %c255_i32_145 dim 1 : vector<32x256xf32>, i32 -> vector<32x256xf32>
    %cst_146 = arith.constant 0.000000e+00 : f32
    %244 = vector.shape_cast %24 : vector<1x256xi1> to vector<1x256xi1>
    %245 = vector.broadcast %244 : vector<1x256xi1> to vector<32x256xi1>
    %246 = vector.broadcast %cst_146 : f32 to vector<32x256xf32>
    %247 = arith.select %245, %243, %246 : vector<32x256xi1>, vector<32x256xf32>
    %c160_147 = arith.constant 160 : index
    %c0_148 = arith.constant 0 : index
    %248 = vector.load %arg5[%c160_147, %c0_148] : memref<288x256xf32, #tpu.memory_space<vmem>>, vector<32x256xf32>
    tpu.vector_store %arg5[%c160_147, %c0_148], %247 {strides = array<i32>} : memref<288x256xf32, #tpu.memory_space<vmem>>, vector<32x256xf32>,
    %c241_i32_149 = arith.constant 241 : i32
    %249 = tpu.dynamic_rotate %217 by %c241_i32_149 dim 1 : vector<32x256xf32>, i32 -> vector<32x256xf32>
    %cst_150 = arith.constant 0.000000e+00 : f32
    %250 = vector.shape_cast %27 : vector<1x256xi1> to vector<1x256xi1>
    %251 = vector.broadcast %250 : vector<1x256xi1> to vector<32x256xi1>
    %252 = vector.broadcast %cst_150 : f32 to vector<32x256xf32>
    %253 = arith.select %251, %249, %252 : vector<32x256xi1>, vector<32x256xf32>
    %c192_151 = arith.constant 192 : index
    %c0_152 = arith.constant 0 : index
    %254 = vector.load %arg5[%c192_151, %c0_152] : memref<288x256xf32, #tpu.memory_space<vmem>>, vector<32x256xf32>
    tpu.vector_store %arg5[%c192_151, %c0_152], %253 {strides = array<i32>} : memref<288x256xf32, #tpu.memory_space<vmem>>, vector<32x256xf32>,
    %c240_i32_153 = arith.constant 240 : i32
    %255 = tpu.dynamic_rotate %217 by %c240_i32_153 dim 1 : vector<32x256xf32>, i32 -> vector<32x256xf32>
    %cst_154 = arith.constant 0.000000e+00 : f32
    %256 = vector.shape_cast %20 : vector<1x256xi1> to vector<1x256xi1>
    %257 = vector.broadcast %256 : vector<1x256xi1> to vector<32x256xi1>
    %258 = vector.broadcast %cst_154 : f32 to vector<32x256xf32>
    %259 = arith.select %257, %255, %258 : vector<32x256xi1>, vector<32x256xf32>
    %c224_155 = arith.constant 224 : index
    %c0_156 = arith.constant 0 : index
    %260 = vector.load %arg5[%c224_155, %c0_156] : memref<288x256xf32, #tpu.memory_space<vmem>>, vector<32x256xf32>
    tpu.vector_store %arg5[%c224_155, %c0_156], %259 {strides = array<i32>} : memref<288x256xf32, #tpu.memory_space<vmem>>, vector<32x256xf32>,
    %c239_i32_157 = arith.constant 239 : i32
    %261 = tpu.dynamic_rotate %217 by %c239_i32_157 dim 1 : vector<32x256xf32>, i32 -> vector<32x256xf32>
    %cst_158 = arith.constant 0.000000e+00 : f32
    %262 = vector.shape_cast %28 : vector<1x256xi1> to vector<1x256xi1>
    %263 = vector.broadcast %262 : vector<1x256xi1> to vector<32x256xi1>
    %264 = vector.broadcast %cst_158 : f32 to vector<32x256xf32>
    %265 = arith.select %263, %261, %264 : vector<32x256xi1>, vector<32x256xf32>
    %c256_159 = arith.constant 256 : index
    %c0_160 = arith.constant 0 : index
    %266 = vector.load %arg5[%c256_159, %c0_160] : memref<288x256xf32, #tpu.memory_space<vmem>>, vector<32x256xf32>
    tpu.vector_store %arg5[%c256_159, %c0_160], %265 {strides = array<i32>} : memref<288x256xf32, #tpu.memory_space<vmem>>, vector<32x256xf32>,
    %c3 = arith.constant 3 : index
    %c0_161 = arith.constant 0 : index
    %c0_162 = arith.constant 0 : index
    %267 = vector.load %arg2[%c3, %c0_161, %c0_162] : memref<6x32x288xf32, #tpu.memory_space<vmem>>, vector<1x32x288xf32>
    %268 = vector.shape_cast %267 : vector<1x32x288xf32> to vector<32x288xf32>
    %c0_163 = arith.constant 0 : index
    %c0_164 = arith.constant 0 : index
    %269 = vector.load %arg5[%c0_163, %c0_164] : memref<288x256xf32, #tpu.memory_space<vmem>>, vector<288x256xf32>
    %cst_165 = arith.constant dense<0.000000e+00> : vector<32x256xf32>
    %270 = tpu.matmul %268, %269, %cst_165 {dimension_numbers = #tpu.dot_dimension_numbers<[1], [0], [0], [1], [0, 0, 1, 1], [], []>} : vector<32x288xf32>, vector<288x256xf32>, vector<32x256xf32> -> vector<32x256xf32>
    %c3_166 = arith.constant 3 : index
    %c0_167 = arith.constant 0 : index
    %c0_168 = arith.constant 0 : index
    %271 = vector.load %arg3[%c3_166, %c0_167, %c0_168] : memref<6x32x1xf32, #tpu.memory_space<vmem>>, vector<1x32x1xf32>
    %272 = vector.shape_cast %271 : vector<1x32x1xf32> to vector<32x1xf32>
    %273 = vector.broadcast %272 : vector<32x1xf32> to vector<32x256xf32>
    %274 = arith.addf %270, %273 : vector<32x256xf32>
    %cst_169 = arith.constant 0.000000e+00 : f32
    %275 = vector.broadcast %cst_169 : f32 to vector<32x256xf32>
    %276 = arith.cmpf oge, %274, %275 : vector<32x256xf32>
    %cst_170 = arith.constant 0.00999999977 : f32
    %277 = vector.broadcast %cst_170 : f32 to vector<32x256xf32>
    %278 = arith.mulf %277, %274 : vector<32x256xf32>
    %279 = arith.select %276, %274, %278 : vector<32x256xi1>, vector<32x256xf32>
    %280 = arith.addf %279, %155 : vector<32x256xf32>
    %c17_i32_171 = arith.constant 17 : i32
    %281 = tpu.dynamic_rotate %280 by %c17_i32_171 dim 1 : vector<32x256xf32>, i32 -> vector<32x256xf32>
    %cst_172 = arith.constant 0.000000e+00 : f32
    %282 = vector.shape_cast %25 : vector<1x256xi1> to vector<1x256xi1>
    %283 = vector.broadcast %282 : vector<1x256xi1> to vector<32x256xi1>
    %284 = vector.broadcast %cst_172 : f32 to vector<32x256xf32>
    %285 = arith.select %283, %281, %284 : vector<32x256xi1>, vector<32x256xf32>
    %c0_173 = arith.constant 0 : index
    %c0_174 = arith.constant 0 : index
    %286 = vector.load %arg5[%c0_173, %c0_174] : memref<288x256xf32, #tpu.memory_space<vmem>>, vector<32x256xf32>
    tpu.vector_store %arg5[%c0_173, %c0_174], %285 {strides = array<i32>} : memref<288x256xf32, #tpu.memory_space<vmem>>, vector<32x256xf32>,
    %c16_i32_175 = arith.constant 16 : i32
    %287 = tpu.dynamic_rotate %280 by %c16_i32_175 dim 1 : vector<32x256xf32>, i32 -> vector<32x256xf32>
    %cst_176 = arith.constant 0.000000e+00 : f32
    %288 = vector.shape_cast %18 : vector<1x256xi1> to vector<1x256xi1>
    %289 = vector.broadcast %288 : vector<1x256xi1> to vector<32x256xi1>
    %290 = vector.broadcast %cst_176 : f32 to vector<32x256xf32>
    %291 = arith.select %289, %287, %290 : vector<32x256xi1>, vector<32x256xf32>
    %c32_177 = arith.constant 32 : index
    %c0_178 = arith.constant 0 : index
    %292 = vector.load %arg5[%c32_177, %c0_178] : memref<288x256xf32, #tpu.memory_space<vmem>>, vector<32x256xf32>
    tpu.vector_store %arg5[%c32_177, %c0_178], %291 {strides = array<i32>} : memref<288x256xf32, #tpu.memory_space<vmem>>, vector<32x256xf32>,
    %c15_i32_179 = arith.constant 15 : i32
    %293 = tpu.dynamic_rotate %280 by %c15_i32_179 dim 1 : vector<32x256xf32>, i32 -> vector<32x256xf32>
    %cst_180 = arith.constant 0.000000e+00 : f32
    %294 = vector.shape_cast %26 : vector<1x256xi1> to vector<1x256xi1>
    %295 = vector.broadcast %294 : vector<1x256xi1> to vector<32x256xi1>
    %296 = vector.broadcast %cst_180 : f32 to vector<32x256xf32>
    %297 = arith.select %295, %293, %296 : vector<32x256xi1>, vector<32x256xf32>
    %c64_181 = arith.constant 64 : index
    %c0_182 = arith.constant 0 : index
    %298 = vector.load %arg5[%c64_181, %c0_182] : memref<288x256xf32, #tpu.memory_space<vmem>>, vector<32x256xf32>
    tpu.vector_store %arg5[%c64_181, %c0_182], %297 {strides = array<i32>} : memref<288x256xf32, #tpu.memory_space<vmem>>, vector<32x256xf32>,
    %c1_i32_183 = arith.constant 1 : i32
    %299 = tpu.dynamic_rotate %280 by %c1_i32_183 dim 1 : vector<32x256xf32>, i32 -> vector<32x256xf32>
    %cst_184 = arith.constant 0.000000e+00 : f32
    %300 = vector.shape_cast %22 : vector<1x256xi1> to vector<1x256xi1>
    %301 = vector.broadcast %300 : vector<1x256xi1> to vector<32x256xi1>
    %302 = vector.broadcast %cst_184 : f32 to vector<32x256xf32>
    %303 = arith.select %301, %299, %302 : vector<32x256xi1>, vector<32x256xf32>
    %c96_185 = arith.constant 96 : index
    %c0_186 = arith.constant 0 : index
    %304 = vector.load %arg5[%c96_185, %c0_186] : memref<288x256xf32, #tpu.memory_space<vmem>>, vector<32x256xf32>
    tpu.vector_store %arg5[%c96_185, %c0_186], %303 {strides = array<i32>} : memref<288x256xf32, #tpu.memory_space<vmem>>, vector<32x256xf32>,
    %c128_187 = arith.constant 128 : index
    %c0_188 = arith.constant 0 : index
    %305 = vector.load %arg5[%c128_187, %c0_188] : memref<288x256xf32, #tpu.memory_space<vmem>>, vector<32x256xf32>
    tpu.vector_store %arg5[%c128_187, %c0_188], %280 {strides = array<i32>} : memref<288x256xf32, #tpu.memory_space<vmem>>, vector<32x256xf32>,
    %c255_i32_189 = arith.constant 255 : i32
    %306 = tpu.dynamic_rotate %280 by %c255_i32_189 dim 1 : vector<32x256xf32>, i32 -> vector<32x256xf32>
    %cst_190 = arith.constant 0.000000e+00 : f32
    %307 = vector.shape_cast %24 : vector<1x256xi1> to vector<1x256xi1>
    %308 = vector.broadcast %307 : vector<1x256xi1> to vector<32x256xi1>
    %309 = vector.broadcast %cst_190 : f32 to vector<32x256xf32>
    %310 = arith.select %308, %306, %309 : vector<32x256xi1>, vector<32x256xf32>
    %c160_191 = arith.constant 160 : index
    %c0_192 = arith.constant 0 : index
    %311 = vector.load %arg5[%c160_191, %c0_192] : memref<288x256xf32, #tpu.memory_space<vmem>>, vector<32x256xf32>
    tpu.vector_store %arg5[%c160_191, %c0_192], %310 {strides = array<i32>} : memref<288x256xf32, #tpu.memory_space<vmem>>, vector<32x256xf32>,
    %c241_i32_193 = arith.constant 241 : i32
    %312 = tpu.dynamic_rotate %280 by %c241_i32_193 dim 1 : vector<32x256xf32>, i32 -> vector<32x256xf32>
    %cst_194 = arith.constant 0.000000e+00 : f32
    %313 = vector.shape_cast %27 : vector<1x256xi1> to vector<1x256xi1>
    %314 = vector.broadcast %313 : vector<1x256xi1> to vector<32x256xi1>
    %315 = vector.broadcast %cst_194 : f32 to vector<32x256xf32>
    %316 = arith.select %314, %312, %315 : vector<32x256xi1>, vector<32x256xf32>
    %c192_195 = arith.constant 192 : index
    %c0_196 = arith.constant 0 : index
    %317 = vector.load %arg5[%c192_195, %c0_196] : memref<288x256xf32, #tpu.memory_space<vmem>>, vector<32x256xf32>
    tpu.vector_store %arg5[%c192_195, %c0_196], %316 {strides = array<i32>} : memref<288x256xf32, #tpu.memory_space<vmem>>, vector<32x256xf32>,
    %c240_i32_197 = arith.constant 240 : i32
    %318 = tpu.dynamic_rotate %280 by %c240_i32_197 dim 1 : vector<32x256xf32>, i32 -> vector<32x256xf32>
    %cst_198 = arith.constant 0.000000e+00 : f32
    %319 = vector.shape_cast %20 : vector<1x256xi1> to vector<1x256xi1>
    %320 = vector.broadcast %319 : vector<1x256xi1> to vector<32x256xi1>
    %321 = vector.broadcast %cst_198 : f32 to vector<32x256xf32>
    %322 = arith.select %320, %318, %321 : vector<32x256xi1>, vector<32x256xf32>
    %c224_199 = arith.constant 224 : index
    %c0_200 = arith.constant 0 : index
    %323 = vector.load %arg5[%c224_199, %c0_200] : memref<288x256xf32, #tpu.memory_space<vmem>>, vector<32x256xf32>
    tpu.vector_store %arg5[%c224_199, %c0_200], %322 {strides = array<i32>} : memref<288x256xf32, #tpu.memory_space<vmem>>, vector<32x256xf32>,
    %c239_i32_201 = arith.constant 239 : i32
    %324 = tpu.dynamic_rotate %280 by %c239_i32_201 dim 1 : vector<32x256xf32>, i32 -> vector<32x256xf32>
    %cst_202 = arith.constant 0.000000e+00 : f32
    %325 = vector.shape_cast %28 : vector<1x256xi1> to vector<1x256xi1>
    %326 = vector.broadcast %325 : vector<1x256xi1> to vector<32x256xi1>
    %327 = vector.broadcast %cst_202 : f32 to vector<32x256xf32>
    %328 = arith.select %326, %324, %327 : vector<32x256xi1>, vector<32x256xf32>
    %c256_203 = arith.constant 256 : index
    %c0_204 = arith.constant 0 : index
    %329 = vector.load %arg5[%c256_203, %c0_204] : memref<288x256xf32, #tpu.memory_space<vmem>>, vector<32x256xf32>
    tpu.vector_store %arg5[%c256_203, %c0_204], %328 {strides = array<i32>} : memref<288x256xf32, #tpu.memory_space<vmem>>, vector<32x256xf32>,
    %c4 = arith.constant 4 : index
    %c0_205 = arith.constant 0 : index
    %c0_206 = arith.constant 0 : index
    %330 = vector.load %arg2[%c4, %c0_205, %c0_206] : memref<6x32x288xf32, #tpu.memory_space<vmem>>, vector<1x32x288xf32>
    %331 = vector.shape_cast %330 : vector<1x32x288xf32> to vector<32x288xf32>
    %c0_207 = arith.constant 0 : index
    %c0_208 = arith.constant 0 : index
    %332 = vector.load %arg5[%c0_207, %c0_208] : memref<288x256xf32, #tpu.memory_space<vmem>>, vector<288x256xf32>
    %cst_209 = arith.constant dense<0.000000e+00> : vector<32x256xf32>
    %333 = tpu.matmul %331, %332, %cst_209 {dimension_numbers = #tpu.dot_dimension_numbers<[1], [0], [0], [1], [0, 0, 1, 1], [], []>} : vector<32x288xf32>, vector<288x256xf32>, vector<32x256xf32> -> vector<32x256xf32>
    %c4_210 = arith.constant 4 : index
    %c0_211 = arith.constant 0 : index
    %c0_212 = arith.constant 0 : index
    %334 = vector.load %arg3[%c4_210, %c0_211, %c0_212] : memref<6x32x1xf32, #tpu.memory_space<vmem>>, vector<1x32x1xf32>
    %335 = vector.shape_cast %334 : vector<1x32x1xf32> to vector<32x1xf32>
    %336 = vector.broadcast %335 : vector<32x1xf32> to vector<32x256xf32>
    %337 = arith.addf %333, %336 : vector<32x256xf32>
    %cst_213 = arith.constant 0.000000e+00 : f32
    %338 = vector.broadcast %cst_213 : f32 to vector<32x256xf32>
    %339 = arith.cmpf oge, %337, %338 : vector<32x256xf32>
    %cst_214 = arith.constant 0.00999999977 : f32
    %340 = vector.broadcast %cst_214 : f32 to vector<32x256xf32>
    %341 = arith.mulf %340, %337 : vector<32x256xf32>
    %342 = arith.select %339, %337, %341 : vector<32x256xi1>, vector<32x256xf32>
    %c17_i32_215 = arith.constant 17 : i32
    %343 = tpu.dynamic_rotate %342 by %c17_i32_215 dim 1 : vector<32x256xf32>, i32 -> vector<32x256xf32>
    %cst_216 = arith.constant 0.000000e+00 : f32
    %344 = vector.shape_cast %25 : vector<1x256xi1> to vector<1x256xi1>
    %345 = vector.broadcast %344 : vector<1x256xi1> to vector<32x256xi1>
    %346 = vector.broadcast %cst_216 : f32 to vector<32x256xf32>
    %347 = arith.select %345, %343, %346 : vector<32x256xi1>, vector<32x256xf32>
    %c0_217 = arith.constant 0 : index
    %c0_218 = arith.constant 0 : index
    %348 = vector.load %arg5[%c0_217, %c0_218] : memref<288x256xf32, #tpu.memory_space<vmem>>, vector<32x256xf32>
    tpu.vector_store %arg5[%c0_217, %c0_218], %347 {strides = array<i32>} : memref<288x256xf32, #tpu.memory_space<vmem>>, vector<32x256xf32>,
    %c16_i32_219 = arith.constant 16 : i32
    %349 = tpu.dynamic_rotate %342 by %c16_i32_219 dim 1 : vector<32x256xf32>, i32 -> vector<32x256xf32>
    %cst_220 = arith.constant 0.000000e+00 : f32
    %350 = vector.shape_cast %18 : vector<1x256xi1> to vector<1x256xi1>
    %351 = vector.broadcast %350 : vector<1x256xi1> to vector<32x256xi1>
    %352 = vector.broadcast %cst_220 : f32 to vector<32x256xf32>
    %353 = arith.select %351, %349, %352 : vector<32x256xi1>, vector<32x256xf32>
    %c32_221 = arith.constant 32 : index
    %c0_222 = arith.constant 0 : index
    %354 = vector.load %arg5[%c32_221, %c0_222] : memref<288x256xf32, #tpu.memory_space<vmem>>, vector<32x256xf32>
    tpu.vector_store %arg5[%c32_221, %c0_222], %353 {strides = array<i32>} : memref<288x256xf32, #tpu.memory_space<vmem>>, vector<32x256xf32>,
    %c15_i32_223 = arith.constant 15 : i32
    %355 = tpu.dynamic_rotate %342 by %c15_i32_223 dim 1 : vector<32x256xf32>, i32 -> vector<32x256xf32>
    %cst_224 = arith.constant 0.000000e+00 : f32
    %356 = vector.shape_cast %26 : vector<1x256xi1> to vector<1x256xi1>
    %357 = vector.broadcast %356 : vector<1x256xi1> to vector<32x256xi1>
    %358 = vector.broadcast %cst_224 : f32 to vector<32x256xf32>
    %359 = arith.select %357, %355, %358 : vector<32x256xi1>, vector<32x256xf32>
    %c64_225 = arith.constant 64 : index
    %c0_226 = arith.constant 0 : index
    %360 = vector.load %arg5[%c64_225, %c0_226] : memref<288x256xf32, #tpu.memory_space<vmem>>, vector<32x256xf32>
    tpu.vector_store %arg5[%c64_225, %c0_226], %359 {strides = array<i32>} : memref<288x256xf32, #tpu.memory_space<vmem>>, vector<32x256xf32>,
    %c1_i32_227 = arith.constant 1 : i32
    %361 = tpu.dynamic_rotate %342 by %c1_i32_227 dim 1 : vector<32x256xf32>, i32 -> vector<32x256xf32>
    %cst_228 = arith.constant 0.000000e+00 : f32
    %362 = vector.shape_cast %22 : vector<1x256xi1> to vector<1x256xi1>
    %363 = vector.broadcast %362 : vector<1x256xi1> to vector<32x256xi1>
    %364 = vector.broadcast %cst_228 : f32 to vector<32x256xf32>
    %365 = arith.select %363, %361, %364 : vector<32x256xi1>, vector<32x256xf32>
    %c96_229 = arith.constant 96 : index
    %c0_230 = arith.constant 0 : index
    %366 = vector.load %arg5[%c96_229, %c0_230] : memref<288x256xf32, #tpu.memory_space<vmem>>, vector<32x256xf32>
    tpu.vector_store %arg5[%c96_229, %c0_230], %365 {strides = array<i32>} : memref<288x256xf32, #tpu.memory_space<vmem>>, vector<32x256xf32>,
    %c128_231 = arith.constant 128 : index
    %c0_232 = arith.constant 0 : index
    %367 = vector.load %arg5[%c128_231, %c0_232] : memref<288x256xf32, #tpu.memory_space<vmem>>, vector<32x256xf32>
    tpu.vector_store %arg5[%c128_231, %c0_232], %342 {strides = array<i32>} : memref<288x256xf32, #tpu.memory_space<vmem>>, vector<32x256xf32>,
    %c255_i32_233 = arith.constant 255 : i32
    %368 = tpu.dynamic_rotate %342 by %c255_i32_233 dim 1 : vector<32x256xf32>, i32 -> vector<32x256xf32>
    %cst_234 = arith.constant 0.000000e+00 : f32
    %369 = vector.shape_cast %24 : vector<1x256xi1> to vector<1x256xi1>
    %370 = vector.broadcast %369 : vector<1x256xi1> to vector<32x256xi1>
    %371 = vector.broadcast %cst_234 : f32 to vector<32x256xf32>
    %372 = arith.select %370, %368, %371 : vector<32x256xi1>, vector<32x256xf32>
    %c160_235 = arith.constant 160 : index
    %c0_236 = arith.constant 0 : index
    %373 = vector.load %arg5[%c160_235, %c0_236] : memref<288x256xf32, #tpu.memory_space<vmem>>, vector<32x256xf32>
    tpu.vector_store %arg5[%c160_235, %c0_236], %372 {strides = array<i32>} : memref<288x256xf32, #tpu.memory_space<vmem>>, vector<32x256xf32>,
    %c241_i32_237 = arith.constant 241 : i32
    %374 = tpu.dynamic_rotate %342 by %c241_i32_237 dim 1 : vector<32x256xf32>, i32 -> vector<32x256xf32>
    %cst_238 = arith.constant 0.000000e+00 : f32
    %375 = vector.shape_cast %27 : vector<1x256xi1> to vector<1x256xi1>
    %376 = vector.broadcast %375 : vector<1x256xi1> to vector<32x256xi1>
    %377 = vector.broadcast %cst_238 : f32 to vector<32x256xf32>
    %378 = arith.select %376, %374, %377 : vector<32x256xi1>, vector<32x256xf32>
    %c192_239 = arith.constant 192 : index
    %c0_240 = arith.constant 0 : index
    %379 = vector.load %arg5[%c192_239, %c0_240] : memref<288x256xf32, #tpu.memory_space<vmem>>, vector<32x256xf32>
    tpu.vector_store %arg5[%c192_239, %c0_240], %378 {strides = array<i32>} : memref<288x256xf32, #tpu.memory_space<vmem>>, vector<32x256xf32>,
    %c240_i32_241 = arith.constant 240 : i32
    %380 = tpu.dynamic_rotate %342 by %c240_i32_241 dim 1 : vector<32x256xf32>, i32 -> vector<32x256xf32>
    %cst_242 = arith.constant 0.000000e+00 : f32
    %381 = vector.shape_cast %20 : vector<1x256xi1> to vector<1x256xi1>
    %382 = vector.broadcast %381 : vector<1x256xi1> to vector<32x256xi1>
    %383 = vector.broadcast %cst_242 : f32 to vector<32x256xf32>
    %384 = arith.select %382, %380, %383 : vector<32x256xi1>, vector<32x256xf32>
    %c224_243 = arith.constant 224 : index
    %c0_244 = arith.constant 0 : index
    %385 = vector.load %arg5[%c224_243, %c0_244] : memref<288x256xf32, #tpu.memory_space<vmem>>, vector<32x256xf32>
    tpu.vector_store %arg5[%c224_243, %c0_244], %384 {strides = array<i32>} : memref<288x256xf32, #tpu.memory_space<vmem>>, vector<32x256xf32>,
    %c239_i32_245 = arith.constant 239 : i32
    %386 = tpu.dynamic_rotate %342 by %c239_i32_245 dim 1 : vector<32x256xf32>, i32 -> vector<32x256xf32>
    %cst_246 = arith.constant 0.000000e+00 : f32
    %387 = vector.shape_cast %28 : vector<1x256xi1> to vector<1x256xi1>
    %388 = vector.broadcast %387 : vector<1x256xi1> to vector<32x256xi1>
    %389 = vector.broadcast %cst_246 : f32 to vector<32x256xf32>
    %390 = arith.select %388, %386, %389 : vector<32x256xi1>, vector<32x256xf32>
    %c256_247 = arith.constant 256 : index
    %c0_248 = arith.constant 0 : index
    %391 = vector.load %arg5[%c256_247, %c0_248] : memref<288x256xf32, #tpu.memory_space<vmem>>, vector<32x256xf32>
    tpu.vector_store %arg5[%c256_247, %c0_248], %390 {strides = array<i32>} : memref<288x256xf32, #tpu.memory_space<vmem>>, vector<32x256xf32>,
    %c5 = arith.constant 5 : index
    %c0_249 = arith.constant 0 : index
    %c0_250 = arith.constant 0 : index
    %392 = vector.load %arg2[%c5, %c0_249, %c0_250] : memref<6x32x288xf32, #tpu.memory_space<vmem>>, vector<1x32x288xf32>
    %393 = vector.shape_cast %392 : vector<1x32x288xf32> to vector<32x288xf32>
    %c0_251 = arith.constant 0 : index
    %c0_252 = arith.constant 0 : index
    %394 = vector.load %arg5[%c0_251, %c0_252] : memref<288x256xf32, #tpu.memory_space<vmem>>, vector<288x256xf32>
    %cst_253 = arith.constant dense<0.000000e+00> : vector<32x256xf32>
    %395 = tpu.matmul %393, %394, %cst_253 {dimension_numbers = #tpu.dot_dimension_numbers<[1], [0], [0], [1], [0, 0, 1, 1], [], []>} : vector<32x288xf32>, vector<288x256xf32>, vector<32x256xf32> -> vector<32x256xf32>
    %c5_254 = arith.constant 5 : index
    %c0_255 = arith.constant 0 : index
    %c0_256 = arith.constant 0 : index
    %396 = vector.load %arg3[%c5_254, %c0_255, %c0_256] : memref<6x32x1xf32, #tpu.memory_space<vmem>>, vector<1x32x1xf32>
    %397 = vector.shape_cast %396 : vector<1x32x1xf32> to vector<32x1xf32>
    %398 = vector.broadcast %397 : vector<32x1xf32> to vector<32x256xf32>
    %399 = arith.addf %395, %398 : vector<32x256xf32>
    %cst_257 = arith.constant 0.000000e+00 : f32
    %400 = vector.broadcast %cst_257 : f32 to vector<32x256xf32>
    %401 = arith.cmpf oge, %399, %400 : vector<32x256xf32>
    %cst_258 = arith.constant 0.00999999977 : f32
    %402 = vector.broadcast %cst_258 : f32 to vector<32x256xf32>
    %403 = arith.mulf %402, %399 : vector<32x256xf32>
    %404 = arith.select %401, %399, %403 : vector<32x256xi1>, vector<32x256xf32>
    %405 = arith.addf %404, %280 : vector<32x256xf32>
    %406 = arith.addf %405, %30 : vector<32x256xf32>
    %c0_259 = arith.constant 0 : index
    %c0_260 = arith.constant 0 : index
    %c0_261 = arith.constant 0 : index
    %407 = vector.load %arg4[%c0_259, %c0_260, %c0_261] : memref<1x32x256xf32, #tpu.memory_space<vmem>>, vector<1x32x256xf32>
    %408 = vector.shape_cast %407 : vector<1x32x256xf32> to vector<32x256xf32>
    %409 = vector.shape_cast %406 : vector<32x256xf32> to vector<1x32x256xf32>
    tpu.vector_store %arg4[%c0_259, %c0_260, %c0_261], %409 {strides = array<i32>} : memref<1x32x256xf32, #tpu.memory_space<vmem>>, vector<1x32x256xf32>,
    return
  }
  func.func @transform_0(%arg0: i32) -> (i32, i32, i32) {
    %c0_i32 = arith.constant 0 : i32
    %c0_i32_0 = arith.constant 0 : i32
    %c0_i32_1 = arith.constant 0 : i32
    return %arg0, %c0_i32, %c0_i32_0 : i32, i32, i32
  }
  func.func @transform_1(%arg0: i32) -> (i32, i32, i32) {
    %c0_i32 = arith.constant 0 : i32
    %c0_i32_0 = arith.constant 0 : i32
    %c0_i32_1 = arith.constant 0 : i32
    %c0_i32_2 = arith.constant 0 : i32
    return %c0_i32, %c0_i32_0, %c0_i32_1 : i32, i32, i32
  }
  func.func @transform_2(%arg0: i32) -> (i32, i32, i32) {
    %c0_i32 = arith.constant 0 : i32
    %c0_i32_0 = arith.constant 0 : i32
    %c0_i32_1 = arith.constant 0 : i32
    %c0_i32_2 = arith.constant 0 : i32
    return %c0_i32, %c0_i32_0, %c0_i32_1 : i32, i32, i32
  }
  func.func @transform_3(%arg0: i32) -> (i32, i32, i32) {
    %c0_i32 = arith.constant 0 : i32
    %c0_i32_0 = arith.constant 0 : i32
    %c0_i32_1 = arith.constant 0 : i32
    return %arg0, %c0_i32, %c0_i32_0 : i32, i32, i32
  }
}

</mosaic_0001>

<bundles_post_ra>
// kernel: tpu_custom_call.1
= control target key start
LH: loop header
LB: loop body
LE: loop exit
PB: predicated region body
PF: predicated region fallthrough
CT: control target
= control target key end

     0   :  { %8 = vsyncpa [#allocation4], 0  ;;  %s8540_s0 = inlined_call_operand.vmem [shape: f32[2,32,256], index: 0, kind: input, shape index: {}]   ;;  %s8541_s1 = inlined_call_operand.hbm [shape: f32[6,32,288], index: 1, kind: input, shape index: {}]   ;;  %s8542_s2 = inlined_call_operand.vmem [shape: f32[6,32,1], index: 2, kind: input, shape index: {}]   ;;  %s8543_s3 = inlined_call_operand.hbm [shape: f32[2,32,256], index: 3, kind: output, shape index: {}]  }
   0x1   :  { %9 = vsyncpa [#allocation5], 0 }
   0x2   :  { %11 = vsyncpa [#allocation5 + $0x1], 0  ;;  %s6578_s12 = smov 0   ;;  %s6580_s13 = smov 0  }
   0x3   :  { %s6582_s14 = smov 0   ;;  %s6584_s15 = smov 0  }
   0x4 LB: > { %s6599_s16 = sadd.s32 4294967295, %s6541_s15   ;;  %s4314_s17 = sadd.s32 4294967294, %s6541_s15   ;;  %s6541_s15 = sphi %s6584_s15, %s8880_s15   ;;  %s6537_s14 = sphi %s6582_s14, %s8879_s14   ;;  %s6533_s13 = sphi %s6580_s13, %s8878_s13   ;;  %s6529_s12 = sphi %s6578_s12, %s8877_s12  }
   0x5   : > { %s6603_s18 = sadd.s32 1, %s6541_s15   ;;  %s92_s19 = sadd.s32 1, %s6537_s14 }
   0x6   : > { %s89_s20 = ssub.s32 %s6541_s15, %s6603_s18  ;;  %p102_p0 = scmp.ne.s32.totalorder %s6537_s14, %s6533_s13 }
   0x7   : > { %p90_p1 = scmp.eq.s32.totalorder %s89_s20, 0  ;;  %p103_p2 = scmp.eq.s32.totalorder %s6599_s16, 1 }
   0x8   : > { %p108_p3 = scmp.ne.s32.totalorder %s6533_s13, %s6529_s12  ;;  %p109_p4 = scmp.eq.s32.totalorder %s4314_s17, 1 }
   0x9   : > { %s6614_s21 = scalar_select %p90_p1, %s6537_s14, %s92_s19  }
   0xa   : > { %p6616_p5 = por %p103_p2, %p102_p0  ;;  %p6620_p6 = por %p109_p4, %p108_p3 }
   0xb   : > { %p4315_p7 = scmp.ge.s32.totalorder %s6541_s15, 1  ;;  %p116_p8 = scmp.lt.s32.totalorder %s6541_s15, 3 }
   0xc   : > { %s8555_s22 = scalar_select %p6616_p5, 1, 0 }
   0xd   : > { %s8556_s23 = scalar_select %p6620_p6, 1, 0 }
   0xe   : > { %p8544_p9 = scmp.eq.s32.totalorder %s6599_s16, 0  ;;  %p6627_p10 = pnand %p4315_p7, %p116_p8 }
   0xf   : > { %s6543_s25 = smov [#allocation3]   ;;  %s6447_s30 = scalar_lea.hbm %s8541_s1, 9216 }
  0x10   : > { %s8557_s24 = scalar_select %p6627_p10, 1, 0 }
  0x11   : > { %s128_s26 = sshll.u32 %s6543_s25, 4  ;;  %p5412_p11 = pneg %p6627_p10  ;;  %s129_s26 = int_to_ptr.vmem [resolvable:$true] %s128_s26 }
  0x12   : > { %p6448_p13 = scmp.ne.s32.totalorder %s8541_s1, %s6447_s30  ;;  %p6454_p3 = scmp.lt.u32.totalorder %s6447_s30, %s8541_s1 }
  0x13   : > { %p6635_p12 = pnand %p8544_p9, %p5412_p11 }
  0x15   : > { %p6449_p0 = pneg %p6635_p12 }
  0x17   : > { %p6450_p1 = pnand %p6449_p0, %p6448_p13 }
  0x19   : > { %p6451_p2 = pneg %p6450_p1 }
  0x1b   : > { %p6456_p4 = pnand %p6454_p3, %p6451_p2 }
  0x1d   : > { %6459 = shalt.err (!%p6456_p4)
}
  0x1e   : > { %s6460_s8 = scalar_lea.vmem %s129_s26, 9216  ;;  %p6468_p9 = scmp.lt.s32.totalorder %s129_s26, %s129_s26 }
  0x1f   : > { %p6461_p7 = scmp.ne.s32.totalorder %s129_s26, %s6460_s8  ;;  %p6469_p6 = scmp.lt.s32.totalorder %s6460_s8, %s6460_s8 }
  0x21   : > { %p6463_p8 = pnand %p6461_p7, %p6449_p0  ;;  %p6470_p5 = por %p6469_p6, %p6468_p9 }
  0x23   : > { %p6464_p11 = pneg %p6463_p8 }
  0x25   : > { %p6471_p10 = pnand %p6470_p5, %p6464_p11 }
  0x27   : > { %6474 = shalt.err (!%p6471_p10)
}
  0x28   : > { %s6544_s9 = smov 384   ;;  %s6545_s10 = smov 24  }
  0x29   : > { %5415 = dma.hbm_to_vmem [thread:$0]  (!%p6635_p12), %s8541_s1, 9216, %s129_s26, [#allocation4], %s6544_s9, %s6544_s9, %s6545_s10  }
  0x2a   : > { %p8559_p13 = scmp.ne.s32.totalorder %s8557_s24, 0 }
  0x2b   : > { %p8560_p1 = scmp.eq.s32.totalorder (!%p8559_p13), %s6599_s16, 0 }
  0x2c   : > { %155 = sbr.rel (%p8559_p13) target bundleno = 2659 (0xa63), region = 32 }
  0x33   : > { %6520 = dma.done.wait (%p8560_p1), [#allocation4], 9216   ;;  %p8561_p0 = pmov %p8560_p1 }
  0x34   : > { %p179_p5 = scmp.lt.s32.totalorder %s6599_s16, 1  ;;  %s6546_s24 = smov 17   ;;  %v604_v12 = vld [vmem:[#allocation3 + $0x8] sm:$0xff]  ;;  %v687_v13 = vld [vmem:[%s8542_s2] sm:$0xff]  ;;  %v6554_v15 = vmov 0   ;;  %v689_v16 = vld [vmem:[%s8542_s2 + $0x10] sm:$0xff]  ;;  %v184_v18 = vlaneseq }
  0x35   : > { %6522 = vsyncadd (%p8561_p0), [#allocation4], 4294958080  ;;  %s6547_s26 = smov 16   ;;  %s6548_s29 = smov 15   ;;  %788 = vmatprep.mubr.f32.mxu0 %v604_v12  ;;  %v688_v14 = vld [vmem:[%s8542_s2 + $0x8] sm:$0xff]  ;;  %5629 = vset.pattern.permute.xlu0 %v6554_v15  ;;  %v690_v17 = vld [vmem:[%s8542_s2 + $0x18] sm:$0xff] }
  0x36   : > { %s180_s19 = scalar_select %p179_p5, %s6599_s16, 1  ;;  %5630 = vset.pattern.permute.xlu1 %v6554_v15  ;;  %v6744_v19 = vand.u32 127, %v184_v18 }
  0x37   : > { %s6549_s30 = smov 1   ;;  %s6550_s4 = smov 127  }
  0x38   : > { %s4372_s20 = sshll.u32 %s180_s19, 6  ;;  %s6551_s5 = smov 113   ;;  %v6747_v20 = vadd.s32 128, %v6744_v19  ;;  %v191_v21 = vand.u32 15, %v6744_v19  ;;  %vm211_vm0 = vcmp.ge.s32.totalorder %v6744_v19, 16  ;;  %vm251_vm2 = vcmp.lt.s32.totalorder %v6744_v19, 17 }
  0x39   : > { %s6666_s28 = scalar_lea.vmem %s8540_s0, %s4372_s20  ;;  %s6552_s6 = smov 112   ;;  %vm8553_vm5 = vcmp.lt.s32.totalorder %v6744_v19, 16  ;;  %vm8550_vm8 = vcmp.lt.s32.totalorder %v6744_v19, 15  ;;  %vm6825_vm9 = vmpackc.low %vm211_vm0, %vm211_vm0  ;;  %vm8547_vm14 = vcmp.lt.s32.totalorder %v6744_v19, 1 }
  0x3a   : > { %v6669_v0 = vld [vmem:[%s6666_s28 + $0x20] sm:$0xff]  ;;  %v6672_v1 = vld [vmem:[%s6666_s28 + $0x30] sm:$0xff]  ;;  %v6683_v5 = vld [vmem:[%s6666_s28 + $0x28] sm:$0xff]  ;;  %s6553_s7 = smov 111   ;;  %v198_v24 = vand.u32 15, %v6747_v20  ;;  %vm6754_vm1 = vcmp.ge.s32.totalorder %v191_v21, 1 }
  0x3b   : > { %v6675_v2 = vld [vmem:[%s6666_s28] sm:$0xff]  ;;  %v5479_v3 = vpack.i.bf16 %v6672_v1, %v6669_v0  ;;  %v6680_v4 = vld [vmem:[%s6666_s28 + $0x10] sm:$0xff]  ;;  %v6686_v6 = vld [vmem:[%s6666_s28 + $0x38] sm:$0xff]  ;;  %vm6837_vm11 = vcmp.lt.s32.totalorder %v191_v21, 15  ;;  %s4373_s27 = sshll.u32 %s6599_s16, 10  ;;  %p8875_p9 = scmp.ne.s32.totalorder %s8555_s22, 0 }
  0x3c   : > { %v5469_v7 = vpack.i.bf16 %v6680_v4, %v6675_v2  ;;  %v6691_v8 = vld [vmem:[%s6666_s28 + $0x8] sm:$0xff]  ;;  %v6694_v9 = vld [vmem:[%s6666_s28 + $0x18] sm:$0xff]  ;;  %v5484_v10 = vpack.i.bf16 %v6686_v6, %v6683_v5  ;;  %vm6761_vm3 = vcmp.ge.s32.totalorder %v198_v24, 1  ;;  %vm219_vm4 = vmand %vm211_vm0, %vm6754_vm1  ;;  %vm6831_vm10 = vcmp.lt.s32.totalorder %v198_v24, 15  ;;  %s8489_s11 = scalar_lea.hbm %s8543_s3, %s4373_s27 }
  0x3d   : > { %5480 = vrot.lane.b32.xlu1 %v5479_v3, %s6546_s24  ;;  %v5474_v11 = vpack.i.bf16 %v6694_v9, %v6691_v8  ;;  %vm6781_vm6 = vmpackc.low %vm6761_vm3, %vm6761_vm3 }
  0x3e   : > { %5470 = vrot.lane.b32.xlu0 %v5469_v7, %s6546_s24  ;;  %vm6789_vm7 = vmpackc.low %vm219_vm4, %vm219_vm4  ;;  %vm8549_vm4 = vcmp.lt.s32.totalorder %v6744_v19, 113 }
  0x3f   : > { %vm6854_vm12 = vmpackc.low %vm6831_vm10, %vm6831_vm10 }
  0x40   : > { %vm221_vm13 = vmand %vm211_vm0, %vm6837_vm11 }
  0x41   : > { %5485 = vrot.lane.b32.xlu1 %v5484_v10, %s6546_s24  ;;  %vm6875_vm15 = vmpackc.low %vm221_vm13, %vm221_vm13  ;;  %vm214_vm13 = vcmp.lt.s32.totalorder %v6747_v20, 240 }
  0x42   : > { %5475 = vrot.lane.b32.xlu0 %v5474_v11, %s6546_s24  ;;  %vm6900_vm0 = vmpackc.low %vm6754_vm1, %vm6754_vm1  ;;  %vm8548_vm1 = vcmp.lt.s32.totalorder %v6744_v19, 127 }
  0x45   : > { %5495 = vrot.lane.b32.xlu1 %v5474_v11, %s6547_s26 }
  0x46   : > { %5490 = vrot.lane.b32.xlu0 %v5469_v7, %s6547_s26 }
  0x49   : > { %5505 = vrot.lane.b32.xlu1 %v5484_v10, %s6547_s26 }
  0x4a   : > { %5500 = vrot.lane.b32.xlu0 %v5479_v3, %s6547_s26 }
  0x4d   : > { %5515 = vrot.lane.b32.xlu1 %v5474_v11, %s6548_s29 }
  0x4e   : > { %5510 = vrot.lane.b32.xlu0 %v5469_v7, %s6548_s29 }
  0x51   : > { %5525 = vrot.lane.b32.xlu1 %v5484_v10, %s6548_s29 }
  0x52   : > { %5520 = vrot.lane.b32.xlu0 %v5479_v3, %s6548_s29 }
  0x55   : > { %5535 = vrot.lane.b32.xlu1 %v5474_v11, %s6549_s30 }
  0x56   : > { %5530 = vrot.lane.b32.xlu0 %v5469_v7, %s6549_s30 }
  0x59   : > { %5545 = vrot.lane.b32.xlu1 %v5484_v10, %s6549_s30 }
  0x5a   : > { %5540 = vrot.lane.b32.xlu0 %v5479_v3, %s6549_s30 }
  0x5d   : > { %5555 = vrot.lane.b32.xlu1 %v5474_v11, %s6550_s4 }
  0x5e   : > { %5550 = vrot.lane.b32.xlu0 %v5469_v7, %s6550_s4 }
  0x61   : > { %5565 = vrot.lane.b32.xlu1 %v5484_v10, %s6550_s4 }
  0x62   : > { %5560 = vrot.lane.b32.xlu0 %v5479_v3, %s6550_s4 }
  0x65   : > { %5575 = vrot.lane.b32.xlu1 %v5474_v11, %s6551_s5 }
  0x66   : > { %5570 = vrot.lane.b32.xlu0 %v5469_v7, %s6551_s5 }
  0x69   : > { %5585 = vrot.lane.b32.xlu1 %v5484_v10, %s6551_s5 }
  0x6a   : > { %5580 = vrot.lane.b32.xlu0 %v5479_v3, %s6551_s5 }
  0x6d   : > { %5595 = vrot.lane.b32.xlu1 %v5474_v11, %s6552_s6 }
  0x6e   : > { %5590 = vrot.lane.b32.xlu0 %v5469_v7, %s6552_s6 }
  0x71   : > { %5605 = vrot.lane.b32.xlu1 %v5484_v10, %s6552_s6 }
  0x72   : > { %5600 = vrot.lane.b32.xlu0 %v5479_v3, %s6552_s6 }
  0x75   : > { %5615 = vrot.lane.b32.xlu1 %v5474_v11, %s6553_s7 }
  0x76   : > { %5610 = vrot.lane.b32.xlu0 %v5469_v7, %s6553_s7 }
  0x79   : > { %5625 = vrot.lane.b32.xlu1 %v5484_v10, %s6553_s7 }
  0x7a   : > { %5620 = vrot.lane.b32.xlu0 %v5479_v3, %s6553_s7 }
  0x7d   : > { %698 = vperm.xlu1 %5630, %v688_v14  }
  0x7e   : > { %693 = vperm.xlu0 %5629, %v687_v13  }
  0x81   : > { %703 = vperm.xlu1 %5630, %v689_v16  }
  0x82   : > { %708 = vperm.xlu0 %5629, %v690_v17  }
  0xaf   : > { %v5481_v22 = vpop.permute.xlu1 %5480 }
  0xb0   : > { %v5471_v23 = vpop.permute.xlu0 %5470  ;;  %v5483_v25 = vunpack.i.h.bf16 %v5481_v22  ;;  %v5482_v26 = vunpack.i.l.bf16 %v5481_v22 }
  0xb1   : > { %v5473_v33 = vunpack.i.h.bf16 %v5471_v23  ;;  %v5472_v34 = vunpack.i.l.bf16 %v5471_v23 }
  0xb3   : > { %v5486_v28 = vpop.permute.xlu1 %5485 }
  0xb4   : > { %v5488_v29 = vunpack.i.h.bf16 %v5486_v28  ;;  %v5487_v30 = vunpack.i.l.bf16 %v5486_v28  ;;  %v5476_v31 = vpop.permute.xlu0 %5475 }
  0xb5   : > { %v5478_v35 = vunpack.i.h.bf16 %v5476_v31  ;;  %v5477_v36 = vunpack.i.l.bf16 %v5476_v31 }
  0xb6   : > { %v254_v37 = vsel %vm251_vm2, %v5482_v26, %v5487_v30  ;;  %v255_v38 = vsel %vm251_vm2, %v5483_v25, %v5488_v29  ;;  %v258_v53 = vsel %vm251_vm2, %v5487_v30, %v5482_v26  ;;  %v259_v54 = vsel %vm251_vm2, %v5488_v29, %v5483_v25 }
  0xb7   : > { %v252_v39 = vsel %vm251_vm2, %v5472_v34, %v5477_v36  ;;  %v253_v40 = vsel %vm251_vm2, %v5473_v33, %v5478_v35  ;;  %v256_v42 = vsel %vm251_vm2, %v5477_v36, %v5472_v34  ;;  %v257_v43 = vsel %vm251_vm2, %v5478_v35, %v5473_v33  ;;  %v5496_v44 = vpop.permute.xlu1 %5495 }
  0xb8   : > { %v4710_v45 = vpack.c.bf16 %v253_v40, %v252_v39  ;;  %v4713_v46 = vpack.c.bf16 %v257_v43, %v256_v42  ;;  %v5498_v48 = vunpack.i.h.bf16 %v5496_v44  ;;  %v5497_v49 = vunpack.i.l.bf16 %v5496_v44  ;;  %v5491_v50 = vpop.permute.xlu0 %5490 }
  0xb9   : > { %v5493_v51 = vunpack.i.h.bf16 %v5491_v50  ;;  %v5492_v52 = vunpack.i.l.bf16 %v5491_v50  ;;  %v4716_v55 = vpack.c.bf16 %v255_v38, %v254_v37  ;;  %v4719_v7 = vpack.c.bf16 %v259_v54, %v258_v53 }
  0xba   : > { %4712 = vmatprep.subr.msk.bf16.mxu0 %vm6781_vm6, %v4710_v45 }
  0xbb   : > { %4715 = vmatpush1.bf16.msk.msra.mxu0 %vm6789_vm7, %v4713_v46  ;;  %v302_v56 = vsel %vm8553_vm5, %v5498_v48, %v5493_v51  ;;  %v5506_v57 = vpop.permute.xlu1 %5505  ;;  %v297_v58 = vsel %vm8553_vm5, %v5492_v52, %v5497_v49  ;;  %v298_v59 = vsel %vm8553_vm5, %v5493_v51, %v5498_v48  ;;  %v301_v60 = vsel %vm8553_vm5, %v5497_v49, %v5492_v52 }
  0xbc   : > { %4718 = vmatprep.subr.msk.bf16.mxu0 %vm6781_vm6, %v4716_v55  ;;  %v5508_v61 = vunpack.i.h.bf16 %v5506_v57  ;;  %v5507_v62 = vunpack.i.l.bf16 %v5506_v57  ;;  %v5501_v63 = vpop.permute.xlu0 %5500  ;;  %v4722_v3 = vpack.c.bf16 %v298_v59, %v297_v58  ;;  %v4724_v13 = vpack.c.bf16 %v302_v56, %v301_v60 }
  0xbd   : > { %v5503_v10 = vunpack.i.h.bf16 %v5501_v63  ;;  %v5502_v11 = vunpack.i.l.bf16 %v5501_v63 }
  0xbf   : > { %4721 = vmatpush1.bf16.msk.msra.mxu0 %vm6789_vm7, %v4719_v7  ;;  %v304_v12 = vsel %vm8553_vm5, %v5508_v61, %v5503_v10  ;;  %v5516_v14 = vpop.permute.xlu1 %5515  ;;  %v299_v15 = vsel %vm8553_vm5, %v5502_v11, %v5507_v62  ;;  %v300_v16 = vsel %vm8553_vm5, %v5503_v10, %v5508_v61  ;;  %v303_v17 = vsel %vm8553_vm5, %v5507_v62, %v5502_v11 }
  0xc0   : > { %4723 = vmatprep.subr.bf16.mxu0 %v4722_v3  ;;  %v5518_v22 = vunpack.i.h.bf16 %v5516_v14  ;;  %v5517_v23 = vunpack.i.l.bf16 %v5516_v14  ;;  %v5511_v25 = vpop.permute.xlu0 %5510  ;;  %v4727_v26 = vpack.c.bf16 %v300_v16, %v299_v15  ;;  %v4729_v35 = vpack.c.bf16 %v304_v12, %v303_v17 }
  0xc1   : > { %v5513_v28 = vunpack.i.h.bf16 %v5511_v25  ;;  %v5512_v29 = vunpack.i.l.bf16 %v5511_v25 }
  0xc3   : > { %4726 = vmatpush1.bf16.msk.msra.mxu0 %vm6825_vm9, %v4724_v13  ;;  %v343_v33 = vsel %vm8550_vm8, %v5513_v28, %v5518_v22  ;;  %v347_v34 = vsel %vm8550_vm8, %v5518_v22, %v5513_v28  ;;  %v342_v24 = vsel %vm8550_vm8, %v5512_v29, %v5517_v23  ;;  %v5526_v36 = vpop.permute.xlu1 %5525  ;;  %v346_v21 = vsel %vm8550_vm8, %v5517_v23, %v5512_v29 }
  0xc4   : > { %4728 = vmatprep.subr.bf16.mxu0 %v4727_v26  ;;  %v5528_v37 = vunpack.i.h.bf16 %v5526_v36  ;;  %v5527_v38 = vunpack.i.l.bf16 %v5526_v36  ;;  %v5521_v39 = vpop.permute.xlu0 %5520  ;;  %v4732_v40 = vpack.c.bf16 %v343_v33, %v342_v24  ;;  %v4735_v49 = vpack.c.bf16 %v347_v34, %v346_v21 }
  0xc5   : > { %v5523_v43 = vunpack.i.h.bf16 %v5521_v39  ;;  %v5522_v44 = vunpack.i.l.bf16 %v5521_v39  ;;  %v4756_v33 = vpack.c.bf16 %v6694_v9, %v6691_v8 }
  0xc7   : > { %4731 = vmatpush1.bf16.msk.msra.mxu0 %vm6825_vm9, %v4729_v35  ;;  %v345_v45 = vsel %vm8550_vm8, %v5523_v43, %v5528_v37  ;;  %v349_v46 = vsel %vm8550_vm8, %v5528_v37, %v5523_v43  ;;  %v344_v48 = vsel %vm8550_vm8, %v5522_v44, %v5527_v38  ;;  %v5536_v50 = vpop.permute.xlu1 %5535  ;;  %v348_v51 = vsel %vm8550_vm8, %v5527_v38, %v5522_v44  ;;  %vm226_vm8 = vmand %vm214_vm13, %vm6831_vm10 }
  0xc8   : > { %4734 = vmatprep.subr.msk.bf16.mxu0 %vm6854_vm12, %v4732_v40  ;;  %v5538_v53 = vunpack.i.h.bf16 %v5536_v50  ;;  %v5537_v54 = vunpack.i.l.bf16 %v5536_v50  ;;  %v5531_v55 = vpop.permute.xlu0 %5530  ;;  %v4738_v56 = vpack.c.bf16 %v345_v45, %v344_v48  ;;  %v4741_v62 = vpack.c.bf16 %v349_v46, %v348_v51 }
  0xc9   : > { %v5533_v57 = vunpack.i.h.bf16 %v5531_v55  ;;  %v5532_v58 = vunpack.i.l.bf16 %v5531_v55  ;;  %v4758_v38 = vpack.c.bf16 %v6680_v4, %v6675_v2  ;;  %v4760_v40 = vpack.c.bf16 %v6686_v6, %v6683_v5 }
  0xcb   : > { %4737 = vmatpush1.bf16.msk.msra.mxu0 %vm6875_vm15, %v4735_v49  ;;  %v388_v59 = vsel %vm8547_vm14, %v5533_v57, %v5538_v53  ;;  %v392_v60 = vsel %vm8547_vm14, %v5538_v53, %v5533_v57  ;;  %v387_v61 = vsel %vm8547_vm14, %v5532_v58, %v5537_v54  ;;  %v5546_v63 = vpop.permute.xlu1 %5545  ;;  %v391_v3 = vsel %vm8547_vm14, %v5537_v54, %v5532_v58 }
  0xcc   : > { %4740 = vmatprep.subr.msk.bf16.mxu0 %vm6854_vm12, %v4738_v56  ;;  %v5548_v7 = vunpack.i.h.bf16 %v5546_v63  ;;  %v5547_v10 = vunpack.i.l.bf16 %v5546_v63  ;;  %v5541_v11 = vpop.permute.xlu0 %5540  ;;  %v4744_v12 = vpack.c.bf16 %v388_v59, %v387_v61  ;;  %v4747_v17 = vpack.c.bf16 %v392_v60, %v391_v3  ;;  %v3887_v59 = vld [vmem:[#allocation3 + $0x220] sm:$0xff] }
  0xcd   : > { %v5543_v13 = vunpack.i.h.bf16 %v5541_v11  ;;  %v5542_v14 = vunpack.i.l.bf16 %v5541_v11  ;;  %v4762_v49 = vpack.c.bf16 %v6672_v1, %v6669_v0 }
  0xcf   : > { %4743 = vmatpush1.bf16.msk.msra.mxu0 %vm6875_vm15, %v4741_v62  ;;  %v390_v15 = vsel %vm8547_vm14, %v5543_v13, %v5548_v7  ;;  %v389_v16 = vsel %vm8547_vm14, %v5542_v14, %v5547_v10  ;;  %v5556_v22 = vpop.permute.xlu1 %5555  ;;  %v394_v25 = vsel %vm8547_vm14, %v5548_v7, %v5543_v13  ;;  %v393_v26 = vsel %vm8547_vm14, %v5547_v10, %v5542_v14  ;;  %vm6944_vm14 = vmpackc.low %vm6837_vm11, %vm6837_vm11 }
  0xd0   : > { %4746 = vmatprep.subr.msk.bf16.mxu0 %vm6781_vm6, %v4744_v12  ;;  %v4750_v28 = vpack.c.bf16 %v390_v15, %v389_v16  ;;  %v5551_v29 = vpop.permute.xlu0 %5550  ;;  %v4753_v27 = vpack.c.bf16 %v394_v25, %v393_v26  ;;  %v5558_v24 = vunpack.i.h.bf16 %v5556_v22  ;;  %v5557_v35 = vunpack.i.l.bf16 %v5556_v22  ;;  %vm6960_vm11 = vmand %vm214_vm13, %vm6761_vm3 }
  0xd1   : > { %v5553_v36 = vunpack.i.h.bf16 %v5551_v29  ;;  %v5552_v21 = vunpack.i.l.bf16 %v5551_v29  ;;  %vm8551_vm3 = vcmp.lt.s32.totalorder %v6744_v19, 112 }
  0xd3   : > { %4749 = vmatpush1.bf16.msk.msra.mxu0 %vm6900_vm0, %v4747_v17  ;;  %v5566_v34 = vpop.permute.xlu1 %5565  ;;  %v445_v8 = vsel %vm8548_vm1, %v5558_v24, %v5553_v36  ;;  %v444_v9 = vsel %vm8548_vm1, %v5557_v35, %v5552_v21  ;;  %v441_v2 = vsel %vm8548_vm1, %v5553_v36, %v5558_v24  ;;  %v440_v4 = vsel %vm8548_vm1, %v5552_v21, %v5557_v35 }
  0xd4   : > { %4752 = vmatprep.subr.msk.bf16.mxu0 %vm6781_vm6, %v4750_v28  ;;  %v5561_v37 = vpop.permute.xlu0 %5560  ;;  %v5568_v44 = vunpack.i.h.bf16 %v5566_v34  ;;  %v5567_v45 = vunpack.i.l.bf16 %v5566_v34  ;;  %v4764_v50 = vpack.c.bf16 %v445_v8, %v444_v9  ;;  %v4767_v1 = vpack.c.bf16 %v441_v2, %v440_v4 }
  0xd5   : > { %v5563_v46 = vunpack.i.h.bf16 %v5561_v37  ;;  %v5562_v48 = vunpack.i.l.bf16 %v5561_v37 }
  0xd7   : > { %4755 = vmatpush1.bf16.msk.msra.mxu0 %vm6900_vm0, %v4753_v27  ;;  %v5576_v39 = vpop.permute.xlu1 %5575  ;;  %v447_v56 = vsel %vm8548_vm1, %v5568_v44, %v5563_v46  ;;  %v446_v57 = vsel %vm8548_vm1, %v5567_v45, %v5562_v48  ;;  %v443_v0 = vsel %vm8548_vm1, %v5563_v46, %v5568_v44  ;;  %v442_v60 = vsel %vm8548_vm1, %v5562_v48, %v5567_v45  ;;  %vm6980_vm1 = vmpackc.low %vm6960_vm11, %vm6960_vm11 }
  0xd8   : > { %4757 = vmatprep.subr.bf16.mxu0 %v4756_v33  ;;  %v5571_v43 = vpop.permute.xlu0 %5570  ;;  %v5578_v53 = vunpack.i.h.bf16 %v5576_v39  ;;  %v5577_v5 = vunpack.i.l.bf16 %v5576_v39  ;;  %v4770_v63 = vpack.c.bf16 %v447_v56, %v446_v57  ;;  %v4773_v15 = vpack.c.bf16 %v443_v0, %v442_v60 }
  0xd9   : > { %v5573_v6 = vunpack.i.h.bf16 %v5571_v43  ;;  %v5572_v54 = vunpack.i.l.bf16 %v5571_v43  ;;  %vm8552_vm11 = vcmp.lt.s32.totalorder %v6744_v19, 111 }
  0xdb   : > { %4759 = vmatpush1.bf16.msra.mxu0 %v4758_v38  ;;  %v5586_v51 = vpop.permute.xlu1 %5585  ;;  %v490_v61 = vsel %vm8549_vm4, %v5578_v53, %v5573_v6  ;;  %v489_v62 = vsel %vm8549_vm4, %v5577_v5, %v5572_v54  ;;  %v486_v13 = vsel %vm8549_vm4, %v5573_v6, %v5578_v53  ;;  %v485_v14 = vsel %vm8549_vm4, %v5572_v54, %v5577_v5  ;;  %v3883_v5 = vld [vmem:[#allocation3 + $0x200] sm:$0xff] }
  0xdc   : > { %4761 = vmatprep.subr.bf16.mxu0 %v4760_v40  ;;  %v5581_v55 = vpop.permute.xlu0 %5580  ;;  %v5588_v31 = vunpack.i.h.bf16 %v5586_v51  ;;  %v5587_v7 = vunpack.i.l.bf16 %v5586_v51  ;;  %v4776_v16 = vpack.c.bf16 %v490_v61, %v489_v62  ;;  %v4779_v24 = vpack.c.bf16 %v486_v13, %v485_v14  ;;  %v603_v13 = vld [vmem:[#allocation3] sm:$0xff] }
  0xdd   : > { %v5583_v10 = vunpack.i.h.bf16 %v5581_v55  ;;  %v5582_v11 = vunpack.i.l.bf16 %v5581_v55 }
  0xdf   : > { %4763 = vmatpush1.bf16.msra.mxu0 %v4762_v49  ;;  %v5596_v58 = vpop.permute.xlu1 %5595  ;;  %v492_v29 = vsel %vm8549_vm4, %v5588_v31, %v5583_v10  ;;  %v491_v27 = vsel %vm8549_vm4, %v5587_v7, %v5582_v11  ;;  %v488_v34 = vsel %vm8549_vm4, %v5583_v10, %v5588_v31  ;;  %v487_v35 = vsel %vm8549_vm4, %v5582_v11, %v5587_v7  ;;  %vm7012_vm4 = vmpackc.low %vm214_vm13, %vm214_vm13  ;;  %v3884_v11 = vld [vmem:[#allocation3 + $0x208] sm:$0xff] }
  0xe0   : > { %4766 = vmatprep.subr.msk.bf16.mxu0 %vm6854_vm12, %v4764_v50  ;;  %v5591_v3 = vpop.permute.xlu0 %5590  ;;  %v5598_v32 = vunpack.i.h.bf16 %v5596_v58  ;;  %v5597_v17 = vunpack.i.l.bf16 %v5596_v58  ;;  %v4782_v37 = vpack.c.bf16 %v492_v29, %v491_v27  ;;  %v4785_v44 = vpack.c.bf16 %v488_v34, %v487_v35  ;;  %v612_v29 = vld [vmem:[#allocation3 + $0x48] sm:$0xff]  ;;  %v605_v34 = vld [vmem:[#allocation3 + $0x10] sm:$0xff]  ;;  %v611_v35 = vld [vmem:[#allocation3 + $0x40] sm:$0xff] }
  0xe1   : > { %v5593_v22 = vunpack.i.h.bf16 %v5591_v3  ;;  %v5592_v25 = vunpack.i.l.bf16 %v5591_v3  ;;  %v6555_v27 = vmov 0.0  }
  0xe3   : > { %4769 = vmatpush1.bf16.msk.msra.mxu0 %vm6944_vm14, %v4767_v1  ;;  %v5606_v26 = vpop.permute.xlu1 %5605  ;;  %v535_v36 = vsel %vm8551_vm3, %v5598_v32, %v5593_v22  ;;  %v534_v21 = vsel %vm8551_vm3, %v5597_v17, %v5592_v25  ;;  %v530_v46 = vsel %vm8551_vm3, %v5592_v25, %v5597_v17  ;;  %v531_v48 = vsel %vm8551_vm3, %v5593_v22, %v5598_v32  ;;  %v606_v22 = vld [vmem:[#allocation3 + $0x18] sm:$0xff] }
  0xe4   : > { %4772 = vmatprep.subr.msk.bf16.mxu0 %vm6854_vm12, %v4770_v63  ;;  %v5601_v28 = vpop.permute.xlu0 %5600  ;;  %v5608_v8 = vunpack.i.h.bf16 %v5606_v26  ;;  %v5607_v9 = vunpack.i.l.bf16 %v5606_v26  ;;  %v4788_v45 = vpack.c.bf16 %v535_v36, %v534_v21  ;;  %v4791_v55 = vpack.c.bf16 %v531_v48, %v530_v46  ;;  %v610_v25 = vld [vmem:[#allocation3 + $0x38] sm:$0xff]  ;;  %v609_v26 = vld [vmem:[#allocation3 + $0x30] sm:$0xff] }
  0xe5   : > { %v5603_v40 = vunpack.i.h.bf16 %v5601_v28  ;;  %v5602_v43 = vunpack.i.l.bf16 %v5601_v28  ;;  %v613_v28 = vld [vmem:[#allocation3 + $0x50] sm:$0xff]  ;;  %v614_v36 = vld [vmem:[#allocation3 + $0x58] sm:$0xff] }
  0xe7   : > { %4775 = vmatpush1.bf16.msk.msra.mxu0 %vm6944_vm14, %v4773_v15  ;;  %v5616_v38 = vpop.permute.xlu1 %5615  ;;  %v537_v51 = vsel %vm8551_vm3, %v5608_v8, %v5603_v40  ;;  %v536_v53 = vsel %vm8551_vm3, %v5607_v9, %v5602_v43  ;;  %v532_v56 = vsel %vm8551_vm3, %v5602_v43, %v5607_v9  ;;  %v533_v58 = vsel %vm8551_vm3, %v5603_v40, %v5608_v8  ;;  %vm7038_vm3 = vmpackc.low %vm226_vm8, %vm226_vm8 }
  0xe8   : > { %4778 = vmatprep.subr.msk.bf16.mxu0 %vm6980_vm1, %v4776_v16  ;;  %v5611_v39 = vpop.permute.xlu0 %5610  ;;  %v5618_v2 = vunpack.i.h.bf16 %v5616_v38  ;;  %v5617_v4 = vunpack.i.l.bf16 %v5616_v38  ;;  %v4793_v1 = vpack.c.bf16 %v537_v51, %v536_v53  ;;  %v4796_v3 = vpack.c.bf16 %v533_v58, %v532_v56  ;;  %v607_v16 = vld [vmem:[#allocation3 + $0x20] sm:$0xff] }
  0xe9   : > { %v5613_v49 = vunpack.i.h.bf16 %v5611_v39  ;;  %v5612_v50 = vunpack.i.l.bf16 %v5611_v39  ;;  %vm8554_vm8 = vcmask 261120  }
  0xeb   : > { %4781 = vmatpush1.bf16.msk.msra.mxu0 %vm6900_vm0, %v4779_v24  ;;  %v5626_v6 = vpop.permute.xlu1 %5625  ;;  %v580_v57 = vsel %vm8552_vm11, %v5618_v2, %v5613_v49  ;;  %v579_v0 = vsel %vm8552_vm11, %v5617_v4, %v5612_v50  ;;  %v576_v31 = vsel %vm8552_vm11, %v5613_v49, %v5618_v2  ;;  %v575_v7 = vsel %vm8552_vm11, %v5612_v50, %v5617_v4  ;;  %v608_v24 = vld [vmem:[#allocation3 + $0x28] sm:$0xff] }
  0xec   : > { %4784 = vmatprep.subr.msk.bf16.mxu0 %vm6980_vm1, %v4782_v37  ;;  %v5621_v54 = vpop.permute.xlu0 %5620  ;;  %v5628_v60 = vunpack.i.h.bf16 %v5626_v6  ;;  %v5627_v61 = vunpack.i.l.bf16 %v5626_v6  ;;  %v4798_v10 = vpack.c.bf16 %v580_v57, %v579_v0  ;;  %v4801_v12 = vpack.c.bf16 %v576_v31, %v575_v7 }
  0xed   : > { %v5623_v62 = vunpack.i.h.bf16 %v5621_v54  ;;  %v5622_v63 = vunpack.i.l.bf16 %v5621_v54 }
  0xef   : > { %4787 = vmatpush1.bf16.msk.msra.mxu0 %vm6900_vm0, %v4785_v44  ;;  %v582_v20 = vsel %vm8552_vm11, %v5628_v60, %v5623_v62  ;;  %v581_v30 = vsel %vm8552_vm11, %v5627_v61, %v5622_v63  ;;  %v578_v14 = vsel %vm8552_vm11, %v5623_v62, %v5628_v60  ;;  %v577_v15 = vsel %vm8552_vm11, %v5622_v63, %v5627_v61 }
  0xf0   : > { %4790 = vmatprep.subr.msk.bf16.mxu0 %vm7012_vm4, %v4788_v45  ;;  %v4804_v32 = vpack.c.bf16 %v582_v20, %v581_v30  ;;  %v4807_v17 = vpack.c.bf16 %v578_v14, %v577_v15 }
  0xf3   : > { %4792 = vmatpush1.bf16.msra.mxu0 %v4791_v55 }
  0xf4   : > { %4795 = vmatprep.subr.msk.bf16.mxu0 %vm7012_vm4, %v4793_v1 }
  0xf7   : > { %4797 = vmatpush1.bf16.msra.mxu0 %v4796_v3 }
  0xf8   : > { %4800 = vmatprep.subr.msk.bf16.mxu0 %vm7038_vm3, %v4798_v10 }
  0xfa   : > { %789 = vmatmul.mubr.f32.vlgmr.msra.gmra.mrb[0].mxu0 %v603_v13 }
  0xfb   : > { %4803 = vmatpush1.bf16.msk.msra.mxu0 %vm6944_vm14, %v4801_v12  ;;  %794 = vmatprep.mubr.f32.mxu0 %v607_v16 }
  0xfc   : > { %4806 = vmatprep.subr.msk.bf16.mxu0 %vm7038_vm3, %v4804_v32  ;;  %v699_v38 = vpop.permute.xlu1 %698 }
  0xfd   : > { %v694_v21 = vpop.permute.xlu0 %693 }
  0xfe   : > { %795 = vmatmul.mubr.f32.gmra.mrb[2].mxu0 %v606_v22 }
  0xff   : > { %800 = vmatprep.mubr.f32.mxu0 %v610_v25  ;;  %4809 = vmatpush1.bf16.msk.msra.mxu0 %vm6944_vm14, %v4807_v17  ;;  %v1256_v25 = vld [vmem:[#allocation3 + $0x68] sm:$0xff] }
 0x100   : > { %v704_v2 = vpop.permute.xlu1 %703  ;;  %1440 = vmatprep.mubr.f32.mxu1 %v1256_v25 }
 0x101   : > { %v709_v60 = vpop.permute.xlu0 %708 }
 0x102   : > { %801 = vmatmul.mubr.f32.gmra.mrb[4].mxu0 %v609_v26  ;;  %v4327_v26 = vld [vmem:[%s8542_s2 + $0x20] sm:$0xff] }
 0x103   : > { %806 = vmatprep.mubr.f32.mxu0 %v613_v28  ;;  %v4328_v28 = vld [vmem:[%s8542_s2 + $0x28] sm:$0xff] }
 0x106   : > { %807 = vmatmul.mubr.f32.gmra.mrb[6].mxu0 %v612_v29  ;;  %v4329_v29 = vld [vmem:[%s8542_s2 + $0x30] sm:$0xff] }
 0x107   : > { %877 = vmatprep.mubr.f32.mxu0 %v6555_v27 }
 0x10a   : > { %4323 = vmatmul.mubr.msk.f32.vlgmr.msra.gmra.mrb[0].mxu0 %vm8554_vm8, %v605_v34  ;;  %v4330_v34 = vld [vmem:[%s8542_s2 + $0x38] sm:$0xff] }
 0x10b   : > { %883 = vmatprep.mubr.f32.mxu0 %v6555_v27 }
 0x10e   : > { %4324 = vmatmul.mubr.msk.f32.gmra.mrb[2].mxu0 %vm8554_vm8, %v608_v24 }
 0x10f   : > { %889 = vmatprep.mubr.f32.mxu0 %v6555_v27 }
 0x112   : > { %4325 = vmatmul.mubr.msk.f32.gmra.mrb[4].mxu0 %vm8554_vm8, %v611_v35 }
 0x113   : > { %895 = vmatprep.mubr.f32.mxu0 %v6555_v27 }
 0x116   : > { %4326 = vmatmul.mubr.msk.f32.gmra.mrb[6].mxu0 %vm8554_vm8, %v614_v36 }
 0x1dd   : > { %v879_v37 = vpop.f32.mrb[0].mxu0 }
 0x1de   : > { %v5310_v39 = vadd.f32 %v879_v37, %v694_v21  ;;  %v881_v8 = vpop.f32.mrb[1].mxu0 }
 0x1df   : > { %v5311_v9 = vadd.f32 %v881_v8, %v694_v21 }
 0x1e0   : > { %v910_v43 = vmul.f32 0.01, %v5310_v39  ;;  %vm902_vm10 = vcmp.ge.f32.partialorder %v5310_v39, 0.0 }
 0x1e1   : > { %v885_v40 = vpop.f32.mrb[2].mxu0  ;;  %v911_v44 = vmul.f32 0.01, %v5311_v9  ;;  %vm903_vm13 = vcmp.ge.f32.partialorder %v5311_v9, 0.0 }
 0x1e2   : > { %v5312_v45 = vadd.f32 %v885_v40, %v699_v38  ;;  %v887_v46 = vpop.f32.mrb[3].mxu0  ;;  %v7066_v51 = vsel %vm902_vm10, %v5310_v39, %v910_v43 }
 0x1e3   : > { %v5313_v48 = vadd.f32 %v887_v46, %v699_v38  ;;  %v7068_v53 = vsel %vm903_vm13, %v5311_v9, %v911_v44 }
 0x1e4   : > { %vm904_vm11 = vcmp.ge.f32.partialorder %v5312_v45, 0.0  ;;  %v912_v4 = vmul.f32 0.01, %v5312_v45 }
 0x1e5   : > { %vm905_vm5 = vcmp.ge.f32.partialorder %v5313_v48, 0.0  ;;  %v913_v49 = vmul.f32 0.01, %v5313_v48  ;;  %v891_v50 = vpop.f32.mrb[4].mxu0 }
 0x1e6   : > { %v7070_v6 = vsel %vm904_vm11, %v5312_v45, %v912_v4  ;;  %v5314_v54 = vadd.f32 %v891_v50, %v704_v2  ;;  %v893_v55 = vpop.f32.mrb[5].mxu0 }
 0x1e7   : > { %v7072_v56 = vsel %vm905_vm5, %v5313_v48, %v913_v49  ;;  %v5315_v57 = vadd.f32 %v893_v55, %v704_v2  ;;  %v5631_v0 = vpack.i.bf16 %v7070_v6, %v7066_v51  ;;  %v4858_v32 = vpack.c.bf16 %v7070_v6, %v7066_v51 }
 0x1e8   : > { %vm906_vm8 = vcmp.ge.f32.partialorder %v5314_v54, 0.0  ;;  %v914_v1 = vmul.f32 0.01, %v5314_v54  ;;  %v5636_v58 = vpack.i.bf16 %v7072_v56, %v7068_v53  ;;  %v4856_v13 = vpack.c.bf16 %v7072_v56, %v7068_v53 }
 0x1e9   : > { %vm907_vm10 = vcmp.ge.f32.partialorder %v5315_v57, 0.0  ;;  %v915_v61 = vmul.f32 0.01, %v5315_v57  ;;  %v897_v62 = vpop.f32.mrb[6].mxu0  ;;  %5632 = vrot.lane.b32.xlu1 %v5631_v0, %s6546_s24 }
 0x1ea   : > { %v7079_v63 = vsel %vm906_vm8, %v5314_v54, %v914_v1  ;;  %v5316_v3 = vadd.f32 %v897_v62, %v709_v60  ;;  %v899_v31 = vpop.f32.mrb[7].mxu0  ;;  %5637 = vrot.lane.b32.xlu0 %v5636_v58, %s6546_s24  ;;  %vm8592_vm8 = vcmp.lt.s32.totalorder %v6744_v19, 16 }
 0x1eb   : > { %v7082_v7 = vsel %vm907_vm10, %v5315_v57, %v915_v61  ;;  %v5317_v10 = vadd.f32 %v899_v31, %v709_v60  ;;  %vm8593_vm13 = vmmov %vm8592_vm8 }
 0x1ec   : > { %vm908_vm5 = vcmp.ge.f32.partialorder %v5316_v3, 0.0  ;;  %v916_v20 = vmul.f32 0.01, %v5316_v3  ;;  %vm8594_vm10 = vmmov %vm8592_vm8 }
 0x1ed   : > { %vm909_vm11 = vcmp.ge.f32.partialorder %v5317_v10, 0.0  ;;  %v917_v30 = vmul.f32 0.01, %v5317_v10 }
 0x1ee   : > { %v7084_v12 = vsel %vm908_vm5, %v5316_v3, %v916_v20  ;;  %vm8595_vm5 = vmmov %vm8592_vm8 }
 0x1ef   : > { %v7088_v14 = vsel %vm909_vm11, %v5317_v10, %v917_v30  ;;  %v5641_v15 = vpack.i.bf16 %v7084_v12, %v7079_v63  ;;  %v4862_v22 = vpack.c.bf16 %v7084_v12, %v7079_v63  ;;  %vm8596_vm11 = vmmov %vm8595_vm5 }
 0x1f0   : > { %v5651_v16 = vpack.i.bf16 %v7088_v14, %v7082_v7  ;;  %v4860_v17 = vpack.c.bf16 %v7088_v14, %v7082_v7 }
 0x1f1   : > { %5642 = vrot.lane.b32.xlu1 %v5641_v15, %s6546_s24 }
 0x1f2   : > { %5652 = vrot.lane.b32.xlu0 %v5651_v16, %s6546_s24 }
 0x1f5   : > { %5647 = vrot.lane.b32.xlu1 %v5631_v0, %s6547_s26 }
 0x1f6   : > { %5657 = vrot.lane.b32.xlu0 %v5636_v58, %s6547_s26 }
 0x1f9   : > { %5662 = vrot.lane.b32.xlu1 %v5641_v15, %s6547_s26 }
 0x1fa   : > { %5672 = vrot.lane.b32.xlu0 %v5651_v16, %s6547_s26 }
 0x1fd   : > { %5667 = vrot.lane.b32.xlu1 %v5631_v0, %s6548_s29 }
 0x1fe   : > { %5677 = vrot.lane.b32.xlu0 %v5636_v58, %s6548_s29 }
 0x201   : > { %5682 = vrot.lane.b32.xlu1 %v5641_v15, %s6548_s29 }
 0x202   : > { %5692 = vrot.lane.b32.xlu0 %v5651_v16, %s6548_s29 }
 0x205   : > { %5687 = vrot.lane.b32.xlu1 %v5631_v0, %s6549_s30 }
 0x206   : > { %5697 = vrot.lane.b32.xlu0 %v5636_v58, %s6549_s30 }
 0x209   : > { %5702 = vrot.lane.b32.xlu1 %v5641_v15, %s6549_s30 }
 0x20a   : > { %5707 = vrot.lane.b32.xlu0 %v5651_v16, %s6549_s30 }
 0x20d   : > { %5712 = vrot.lane.b32.xlu1 %v5631_v0, %s6550_s4 }
 0x20e   : > { %5717 = vrot.lane.b32.xlu0 %v5636_v58, %s6550_s4 }
 0x211   : > { %5722 = vrot.lane.b32.xlu1 %v5641_v15, %s6550_s4 }
 0x212   : > { %5732 = vrot.lane.b32.xlu0 %v5651_v16, %s6550_s4 }
 0x215   : > { %5727 = vrot.lane.b32.xlu1 %v5631_v0, %s6551_s5 }
 0x216   : > { %5737 = vrot.lane.b32.xlu0 %v5636_v58, %s6551_s5 }
 0x219   : > { %5742 = vrot.lane.b32.xlu1 %v5641_v15, %s6551_s5 }
 0x21a   : > { %5752 = vrot.lane.b32.xlu0 %v5651_v16, %s6551_s5 }
 0x21d   : > { %5747 = vrot.lane.b32.xlu1 %v5631_v0, %s6552_s6 }
 0x21e   : > { %5757 = vrot.lane.b32.xlu0 %v5636_v58, %s6552_s6 }
 0x221   : > { %5762 = vrot.lane.b32.xlu1 %v5641_v15, %s6552_s6 }
 0x222   : > { %5767 = vrot.lane.b32.xlu0 %v5651_v16, %s6552_s6 }
 0x225   : > { %5772 = vrot.lane.b32.xlu1 %v5631_v0, %s6553_s7 }
 0x226   : > { %5777 = vrot.lane.b32.xlu0 %v5636_v58, %s6553_s7 }
 0x229   : > { %5782 = vrot.lane.b32.xlu1 %v5641_v15, %s6553_s7 }
 0x22a   : > { %5787 = vrot.lane.b32.xlu0 %v5651_v16, %s6553_s7 }
 0x22d   : > { %1346 = vperm.xlu1 %5630, %v4327_v26  }
 0x22e   : > { %1351 = vperm.xlu0 %5629, %v4328_v28  }
 0x231   : > { %1356 = vperm.xlu1 %5630, %v4329_v29  }
 0x232   : > { %1361 = vperm.xlu0 %5629, %v4330_v34  }
 0x25b   : > { %v5633_v24 = vpop.permute.xlu1 %5632 }
 0x25c   : > { %v5635_v35 = vunpack.i.h.bf16 %v5633_v24  ;;  %v5634_v36 = vunpack.i.l.bf16 %v5633_v24  ;;  %v5638_v21 = vpop.permute.xlu0 %5637 }
 0x25d   : > { %v5640_v37 = vunpack.i.h.bf16 %v5638_v21  ;;  %v5639_v38 = vunpack.i.l.bf16 %v5638_v21 }
 0x25f   : > { %v942_v39 = vsel %vm251_vm2, %v5634_v36, %v5639_v38  ;;  %v943_v8 = vsel %vm251_vm2, %v5635_v35, %v5640_v37  ;;  %v946_v9 = vsel %vm251_vm2, %v5639_v38, %v5634_v36  ;;  %v947_v40 = vsel %vm251_vm2, %v5640_v37, %v5635_v35 }
 0x260   : > { %v4810_v43 = vpack.c.bf16 %v943_v8, %v942_v39  ;;  %v4813_v44 = vpack.c.bf16 %v947_v40, %v946_v9 }
 0x262   : > { %4812 = vmatprep.subr.msk.bf16.mxu1 %vm6781_vm6, %v4810_v43 }
 0x263   : > { %v5643_v45 = vpop.permute.xlu1 %5642  ;;  %4815 = vmatpush1.bf16.msk.msra.mxu1 %vm6789_vm7, %v4813_v44 }
 0x264   : > { %v5645_v46 = vunpack.i.h.bf16 %v5643_v45  ;;  %v5644_v48 = vunpack.i.l.bf16 %v5643_v45  ;;  %v5653_v2 = vpop.permute.xlu0 %5652 }
 0x265   : > { %v5655_v4 = vunpack.i.h.bf16 %v5653_v2  ;;  %v5654_v49 = vunpack.i.l.bf16 %v5653_v2 }
 0x267   : > { %v944_v50 = vsel %vm251_vm2, %v5644_v48, %v5654_v49  ;;  %v945_v54 = vsel %vm251_vm2, %v5645_v46, %v5655_v4  ;;  %v948_v55 = vsel %vm251_vm2, %v5654_v49, %v5644_v48  ;;  %v949_v57 = vsel %vm251_vm2, %v5655_v4, %v5645_v46  ;;  %v5648_v0 = vpop.permute.xlu1 %5647 }
 0x268   : > { %v5650_v1 = vunpack.i.h.bf16 %v5648_v0  ;;  %v5649_v58 = vunpack.i.l.bf16 %v5648_v0  ;;  %v5658_v60 = vpop.permute.xlu0 %5657  ;;  %v4816_v61 = vpack.c.bf16 %v945_v54, %v944_v50  ;;  %v4819_v62 = vpack.c.bf16 %v949_v57, %v948_v55 }
 0x269   : > { %v5660_v3 = vunpack.i.h.bf16 %v5658_v60  ;;  %v5659_v31 = vunpack.i.l.bf16 %v5658_v60 }
 0x26a   : > { %4818 = vmatprep.subr.msk.bf16.mxu1 %vm6781_vm6, %v4816_v61 }
 0x26b   : > { %v986_v10 = vsel %vm8592_vm8, %v5659_v31, %v5649_v58  ;;  %v987_v20 = vsel %vm8593_vm13, %v5660_v3, %v5650_v1  ;;  %v5663_v30 = vpop.permute.xlu1 %5662  ;;  %4821 = vmatpush1.bf16.msk.msra.mxu1 %vm6789_vm7, %v4819_v62  ;;  %v982_v15 = vsel %vm8594_vm10, %v5649_v58, %v5659_v31  ;;  %v983_v16 = vsel %vm8595_vm5, %v5650_v1, %v5660_v3  ;;  %vm8597_vm8 = vmmov %vm8595_vm5 }
 0x26c   : > { %v5665_v25 = vunpack.i.h.bf16 %v5663_v30  ;;  %v5664_v26 = vunpack.i.l.bf16 %v5663_v30  ;;  %v5673_v28 = vpop.permute.xlu0 %5672  ;;  %v4822_v29 = vpack.c.bf16 %v983_v16, %v982_v15  ;;  %v4824_v34 = vpack.c.bf16 %v987_v20, %v986_v10  ;;  %vm8598_vm13 = vmmov %vm8595_vm5 }
 0x26d   : > { %v5675_v24 = vunpack.i.h.bf16 %v5673_v28  ;;  %v5674_v35 = vunpack.i.l.bf16 %v5673_v28  ;;  %vm8599_vm10 = vmmov %vm8595_vm5  ;;  %vm8600_vm5 = vcmp.lt.s32.totalorder %v6744_v19, 15 }
 0x26e   : > { %4823 = vmatprep.subr.bf16.mxu1 %v4822_v29 }
 0x26f   : > { %v988_v36 = vsel %vm8596_vm11, %v5674_v35, %v5664_v26  ;;  %v989_v21 = vsel %vm8597_vm8, %v5675_v24, %v5665_v25  ;;  %v5668_v37 = vpop.permute.xlu1 %5667  ;;  %4826 = vmatpush1.bf16.msk.msra.mxu1 %vm6825_vm9, %v4824_v34  ;;  %v984_v38 = vsel %vm8598_vm13, %v5664_v26, %v5674_v35  ;;  %v985_v39 = vsel %vm8599_vm10, %v5665_v25, %v5675_v24  ;;  %vm8601_vm11 = vmmov %vm8600_vm5 }
 0x270   : > { %v5670_v8 = vunpack.i.h.bf16 %v5668_v37  ;;  %v5669_v9 = vunpack.i.l.bf16 %v5668_v37  ;;  %v5678_v40 = vpop.permute.xlu0 %5677  ;;  %v4827_v43 = vpack.c.bf16 %v985_v39, %v984_v38  ;;  %v4829_v44 = vpack.c.bf16 %v989_v21, %v988_v36  ;;  %vm8602_vm8 = vmmov %vm8600_vm5 }
 0x271   : > { %v5680_v45 = vunpack.i.h.bf16 %v5678_v40  ;;  %v5679_v46 = vunpack.i.l.bf16 %v5678_v40  ;;  %vm8603_vm13 = vmmov %vm8600_vm5 }
 0x272   : > { %4828 = vmatprep.subr.bf16.mxu1 %v4827_v43  ;;  %vm8604_vm10 = vmmov %vm8600_vm5 }
 0x273   : > { %v1022_v48 = vsel %vm8600_vm5, %v5669_v9, %v5679_v46  ;;  %v1023_v2 = vsel %vm8601_vm11, %v5670_v8, %v5680_v45  ;;  %v1026_v4 = vsel %vm8602_vm8, %v5679_v46, %v5669_v9  ;;  %v1027_v49 = vsel %vm8603_vm13, %v5680_v45, %v5670_v8  ;;  %v5683_v50 = vpop.permute.xlu1 %5682  ;;  %4831 = vmatpush1.bf16.msk.msra.mxu1 %vm6825_vm9, %v4829_v44  ;;  %vm8605_vm11 = vmmov %vm8600_vm5 }
 0x274   : > { %v5685_v54 = vunpack.i.h.bf16 %v5683_v50  ;;  %v5684_v55 = vunpack.i.l.bf16 %v5683_v50  ;;  %v5693_v57 = vpop.permute.xlu0 %5692  ;;  %v4832_v0 = vpack.c.bf16 %v1023_v2, %v1022_v48  ;;  %v4835_v1 = vpack.c.bf16 %v1027_v49, %v1026_v4  ;;  %vm8606_vm8 = vmmov %vm8600_vm5 }
 0x275   : > { %v5695_v58 = vunpack.i.h.bf16 %v5693_v57  ;;  %v5694_v60 = vunpack.i.l.bf16 %v5693_v57  ;;  %vm8607_vm13 = vcmp.lt.s32.totalorder %v6744_v19, 1 }
 0x276   : > { %4834 = vmatprep.subr.msk.bf16.mxu1 %vm6854_vm12, %v4832_v0 }
 0x277   : > { %v1024_v61 = vsel %vm8604_vm10, %v5684_v55, %v5694_v60  ;;  %v1025_v62 = vsel %vm8600_vm5, %v5685_v54, %v5695_v58  ;;  %v1028_v3 = vsel %vm8605_vm11, %v5694_v60, %v5684_v55  ;;  %v1029_v31 = vsel %vm8606_vm8, %v5695_v58, %v5685_v54  ;;  %v5688_v10 = vpop.permute.xlu1 %5687  ;;  %4837 = vmatpush1.bf16.msk.msra.mxu1 %vm6875_vm15, %v4835_v1  ;;  %vm8608_vm10 = vmmov %vm8607_vm13 }
 0x278   : > { %v5690_v20 = vunpack.i.h.bf16 %v5688_v10  ;;  %v5689_v30 = vunpack.i.l.bf16 %v5688_v10  ;;  %v5698_v15 = vpop.permute.xlu0 %5697  ;;  %v4838_v16 = vpack.c.bf16 %v1025_v62, %v1024_v61  ;;  %v4841_v25 = vpack.c.bf16 %v1029_v31, %v1028_v3  ;;  %vm8609_vm5 = vmmov %vm8608_vm10 }
 0x279   : > { %v5700_v26 = vunpack.i.h.bf16 %v5698_v15  ;;  %v5699_v28 = vunpack.i.l.bf16 %v5698_v15  ;;  %vm8610_vm11 = vmmov %vm8609_vm5 }
 0x27a   : > { %4840 = vmatprep.subr.msk.bf16.mxu1 %vm6854_vm12, %v4838_v16  ;;  %vm8611_vm8 = vmmov %vm8609_vm5 }
 0x27b   : > { %v1062_v29 = vsel %vm8607_vm13, %v5689_v30, %v5699_v28  ;;  %v1063_v34 = vsel %vm8608_vm10, %v5690_v20, %v5700_v26  ;;  %v1066_v24 = vsel %vm8609_vm5, %v5699_v28, %v5689_v30  ;;  %v1067_v35 = vsel %vm8610_vm11, %v5700_v26, %v5690_v20  ;;  %v5703_v36 = vpop.permute.xlu1 %5702  ;;  %4843 = vmatpush1.bf16.msk.msra.mxu1 %vm6875_vm15, %v4841_v25  ;;  %vm8612_vm13 = vmmov %vm8609_vm5 }
 0x27c   : > { %v5705_v21 = vunpack.i.h.bf16 %v5703_v36  ;;  %v5704_v37 = vunpack.i.l.bf16 %v5703_v36  ;;  %v5708_v38 = vpop.permute.xlu0 %5707  ;;  %v4844_v39 = vpack.c.bf16 %v1063_v34, %v1062_v29  ;;  %v4847_v8 = vpack.c.bf16 %v1067_v35, %v1066_v24  ;;  %vm8613_vm10 = vmmov %vm8609_vm5 }
 0x27d   : > { %v5710_v9 = vunpack.i.h.bf16 %v5708_v38  ;;  %v5709_v40 = vunpack.i.l.bf16 %v5708_v38  ;;  %vm8614_vm11 = vcmp.lt.s32.totalorder %v6744_v19, 127 }
 0x27e   : > { %4846 = vmatprep.subr.msk.bf16.mxu1 %vm6781_vm6, %v4844_v39 }
 0x27f   : > { %v1064_v43 = vsel %vm8611_vm8, %v5704_v37, %v5709_v40  ;;  %v1065_v44 = vsel %vm8612_vm13, %v5705_v21, %v5710_v9  ;;  %v1068_v45 = vsel %vm8613_vm10, %v5709_v40, %v5704_v37  ;;  %v1069_v46 = vsel %vm8609_vm5, %v5710_v9, %v5705_v21  ;;  %v5713_v48 = vpop.permute.xlu1 %5712  ;;  %4849 = vmatpush1.bf16.msk.msra.mxu1 %vm6900_vm0, %v4847_v8  ;;  %vm8615_vm8 = vmmov %vm8614_vm11 }
 0x280   : > { %v5718_v2 = vpop.permute.xlu0 %5717  ;;  %v4850_v4 = vpack.c.bf16 %v1065_v44, %v1064_v43  ;;  %v4853_v49 = vpack.c.bf16 %v1069_v46, %v1068_v45  ;;  %v5715_v50 = vunpack.i.h.bf16 %v5713_v48  ;;  %v5714_v54 = vunpack.i.l.bf16 %v5713_v48  ;;  %vm8616_vm13 = vmmov %vm8615_vm8 }
 0x281   : > { %v5720_v55 = vunpack.i.h.bf16 %v5718_v2  ;;  %v5719_v57 = vunpack.i.l.bf16 %v5718_v2  ;;  %vm8617_vm10 = vmmov %vm8615_vm8 }
 0x282   : > { %4852 = vmatprep.subr.msk.bf16.mxu1 %vm6781_vm6, %v4850_v4  ;;  %vm8618_vm5 = vmmov %vm8615_vm8 }
 0x283   : > { %v5723_v0 = vpop.permute.xlu1 %5722  ;;  %4855 = vmatpush1.bf16.msk.msra.mxu1 %vm6900_vm0, %v4853_v49  ;;  %v1114_v58 = vsel %vm8614_vm11, %v5719_v57, %v5714_v54  ;;  %v1115_v60 = vsel %vm8615_vm8, %v5720_v55, %v5715_v50  ;;  %v1110_v53 = vsel %vm8616_vm13, %v5714_v54, %v5719_v57  ;;  %v1111_v56 = vsel %vm8617_vm10, %v5715_v50, %v5720_v55  ;;  %vm8619_vm11 = vmmov %vm8618_vm5 }
 0x284   : > { %v5733_v1 = vpop.permute.xlu0 %5732  ;;  %4857 = vmatprep.subr.bf16.mxu1 %v4856_v13  ;;  %v5725_v61 = vunpack.i.h.bf16 %v5723_v0  ;;  %v5724_v62 = vunpack.i.l.bf16 %v5723_v0  ;;  %v4864_v13 = vpack.c.bf16 %v1115_v60, %v1114_v58  ;;  %vm8620_vm8 = vmmov %vm8618_vm5  ;;  %vm8622_vm10 = vcmp.lt.s32.totalorder %v6744_v19, 113 }
 0x285   : > { %v5735_v3 = vunpack.i.h.bf16 %v5733_v1  ;;  %v5734_v31 = vunpack.i.l.bf16 %v5733_v1  ;;  %vm8621_vm13 = vmmov %vm8618_vm5 }
 0x287   : > { %v5728_v10 = vpop.permute.xlu1 %5727  ;;  %4859 = vmatpush1.bf16.msra.mxu1 %v4858_v32  ;;  %v1116_v51 = vsel %vm8618_vm5, %v5734_v31, %v5724_v62  ;;  %v1117_v6 = vsel %vm8619_vm11, %v5735_v3, %v5725_v61  ;;  %v1112_v14 = vsel %vm8620_vm8, %v5724_v62, %v5734_v31  ;;  %v1113_v26 = vsel %vm8621_vm13, %v5725_v61, %v5735_v3  ;;  %vm8623_vm5 = vmmov %vm8622_vm10 }
 0x288   : > { %v5738_v20 = vpop.permute.xlu0 %5737  ;;  %4861 = vmatprep.subr.bf16.mxu1 %v4860_v17  ;;  %v5730_v30 = vunpack.i.h.bf16 %v5728_v10  ;;  %v5729_v15 = vunpack.i.l.bf16 %v5728_v10  ;;  %v4867_v17 = vpack.c.bf16 %v1111_v56, %v1110_v53  ;;  %v4870_v34 = vpack.c.bf16 %v1117_v6, %v1116_v51  ;;  %vm8624_vm11 = vmmov %vm8623_vm5 }
 0x289   : > { %v5740_v16 = vunpack.i.h.bf16 %v5738_v20  ;;  %v5739_v25 = vunpack.i.l.bf16 %v5738_v20  ;;  %vm8625_vm8 = vmmov %vm8623_vm5  ;;  %v4873_v38 = vpack.c.bf16 %v1113_v26, %v1112_v14 }
 0x28a   : > { %vm8626_vm13 = vmmov %vm8623_vm5 }
 0x28b   : > { %v5743_v32 = vpop.permute.xlu1 %5742  ;;  %4863 = vmatpush1.bf16.msra.mxu1 %v4862_v22  ;;  %v1154_v28 = vsel %vm8622_vm10, %v5739_v25, %v5729_v15  ;;  %v1155_v29 = vsel %vm8623_vm5, %v5740_v16, %v5730_v30  ;;  %v1150_v21 = vsel %vm8624_vm11, %v5729_v15, %v5739_v25  ;;  %v1151_v37 = vsel %vm8625_vm8, %v5730_v30, %v5740_v16  ;;  %vm8627_vm10 = vmmov %vm8623_vm5 }
 0x28c   : > { %v5753_v7 = vpop.permute.xlu0 %5752  ;;  %4866 = vmatprep.subr.msk.bf16.mxu1 %vm6854_vm12, %v4864_v13  ;;  %v5745_v63 = vunpack.i.h.bf16 %v5743_v32  ;;  %v5744_v12 = vunpack.i.l.bf16 %v5743_v32  ;;  %v4876_v39 = vpack.c.bf16 %v1155_v29, %v1154_v28  ;;  %v4879_v4 = vpack.c.bf16 %v1151_v37, %v1150_v21  ;;  %vm8628_vm11 = vmmov %vm8623_vm5  ;;  %v1255_v21 = vld [vmem:[#allocation3 + $0x60] sm:$0xff] }
 0x28d   : > { %v5755_v22 = vunpack.i.h.bf16 %v5753_v7  ;;  %v5754_v24 = vunpack.i.l.bf16 %v5753_v7  ;;  %vm8629_vm8 = vcmp.lt.s32.totalorder %v6744_v19, 112  ;;  %v1259_v37 = vld [vmem:[#allocation3 + $0x80] sm:$0xff] }
 0x28f   : > { %v5748_v35 = vpop.permute.xlu1 %5747  ;;  %4869 = vmatpush1.bf16.msk.msra.mxu1 %vm6944_vm14, %v4867_v17  ;;  %v1156_v44 = vsel %vm8626_vm13, %v5754_v24, %v5744_v12  ;;  %v1157_v45 = vsel %vm8627_vm10, %v5755_v22, %v5745_v63  ;;  %v1152_v2 = vsel %vm8623_vm5, %v5744_v12, %v5754_v24  ;;  %v1153_v49 = vsel %vm8628_vm11, %v5745_v63, %v5755_v22  ;;  %vm8630_vm13 = vmmov %vm8629_vm8 }
 0x290   : > { %v5758_v36 = vpop.permute.xlu0 %5757  ;;  %4872 = vmatprep.subr.msk.bf16.mxu1 %vm6854_vm12, %v4870_v34  ;;  %v5750_v8 = vunpack.i.h.bf16 %v5748_v35  ;;  %v5749_v9 = vunpack.i.l.bf16 %v5748_v35  ;;  %v4882_v55 = vpack.c.bf16 %v1157_v45, %v1156_v44  ;;  %v4885_v62 = vpack.c.bf16 %v1153_v49, %v1152_v2  ;;  %vm8631_vm10 = vmmov %vm8629_vm8  ;;  %v1261_v45 = vld [vmem:[#allocation3 + $0x90] sm:$0xff]  ;;  %v1263_v49 = vld [vmem:[#allocation3 + $0xa0] sm:$0xff] }
 0x291   : > { %v5760_v40 = vunpack.i.h.bf16 %v5758_v36  ;;  %v5759_v43 = vunpack.i.l.bf16 %v5758_v36  ;;  %vm8632_vm5 = vmmov %vm8629_vm8  ;;  %v1257_v2 = vld [vmem:[#allocation3 + $0x70] sm:$0xff] }
 0x292   : > { %vm8633_vm11 = vmmov %vm8632_vm5 }
 0x293   : > { %v5763_v46 = vpop.permute.xlu1 %5762  ;;  %4875 = vmatpush1.bf16.msk.msra.mxu1 %vm6944_vm14, %v4873_v38  ;;  %v1194_v50 = vsel %vm8629_vm8, %v5759_v43, %v5749_v9  ;;  %v1195_v54 = vsel %vm8630_vm13, %v5760_v40, %v5750_v8  ;;  %v1190_v31 = vsel %vm8631_vm10, %v5749_v9, %v5759_v43  ;;  %v1191_v10 = vsel %vm8632_vm5, %v5750_v8, %v5760_v40  ;;  %vm8634_vm8 = vmmov %vm8632_vm5  ;;  %v1258_v40 = vld [vmem:[#allocation3 + $0x78] sm:$0xff] }
 0x294   : > { %v5768_v48 = vpop.permute.xlu0 %5767  ;;  %4878 = vmatprep.subr.msk.bf16.mxu1 %vm6980_vm1, %v4876_v39  ;;  %v5765_v57 = vunpack.i.h.bf16 %v5763_v46  ;;  %v5764_v0 = vunpack.i.l.bf16 %v5763_v46  ;;  %v4888_v3 = vpack.c.bf16 %v1195_v54, %v1194_v50  ;;  %v4891_v51 = vpack.c.bf16 %v1191_v10, %v1190_v31  ;;  %vm8635_vm13 = vmmov %vm8632_vm5  ;;  %v1262_v43 = vld [vmem:[#allocation3 + $0x98] sm:$0xff]  ;;  %v1265_v46 = vld [vmem:[#allocation3 + $0xb0] sm:$0xff] }
 0x295   : > { %v5770_v1 = vunpack.i.h.bf16 %v5768_v48  ;;  %v5769_v58 = vunpack.i.l.bf16 %v5768_v48  ;;  %vm8636_vm10 = vcmp.lt.s32.totalorder %v6744_v19, 111  ;;  %v1264_v48 = vld [vmem:[#allocation3 + $0xa8] sm:$0xff]  ;;  %v1266_v50 = vld [vmem:[#allocation3 + $0xb8] sm:$0xff] }
 0x296   : > { %vm8637_vm5 = vmmov %vm8636_vm10 }
 0x297   : > { %v5773_v60 = vpop.permute.xlu1 %5772  ;;  %4881 = vmatpush1.bf16.msk.msra.mxu1 %vm6900_vm0, %v4879_v4  ;;  %v1196_v30 = vsel %vm8633_vm11, %v5769_v58, %v5764_v0  ;;  %v1197_v15 = vsel %vm8634_vm8, %v5770_v1, %v5765_v57  ;;  %v1192_v6 = vsel %vm8635_vm13, %v5764_v0, %v5769_v58  ;;  %vm8638_vm11 = vmmov %vm8634_vm8  ;;  %v1260_v4 = vld [vmem:[#allocation3 + $0x88] sm:$0xff] }
 0x298   : > { %v5778_v61 = vpop.permute.xlu0 %5777  ;;  %4884 = vmatprep.subr.msk.bf16.mxu1 %vm6980_vm1, %v4882_v55  ;;  %v5775_v20 = vunpack.i.h.bf16 %v5773_v60  ;;  %v5774_v53 = vunpack.i.l.bf16 %v5773_v60  ;;  %v4893_v14 = vpack.c.bf16 %v1197_v15, %v1196_v30  ;;  %v1193_v17 = vsel %vm8638_vm11, %v5765_v57, %v5770_v1  ;;  %vm8639_vm8 = vmmov %vm8637_vm5 }
 0x299   : > { %v5780_v56 = vunpack.i.h.bf16 %v5778_v61  ;;  %v5779_v13 = vunpack.i.l.bf16 %v5778_v61  ;;  %v4896_v63 = vpack.c.bf16 %v1193_v17, %v1192_v6  ;;  %vm8640_vm13 = vmmov %vm8637_vm5  ;;  %v6431_v6 = vld [vmem:[%s6666_s28] sm:$0xff] }
 0x29a   : > { %vm8642_vm11 = vmmov %vm8637_vm5 }
 0x29b   : > { %4887 = vmatpush1.bf16.msk.msra.mxu1 %vm6900_vm0, %v4885_v62  ;;  %v5783_v16 = vpop.permute.xlu1 %5782  ;;  %v1234_v32 = vsel %vm8636_vm10, %v5779_v13, %v5774_v53  ;;  %v1235_v7 = vsel %vm8637_vm5, %v5780_v56, %v5775_v20  ;;  %v1230_v12 = vsel %vm8639_vm8, %v5774_v53, %v5779_v13  ;;  %v1231_v22 = vsel %vm8640_vm13, %v5775_v20, %v5780_v56  ;;  %vm8641_vm10 = vmmov %vm8637_vm5 }
 0x29c   : > { %v5788_v25 = vpop.permute.xlu0 %5787  ;;  %4890 = vmatprep.subr.msk.bf16.mxu1 %vm7012_vm4, %v4888_v3  ;;  %v5785_v26 = vunpack.i.h.bf16 %v5783_v16  ;;  %v5784_v28 = vunpack.i.l.bf16 %v5783_v16  ;;  %v4898_v24 = vpack.c.bf16 %v1235_v7, %v1234_v32  ;;  %v4901_v38 = vpack.c.bf16 %v1231_v22, %v1230_v12  ;;  %vm8643_vm8 = vmmov %vm8637_vm5  ;;  %v6432_v7 = vld [vmem:[%s6666_s28 + $0x10] sm:$0xff] }
 0x29d   : > { %v5790_v29 = vunpack.i.h.bf16 %v5788_v25  ;;  %v5789_v34 = vunpack.i.l.bf16 %v5788_v25  ;;  %vm8644_vm13 = vcmask 261120  }
 0x29f   : > { %4892 = vmatpush1.bf16.msra.mxu1 %v4891_v51  ;;  %v1236_v35 = vsel %vm8641_vm10, %v5789_v34, %v5784_v28  ;;  %v1237_v36 = vsel %vm8637_vm5, %v5790_v29, %v5785_v26  ;;  %v1232_v39 = vsel %vm8642_vm11, %v5784_v28, %v5789_v34  ;;  %v1233_v8 = vsel %vm8643_vm8, %v5785_v26, %v5790_v29  ;;  %vm8645_vm10 = vmmov %vm8644_vm13  ;;  %v6433_v28 = vld [vmem:[%s6666_s28 + $0x8] sm:$0xff]  ;;  %v6434_v34 = vld [vmem:[%s6666_s28 + $0x18] sm:$0xff] }
 0x2a0   : > { %4895 = vmatprep.subr.msk.bf16.mxu1 %vm7012_vm4, %v4893_v14  ;;  %v4904_v9 = vpack.c.bf16 %v1237_v36, %v1236_v35  ;;  %v4907_v44 = vpack.c.bf16 %v1233_v8, %v1232_v39  ;;  %vm8646_vm5 = vmmov %vm8645_vm10 }
 0x2a1   : > { %vm8647_vm11 = vmmov %vm8646_vm5 }
 0x2a3   : > { %4897 = vmatpush1.bf16.msra.mxu1 %v4896_v63 }
 0x2a4   : > { %4900 = vmatprep.subr.msk.bf16.mxu1 %vm7038_vm3, %v4898_v24 }
 0x2a6   : > { %1441 = vmatmul.mubr.f32.vlgmr.msra.gmra.mrb[0].mxu1 %v1255_v21 }
 0x2a7   : > { %4903 = vmatpush1.bf16.msk.msra.mxu1 %vm6944_vm14, %v4901_v38  ;;  %1446 = vmatprep.mubr.f32.mxu1 %v1259_v37 }
 0x2a8   : > { %4906 = vmatprep.subr.msk.bf16.mxu1 %vm7038_vm3, %v4904_v9 }
 0x2aa   : > { %1447 = vmatmul.mubr.f32.gmra.mrb[2].mxu1 %v1258_v40 }
 0x2ab   : > { %4909 = vmatpush1.bf16.msk.msra.mxu1 %vm6944_vm14, %v4907_v44  ;;  %1452 = vmatprep.mubr.f32.mxu1 %v1262_v43 }
 0x2ac   : > { %v1347_v54 = vpop.permute.xlu1 %1346 }
 0x2ad   : > { %v1352_v60 = vpop.permute.xlu0 %1351 }
 0x2ae   : > { %1453 = vmatmul.mubr.f32.gmra.mrb[4].mxu1 %v1261_v45  ;;  %v6435_v45 = vld [vmem:[%s6666_s28 + $0x20] sm:$0xff] }
 0x2af   : > { %1458 = vmatprep.mubr.f32.mxu1 %v1265_v46 }
 0x2b0   : > { %v1357_v56 = vpop.permute.xlu1 %1356 }
 0x2b1   : > { %v1362_v22 = vpop.permute.xlu0 %1361 }
 0x2b2   : > { %1459 = vmatmul.mubr.f32.gmra.mrb[6].mxu1 %v1264_v48  ;;  %v6436_v48 = vld [vmem:[%s6666_s28 + $0x30] sm:$0xff] }
 0x2b3   : > { %1529 = vmatprep.mubr.f32.mxu1 %v6555_v27 }
 0x2b6   : > { %4331 = vmatmul.mubr.msk.f32.vlgmr.msra.gmra.mrb[0].mxu1 %vm8644_vm13, %v1257_v2 }
 0x2b7   : > { %1535 = vmatprep.mubr.f32.mxu1 %v6555_v27 }
 0x2ba   : > { %4332 = vmatmul.mubr.msk.f32.gmra.mrb[2].mxu1 %vm8645_vm10, %v1260_v4 }
 0x2bb   : > { %1541 = vmatprep.mubr.f32.mxu1 %v6555_v27 }
 0x2be   : > { %4333 = vmatmul.mubr.msk.f32.gmra.mrb[4].mxu1 %vm8646_vm5, %v1263_v49  ;;  %v6437_v49 = vld [vmem:[%s6666_s28 + $0x28] sm:$0xff] }
 0x2bf   : > { %1547 = vmatprep.mubr.f32.mxu1 %v6555_v27 }
 0x2c2   : > { %4334 = vmatmul.mubr.msk.f32.gmra.mrb[6].mxu1 %vm8647_vm11, %v1266_v50 }
 0x389   : > { %v1531_v55 = vpop.f32.mrb[0].mxu1 }
 0x38a   : > { %v5318_v57 = vadd.f32 %v1531_v55, %v1347_v54  ;;  %v1533_v0 = vpop.f32.mrb[1].mxu1 }
 0x38b   : > { %v5319_v1 = vadd.f32 %v1533_v0, %v1347_v54  ;;  %v6438_v54 = vld [vmem:[%s6666_s28 + $0x38] sm:$0xff] }
 0x38c   : > { %v1562_v58 = vmul.f32 0.01, %v5318_v57  ;;  %vm1554_vm8 = vcmp.ge.f32.partialorder %v5318_v57, 0.0 }
 0x38d   : > { %v1563_v61 = vmul.f32 0.01, %v5319_v1  ;;  %v1537_v62 = vpop.f32.mrb[2].mxu1  ;;  %vm1555_vm13 = vcmp.ge.f32.partialorder %v5319_v1, 0.0 }
 0x38e   : > { %v5320_v3 = vadd.f32 %v1537_v62, %v1352_v60  ;;  %v1539_v31 = vpop.f32.mrb[3].mxu1  ;;  %v1570_v20 = vsel %vm1554_vm8, %v5318_v57, %v1562_v58  ;;  %v4335_v58 = vld [vmem:[%s8542_s2 + $0x40] sm:$0xff]  ;;  %v4338_v62 = vld [vmem:[%s8542_s2 + $0x58] sm:$0xff] }
 0x38f   : > { %v5321_v10 = vadd.f32 %v1539_v31, %v1352_v60  ;;  %v1571_v13 = vsel %vm1555_vm13, %v5319_v1, %v1563_v61  ;;  %v7347_v32 = vadd.f32 %v6431_v6, %v1570_v20  ;;  %v1916_v1 = vld [vmem:[#allocation3 + $0xc8] sm:$0xff]  ;;  %v4337_v61 = vld [vmem:[%s8542_s2 + $0x50] sm:$0xff] }
 0x390   : > { %vm1556_vm10 = vcmp.ge.f32.partialorder %v5320_v3, 0.0  ;;  %v1564_v53 = vmul.f32 0.01, %v5320_v3  ;;  %v7353_v29 = vadd.f32 %v6433_v28, %v1571_v13  ;;  %2100 = vmatprep.mubr.f32.mxu0 %v1916_v1  ;;  %v4336_v60 = vld [vmem:[%s8542_s2 + $0x48] sm:$0xff] }
 0x391   : > { %vm1557_vm5 = vcmp.ge.f32.partialorder %v5321_v10, 0.0  ;;  %v1565_v30 = vmul.f32 0.01, %v5321_v10  ;;  %v1543_v15 = vpop.f32.mrb[4].mxu1 }
 0x392   : > { %v1572_v16 = vsel %vm1556_vm10, %v5320_v3, %v1564_v53  ;;  %v5322_v25 = vadd.f32 %v1543_v15, %v1357_v56  ;;  %v1545_v51 = vpop.f32.mrb[5].mxu1 }
 0x393   : > { %v7350_v14 = vadd.f32 %v6432_v7, %v1572_v16  ;;  %v1573_v17 = vsel %vm1557_vm5, %v5321_v10, %v1565_v30  ;;  %v5323_v26 = vadd.f32 %v1545_v51, %v1357_v56  ;;  %vm8648_vm5 = vcmp.lt.s32.totalorder %v6744_v19, 16 }
 0x394   : > { %v7356_v63 = vadd.f32 %v6434_v34, %v1573_v17  ;;  %v1566_v12 = vmul.f32 0.01, %v5322_v25  ;;  %vm1558_vm11 = vcmp.ge.f32.partialorder %v5322_v25, 0.0 }
 0x395   : > { %v1567_v24 = vmul.f32 0.01, %v5323_v26  ;;  %v1549_v35 = vpop.f32.mrb[6].mxu1  ;;  %v5791_v36 = vpack.i.bf16 %v7350_v14, %v7347_v32  ;;  %vm1559_vm8 = vcmp.ge.f32.partialorder %v5323_v26, 0.0 }
 0x396   : > { %v5324_v21 = vadd.f32 %v1549_v35, %v1362_v22  ;;  %v1551_v37 = vpop.f32.mrb[7].mxu1  ;;  %v5796_v38 = vpack.i.bf16 %v7356_v63, %v7353_v29  ;;  %v1574_v8 = vsel %vm1558_vm11, %v5322_v25, %v1566_v12  ;;  %vm8649_vm11 = vmmov %vm8648_vm5 }
 0x397   : > { %v5325_v39 = vadd.f32 %v1551_v37, %v1362_v22  ;;  %5792 = vrot.lane.b32.xlu1 %v5791_v36, %s6546_s24  ;;  %v1575_v40 = vsel %vm1559_vm8, %v5323_v26, %v1567_v24  ;;  %v7365_v46 = vadd.f32 %v6435_v45, %v1574_v8  ;;  %vm8650_vm8 = vmmov %vm8648_vm5 }
 0x398   : > { %vm1560_vm13 = vcmp.ge.f32.partialorder %v5324_v21, 0.0  ;;  %v1568_v9 = vmul.f32 0.01, %v5324_v21  ;;  %5797 = vrot.lane.b32.xlu0 %v5796_v38, %s6546_s24  ;;  %v7371_v50 = vadd.f32 %v6437_v49, %v1575_v40 }
 0x399   : > { %vm1561_vm10 = vcmp.ge.f32.partialorder %v5325_v39, 0.0  ;;  %v1569_v43 = vmul.f32 0.01, %v5325_v39 }
 0x39a   : > { %v1576_v44 = vsel %vm1560_vm13, %v5324_v21, %v1568_v9  ;;  %vm8651_vm13 = vmmov %vm8648_vm5 }
 0x39b   : > { %v7368_v2 = vadd.f32 %v6436_v48, %v1576_v44  ;;  %v1577_v4 = vsel %vm1561_vm10, %v5325_v39, %v1569_v43  ;;  %vm8652_vm10 = vmmov %vm8648_vm5 }
 0x39c   : > { %v7374_v55 = vadd.f32 %v6438_v54, %v1577_v4 }
 0x39d   : > { %v5801_v57 = vpack.i.bf16 %v7368_v2, %v7365_v46 }
 0x39e   : > { %v5811_v0 = vpack.i.bf16 %v7374_v55, %v7371_v50 }
 0x39f   : > { %5802 = vrot.lane.b32.xlu1 %v5801_v57, %s6546_s24 }
 0x3a0   : > { %5812 = vrot.lane.b32.xlu0 %v5811_v0, %s6546_s24 }
 0x3a3   : > { %5807 = vrot.lane.b32.xlu1 %v5791_v36, %s6547_s26 }
 0x3a4   : > { %5817 = vrot.lane.b32.xlu0 %v5796_v38, %s6547_s26 }
 0x3a7   : > { %5822 = vrot.lane.b32.xlu1 %v5801_v57, %s6547_s26 }
 0x3a8   : > { %5832 = vrot.lane.b32.xlu0 %v5811_v0, %s6547_s26 }
 0x3ab   : > { %5827 = vrot.lane.b32.xlu1 %v5791_v36, %s6548_s29 }
 0x3ac   : > { %5837 = vrot.lane.b32.xlu0 %v5796_v38, %s6548_s29 }
 0x3af   : > { %5842 = vrot.lane.b32.xlu1 %v5801_v57, %s6548_s29 }
 0x3b0   : > { %5852 = vrot.lane.b32.xlu0 %v5811_v0, %s6548_s29 }
 0x3b3   : > { %5847 = vrot.lane.b32.xlu1 %v5791_v36, %s6549_s30 }
 0x3b4   : > { %5857 = vrot.lane.b32.xlu0 %v5796_v38, %s6549_s30 }
 0x3b7   : > { %5862 = vrot.lane.b32.xlu1 %v5801_v57, %s6549_s30 }
 0x3b8   : > { %5867 = vrot.lane.b32.xlu0 %v5811_v0, %s6549_s30 }
 0x3bb   : > { %5872 = vrot.lane.b32.xlu1 %v5791_v36, %s6550_s4 }
 0x3bc   : > { %5877 = vrot.lane.b32.xlu0 %v5796_v38, %s6550_s4 }
 0x3bf   : > { %5882 = vrot.lane.b32.xlu1 %v5801_v57, %s6550_s4 }
 0x3c0   : > { %5892 = vrot.lane.b32.xlu0 %v5811_v0, %s6550_s4 }
 0x3c3   : > { %5887 = vrot.lane.b32.xlu1 %v5791_v36, %s6551_s5 }
 0x3c4   : > { %5897 = vrot.lane.b32.xlu0 %v5796_v38, %s6551_s5 }
 0x3c7   : > { %5902 = vrot.lane.b32.xlu1 %v5801_v57, %s6551_s5 }
 0x3c8   : > { %5912 = vrot.lane.b32.xlu0 %v5811_v0, %s6551_s5 }
 0x3cb   : > { %5907 = vrot.lane.b32.xlu1 %v5791_v36, %s6552_s6 }
 0x3cc   : > { %5917 = vrot.lane.b32.xlu0 %v5796_v38, %s6552_s6 }
 0x3cf   : > { %5922 = vrot.lane.b32.xlu1 %v5801_v57, %s6552_s6 }
 0x3d0   : > { %5927 = vrot.lane.b32.xlu0 %v5811_v0, %s6552_s6 }
 0x3d3   : > { %5932 = vrot.lane.b32.xlu1 %v5791_v36, %s6553_s7 }
 0x3d4   : > { %5937 = vrot.lane.b32.xlu0 %v5796_v38, %s6553_s7 }
 0x3d7   : > { %5942 = vrot.lane.b32.xlu1 %v5801_v57, %s6553_s7 }
 0x3d8   : > { %5947 = vrot.lane.b32.xlu0 %v5811_v0, %s6553_s7 }
 0x3db   : > { %2006 = vperm.xlu1 %5630, %v4335_v58  }
 0x3dc   : > { %2011 = vperm.xlu0 %5629, %v4336_v60  }
 0x3df   : > { %2016 = vperm.xlu1 %5630, %v4337_v61  }
 0x3e0   : > { %2021 = vperm.xlu0 %5629, %v4338_v62  }
 0x409   : > { %v5793_v3 = vpop.permute.xlu1 %5792 }
 0x40a   : > { %v5795_v31 = vunpack.i.h.bf16 %v5793_v3  ;;  %v5794_v10 = vunpack.i.l.bf16 %v5793_v3  ;;  %v5798_v20 = vpop.permute.xlu0 %5797 }
 0x40b   : > { %v5800_v53 = vunpack.i.h.bf16 %v5798_v20  ;;  %v5799_v56 = vunpack.i.l.bf16 %v5798_v20 }
 0x40d   : > { %v1602_v13 = vsel %vm251_vm2, %v5794_v10, %v5799_v56  ;;  %v1603_v30 = vsel %vm251_vm2, %v5795_v31, %v5800_v53  ;;  %v1606_v15 = vsel %vm251_vm2, %v5799_v56, %v5794_v10  ;;  %v1607_v16 = vsel %vm251_vm2, %v5800_v53, %v5795_v31 }
 0x40e   : > { %v4913_v25 = vpack.c.bf16 %v1607_v16, %v1606_v15  ;;  %v4910_v51 = vpack.c.bf16 %v1603_v30, %v1602_v13 }
 0x410   : > { %4912 = vmatprep.subr.msk.bf16.mxu0 %vm6781_vm6, %v4910_v51 }
 0x411   : > { %v5803_v6 = vpop.permute.xlu1 %5802  ;;  %4915 = vmatpush1.bf16.msk.msra.mxu0 %vm6789_vm7, %v4913_v25 }
 0x412   : > { %v5805_v7 = vunpack.i.h.bf16 %v5803_v6  ;;  %v5804_v17 = vunpack.i.l.bf16 %v5803_v6  ;;  %v5813_v26 = vpop.permute.xlu0 %5812 }
 0x413   : > { %v5815_v28 = vunpack.i.h.bf16 %v5813_v26  ;;  %v5814_v34 = vunpack.i.l.bf16 %v5813_v26 }
 0x415   : > { %v1604_v12 = vsel %vm251_vm2, %v5804_v17, %v5814_v34  ;;  %v1605_v22 = vsel %vm251_vm2, %v5805_v7, %v5815_v28  ;;  %v1608_v24 = vsel %vm251_vm2, %v5814_v34, %v5804_v17  ;;  %v1609_v35 = vsel %vm251_vm2, %v5815_v28, %v5805_v7  ;;  %v5808_v36 = vpop.permute.xlu1 %5807 }
 0x416   : > { %v4919_v21 = vpack.c.bf16 %v1609_v35, %v1608_v24  ;;  %v5810_v37 = vunpack.i.h.bf16 %v5808_v36  ;;  %v5809_v38 = vunpack.i.l.bf16 %v5808_v36  ;;  %v5818_v39 = vpop.permute.xlu0 %5817  ;;  %v4916_v8 = vpack.c.bf16 %v1605_v22, %v1604_v12 }
 0x417   : > { %v5820_v9 = vunpack.i.h.bf16 %v5818_v39  ;;  %v5819_v40 = vunpack.i.l.bf16 %v5818_v39 }
 0x418   : > { %4918 = vmatprep.subr.msk.bf16.mxu0 %vm6781_vm6, %v4916_v8 }
 0x419   : > { %v1646_v43 = vsel %vm8648_vm5, %v5819_v40, %v5809_v38  ;;  %v1647_v44 = vsel %vm8649_vm11, %v5820_v9, %v5810_v37  ;;  %v5823_v45 = vpop.permute.xlu1 %5822  ;;  %4921 = vmatpush1.bf16.msk.msra.mxu0 %vm6789_vm7, %v4919_v21  ;;  %v1642_v48 = vsel %vm8650_vm8, %v5809_v38, %v5819_v40  ;;  %v1643_v4 = vsel %vm8651_vm13, %v5810_v37, %v5820_v9  ;;  %vm8653_vm11 = vmmov %vm8648_vm5 }
 0x41a   : > { %v4924_v49 = vpack.c.bf16 %v1647_v44, %v1646_v43  ;;  %v5825_v54 = vunpack.i.h.bf16 %v5823_v45  ;;  %v5824_v57 = vunpack.i.l.bf16 %v5823_v45  ;;  %v5833_v0 = vpop.permute.xlu0 %5832  ;;  %v4922_v1 = vpack.c.bf16 %v1643_v4, %v1642_v48  ;;  %vm8654_vm8 = vmmov %vm8648_vm5 }
 0x41b   : > { %v5835_v58 = vunpack.i.h.bf16 %v5833_v0  ;;  %v5834_v60 = vunpack.i.l.bf16 %v5833_v0  ;;  %vm8655_vm13 = vcmp.lt.s32.totalorder %v6744_v19, 15 }
 0x41c   : > { %4923 = vmatprep.subr.bf16.mxu0 %v4922_v1 }
 0x41d   : > { %v1648_v61 = vsel %vm8652_vm10, %v5834_v60, %v5824_v57  ;;  %v1649_v62 = vsel %vm8648_vm5, %v5835_v58, %v5825_v54  ;;  %v5828_v3 = vpop.permute.xlu1 %5827  ;;  %4926 = vmatpush1.bf16.msk.msra.mxu0 %vm6825_vm9, %v4924_v49  ;;  %v1644_v31 = vsel %vm8653_vm11, %v5824_v57, %v5834_v60  ;;  %v1645_v10 = vsel %vm8654_vm8, %v5825_v54, %v5835_v58  ;;  %vm8656_vm10 = vmmov %vm8655_vm13 }
 0x41e   : > { %v4929_v20 = vpack.c.bf16 %v1649_v62, %v1648_v61  ;;  %v5830_v53 = vunpack.i.h.bf16 %v5828_v3  ;;  %v5829_v56 = vunpack.i.l.bf16 %v5828_v3  ;;  %v5838_v13 = vpop.permute.xlu0 %5837  ;;  %v4927_v30 = vpack.c.bf16 %v1645_v10, %v1644_v31  ;;  %vm8657_vm5 = vmmov %vm8656_vm10 }
 0x41f   : > { %v5840_v15 = vunpack.i.h.bf16 %v5838_v13  ;;  %v5839_v16 = vunpack.i.l.bf16 %v5838_v13  ;;  %vm8658_vm11 = vmmov %vm8657_vm5 }
 0x420   : > { %4928 = vmatprep.subr.bf16.mxu0 %v4927_v30  ;;  %vm8659_vm8 = vmmov %vm8657_vm5 }
 0x421   : > { %v1682_v25 = vsel %vm8655_vm13, %v5829_v56, %v5839_v16  ;;  %v1683_v51 = vsel %vm8656_vm10, %v5830_v53, %v5840_v15  ;;  %v1686_v6 = vsel %vm8657_vm5, %v5839_v16, %v5829_v56  ;;  %v1687_v7 = vsel %vm8658_vm11, %v5840_v15, %v5830_v53  ;;  %v5843_v17 = vpop.permute.xlu1 %5842  ;;  %4931 = vmatpush1.bf16.msk.msra.mxu0 %vm6825_vm9, %v4929_v20  ;;  %vm8660_vm13 = vmmov %vm8657_vm5 }
 0x422   : > { %v4935_v26 = vpack.c.bf16 %v1687_v7, %v1686_v6  ;;  %v5845_v28 = vunpack.i.h.bf16 %v5843_v17  ;;  %v5844_v34 = vunpack.i.l.bf16 %v5843_v17  ;;  %v5853_v12 = vpop.permute.xlu0 %5852  ;;  %v4932_v22 = vpack.c.bf16 %v1683_v51, %v1682_v25  ;;  %vm8661_vm10 = vmmov %vm8657_vm5 }
 0x423   : > { %v5855_v24 = vunpack.i.h.bf16 %v5853_v12  ;;  %v5854_v35 = vunpack.i.l.bf16 %v5853_v12  ;;  %vm8662_vm11 = vcmp.lt.s32.totalorder %v6744_v19, 1  ;;  %v4956_v25 = vpack.c.bf16 %v7356_v63, %v7353_v29 }
 0x424   : > { %4934 = vmatprep.subr.msk.bf16.mxu0 %vm6854_vm12, %v4932_v22 }
 0x425   : > { %v1684_v36 = vsel %vm8659_vm8, %v5844_v34, %v5854_v35  ;;  %v1685_v21 = vsel %vm8660_vm13, %v5845_v28, %v5855_v24  ;;  %v1688_v37 = vsel %vm8661_vm10, %v5854_v35, %v5844_v34  ;;  %v1689_v38 = vsel %vm8657_vm5, %v5855_v24, %v5845_v28  ;;  %v5848_v39 = vpop.permute.xlu1 %5847  ;;  %4937 = vmatpush1.bf16.msk.msra.mxu0 %vm6875_vm15, %v4935_v26  ;;  %vm8663_vm8 = vmmov %vm8662_vm11 }
 0x426   : > { %v4941_v8 = vpack.c.bf16 %v1689_v38, %v1688_v37  ;;  %v5850_v9 = vunpack.i.h.bf16 %v5848_v39  ;;  %v5849_v40 = vunpack.i.l.bf16 %v5848_v39  ;;  %v5858_v43 = vpop.permute.xlu0 %5857  ;;  %v4938_v44 = vpack.c.bf16 %v1685_v21, %v1684_v36  ;;  %vm8664_vm13 = vmmov %vm8663_vm8 }
 0x427   : > { %v5860_v45 = vunpack.i.h.bf16 %v5858_v43  ;;  %v5859_v48 = vunpack.i.l.bf16 %v5858_v43  ;;  %vm8665_vm10 = vmmov %vm8663_vm8  ;;  %v4958_v34 = vpack.c.bf16 %v7350_v14, %v7347_v32  ;;  %v4960_v24 = vpack.c.bf16 %v7374_v55, %v7371_v50 }
 0x428   : > { %4940 = vmatprep.subr.msk.bf16.mxu0 %vm6854_vm12, %v4938_v44  ;;  %vm8666_vm5 = vmmov %vm8663_vm8 }
 0x429   : > { %v1722_v4 = vsel %vm8662_vm11, %v5849_v40, %v5859_v48  ;;  %v1723_v49 = vsel %vm8663_vm8, %v5850_v9, %v5860_v45  ;;  %v1726_v54 = vsel %vm8664_vm13, %v5859_v48, %v5849_v40  ;;  %v1727_v57 = vsel %vm8665_vm10, %v5860_v45, %v5850_v9  ;;  %v5863_v0 = vpop.permute.xlu1 %5862  ;;  %4943 = vmatpush1.bf16.msk.msra.mxu0 %vm6875_vm15, %v4941_v8  ;;  %vm8667_vm11 = vmmov %vm8666_vm5 }
 0x42a   : > { %v4947_v1 = vpack.c.bf16 %v1727_v57, %v1726_v54  ;;  %v5865_v58 = vunpack.i.h.bf16 %v5863_v0  ;;  %v5864_v60 = vunpack.i.l.bf16 %v5863_v0  ;;  %v5868_v61 = vpop.permute.xlu0 %5867  ;;  %v4944_v62 = vpack.c.bf16 %v1723_v49, %v1722_v4  ;;  %vm8668_vm8 = vmmov %vm8666_vm5 }
 0x42b   : > { %v5870_v3 = vunpack.i.h.bf16 %v5868_v61  ;;  %v5869_v31 = vunpack.i.l.bf16 %v5868_v61  ;;  %vm8669_vm13 = vmmov %vm8666_vm5  ;;  %vm8670_vm10 = vcmp.lt.s32.totalorder %v6744_v19, 127  ;;  %v4962_v40 = vpack.c.bf16 %v7368_v2, %v7365_v46 }
 0x42c   : > { %4946 = vmatprep.subr.msk.bf16.mxu0 %vm6781_vm6, %v4944_v62 }
 0x42d   : > { %v1724_v10 = vsel %vm8666_vm5, %v5864_v60, %v5869_v31  ;;  %v1725_v20 = vsel %vm8667_vm11, %v5865_v58, %v5870_v3  ;;  %v1728_v53 = vsel %vm8668_vm8, %v5869_v31, %v5864_v60  ;;  %v1729_v56 = vsel %vm8669_vm13, %v5870_v3, %v5865_v58  ;;  %v5873_v13 = vpop.permute.xlu1 %5872  ;;  %4949 = vmatpush1.bf16.msk.msra.mxu0 %vm6900_vm0, %v4947_v1  ;;  %vm8671_vm5 = vmmov %vm8670_vm10 }
 0x42e   : > { %v4953_v30 = vpack.c.bf16 %v1729_v56, %v1728_v53  ;;  %v5878_v15 = vpop.permute.xlu0 %5877  ;;  %v4950_v16 = vpack.c.bf16 %v1725_v20, %v1724_v10  ;;  %v5875_v51 = vunpack.i.h.bf16 %v5873_v13  ;;  %v5874_v6 = vunpack.i.l.bf16 %v5873_v13  ;;  %vm8672_vm11 = vmmov %vm8671_vm5 }
 0x42f   : > { %v5880_v7 = vunpack.i.h.bf16 %v5878_v15  ;;  %v5879_v17 = vunpack.i.l.bf16 %v5878_v15  ;;  %vm8673_vm8 = vmmov %vm8671_vm5 }
 0x430   : > { %4952 = vmatprep.subr.msk.bf16.mxu0 %vm6781_vm6, %v4950_v16  ;;  %vm8674_vm13 = vmmov %vm8671_vm5 }
 0x431   : > { %v5883_v26 = vpop.permute.xlu1 %5882  ;;  %4955 = vmatpush1.bf16.msk.msra.mxu0 %vm6900_vm0, %v4953_v30  ;;  %v1774_v12 = vsel %vm8670_vm10, %v5879_v17, %v5874_v6  ;;  %v1775_v22 = vsel %vm8671_vm5, %v5880_v7, %v5875_v51  ;;  %v1770_v8 = vsel %vm8672_vm11, %v5874_v6, %v5879_v17  ;;  %v1771_v9 = vsel %vm8673_vm8, %v5875_v51, %v5880_v7  ;;  %vm8675_vm10 = vmmov %vm8671_vm5 }
 0x432   : > { %v5893_v28 = vpop.permute.xlu0 %5892  ;;  %4957 = vmatprep.subr.bf16.mxu0 %v4956_v25  ;;  %v5885_v35 = vunpack.i.h.bf16 %v5883_v26  ;;  %v5884_v36 = vunpack.i.l.bf16 %v5883_v26  ;;  %v4964_v43 = vpack.c.bf16 %v1775_v22, %v1774_v12  ;;  %v4967_v1 = vpack.c.bf16 %v1771_v9, %v1770_v8  ;;  %vm8676_vm11 = vmmov %vm8671_vm5 }
 0x433   : > { %v5895_v21 = vunpack.i.h.bf16 %v5893_v28  ;;  %v5894_v37 = vunpack.i.l.bf16 %v5893_v28  ;;  %vm8677_vm8 = vcmp.lt.s32.totalorder %v6744_v19, 113 }
 0x435   : > { %v5888_v38 = vpop.permute.xlu1 %5887  ;;  %4959 = vmatpush1.bf16.msra.mxu0 %v4958_v34  ;;  %v1776_v49 = vsel %vm8674_vm13, %v5894_v37, %v5884_v36  ;;  %v1777_v54 = vsel %vm8675_vm10, %v5895_v21, %v5885_v35  ;;  %v1772_v58 = vsel %vm8671_vm5, %v5884_v36, %v5894_v37  ;;  %v1773_v60 = vsel %vm8676_vm11, %v5885_v35, %v5895_v21  ;;  %vm8678_vm13 = vmmov %vm8677_vm8 }
 0x436   : > { %v5898_v39 = vpop.permute.xlu0 %5897  ;;  %4961 = vmatprep.subr.bf16.mxu0 %v4960_v24  ;;  %v5890_v44 = vunpack.i.h.bf16 %v5888_v38  ;;  %v5889_v45 = vunpack.i.l.bf16 %v5888_v38  ;;  %v4970_v3 = vpack.c.bf16 %v1777_v54, %v1776_v49  ;;  %v4973_v30 = vpack.c.bf16 %v1773_v60, %v1772_v58  ;;  %vm8679_vm10 = vmmov %vm8677_vm8 }
 0x437   : > { %v5900_v48 = vunpack.i.h.bf16 %v5898_v39  ;;  %v5899_v4 = vunpack.i.l.bf16 %v5898_v39  ;;  %vm8680_vm5 = vmmov %vm8677_vm8 }
 0x438   : > { %vm8681_vm11 = vmmov %vm8680_vm5 }
 0x439   : > { %v5903_v57 = vpop.permute.xlu1 %5902  ;;  %4963 = vmatpush1.bf16.msra.mxu0 %v4962_v40  ;;  %v1814_v61 = vsel %vm8677_vm8, %v5899_v4, %v5889_v45  ;;  %v1815_v62 = vsel %vm8678_vm13, %v5900_v48, %v5890_v44  ;;  %v1810_v15 = vsel %vm8679_vm10, %v5889_v45, %v5899_v4  ;;  %v1811_v16 = vsel %vm8680_vm5, %v5890_v44, %v5900_v48  ;;  %vm8682_vm8 = vmmov %vm8680_vm5 }
 0x43a   : > { %v5913_v0 = vpop.permute.xlu0 %5912  ;;  %4966 = vmatprep.subr.msk.bf16.mxu0 %vm6854_vm12, %v4964_v43  ;;  %v5905_v31 = vunpack.i.h.bf16 %v5903_v57  ;;  %v5904_v10 = vunpack.i.l.bf16 %v5903_v57  ;;  %v4976_v25 = vpack.c.bf16 %v1815_v62, %v1814_v61  ;;  %v4979_v22 = vpack.c.bf16 %v1811_v16, %v1810_v15  ;;  %vm8683_vm13 = vmmov %vm8680_vm5 }
 0x43b   : > { %v5915_v20 = vunpack.i.h.bf16 %v5913_v0  ;;  %v5914_v53 = vunpack.i.l.bf16 %v5913_v0  ;;  %vm8684_vm10 = vmmov %vm8680_vm5  ;;  %vm8685_vm5 = vcmp.lt.s32.totalorder %v6744_v19, 112 }
 0x43d   : > { %v5908_v56 = vpop.permute.xlu1 %5907  ;;  %4969 = vmatpush1.bf16.msk.msra.mxu0 %vm6944_vm14, %v4967_v1  ;;  %v1816_v26 = vsel %vm8681_vm11, %v5914_v53, %v5904_v10  ;;  %v1817_v28 = vsel %vm8682_vm8, %v5915_v20, %v5905_v31  ;;  %v1812_v24 = vsel %vm8683_vm13, %v5904_v10, %v5914_v53  ;;  %v1813_v35 = vsel %vm8684_vm10, %v5905_v31, %v5915_v20  ;;  %vm8686_vm11 = vmmov %vm8685_vm5 }
 0x43e   : > { %v5918_v13 = vpop.permute.xlu0 %5917  ;;  %4972 = vmatprep.subr.msk.bf16.mxu0 %vm6854_vm12, %v4970_v3  ;;  %v5910_v51 = vunpack.i.h.bf16 %v5908_v56  ;;  %v5909_v6 = vunpack.i.l.bf16 %v5908_v56  ;;  %v4982_v37 = vpack.c.bf16 %v1817_v28, %v1816_v26  ;;  %v4985_v44 = vpack.c.bf16 %v1813_v35, %v1812_v24  ;;  %vm8687_vm8 = vmmov %vm8685_vm5  ;;  %v1915_v26 = vld [vmem:[#allocation3 + $0xc0] sm:$0xff]  ;;  %v1918_v35 = vld [vmem:[#allocation3 + $0xd8] sm:$0xff] }
 0x43f   : > { %v5920_v7 = vunpack.i.h.bf16 %v5918_v13  ;;  %v5919_v17 = vunpack.i.l.bf16 %v5918_v13  ;;  %vm8688_vm13 = vmmov %vm8685_vm5  ;;  %v1919_v28 = vld [vmem:[#allocation3 + $0xe0] sm:$0xff] }
 0x440   : > { %vm8689_vm10 = vmmov %vm8685_vm5 }
 0x441   : > { %v5923_v34 = vpop.permute.xlu1 %5922  ;;  %4975 = vmatpush1.bf16.msk.msra.mxu0 %vm6944_vm14, %v4973_v30  ;;  %v1854_v36 = vsel %vm8685_vm5, %v5919_v17, %v5909_v6  ;;  %v1855_v21 = vsel %vm8686_vm11, %v5920_v7, %v5910_v51  ;;  %v1850_v45 = vsel %vm8687_vm8, %v5909_v6, %v5919_v17  ;;  %v1851_v48 = vsel %vm8688_vm13, %v5910_v51, %v5920_v7  ;;  %vm8690_vm11 = vmmov %vm8685_vm5 }
 0x442   : > { %v5928_v12 = vpop.permute.xlu0 %5927  ;;  %4978 = vmatprep.subr.msk.bf16.mxu0 %vm6980_vm1, %v4976_v25  ;;  %v5925_v38 = vunpack.i.h.bf16 %v5923_v34  ;;  %v5924_v39 = vunpack.i.l.bf16 %v5923_v34  ;;  %v4988_v4 = vpack.c.bf16 %v1855_v21, %v1854_v36  ;;  %v4991_v3 = vpack.c.bf16 %v1851_v48, %v1850_v45  ;;  %vm8691_vm8 = vmmov %vm8685_vm5  ;;  %v1922_v36 = vld [vmem:[#allocation3 + $0xf8] sm:$0xff] }
 0x443   : > { %v5930_v8 = vunpack.i.h.bf16 %v5928_v12  ;;  %v5929_v9 = vunpack.i.l.bf16 %v5928_v12  ;;  %vm8692_vm13 = vcmp.lt.s32.totalorder %v6744_v19, 111 }
 0x445   : > { %v5933_v40 = vpop.permute.xlu1 %5932  ;;  %4981 = vmatpush1.bf16.msk.msra.mxu0 %vm6900_vm0, %v4979_v22  ;;  %v1856_v1 = vsel %vm8689_vm10, %v5929_v9, %v5924_v39  ;;  %v1857_v58 = vsel %vm8685_vm5, %v5930_v8, %v5925_v38  ;;  %v1852_v62 = vsel %vm8690_vm11, %v5924_v39, %v5929_v9  ;;  %v1853_v31 = vsel %vm8691_vm8, %v5925_v38, %v5930_v8  ;;  %vm8693_vm10 = vmmov %vm8692_vm13  ;;  %v1925_v38 = vld [vmem:[#allocation3 + $0x110] sm:$0xff]  ;;  %v1924_v39 = vld [vmem:[#allocation3 + $0x108] sm:$0xff] }
 0x446   : > { %v5938_v43 = vpop.permute.xlu0 %5937  ;;  %4984 = vmatprep.subr.msk.bf16.mxu0 %vm6980_vm1, %v4982_v37  ;;  %v5935_v49 = vunpack.i.h.bf16 %v5933_v40  ;;  %v5934_v54 = vunpack.i.l.bf16 %v5933_v40  ;;  %v4993_v53 = vpack.c.bf16 %v1857_v58, %v1856_v1  ;;  %v4996_v16 = vpack.c.bf16 %v1853_v31, %v1852_v62  ;;  %vm8694_vm5 = vmmov %vm8693_vm10  ;;  %v1921_v37 = vld [vmem:[#allocation3 + $0xf0] sm:$0xff]  ;;  %v1920_v9 = vld [vmem:[#allocation3 + $0xe8] sm:$0xff] }
 0x447   : > { %v5940_v57 = vunpack.i.h.bf16 %v5938_v43  ;;  %v5939_v0 = vunpack.i.l.bf16 %v5938_v43  ;;  %vm8695_vm11 = vmmov %vm8694_vm5  ;;  %v1917_v8 = vld [vmem:[#allocation3 + $0xd0] sm:$0xff]  ;;  %v1923_v40 = vld [vmem:[#allocation3 + $0x100] sm:$0xff] }
 0x448   : > { %vm8696_vm8 = vmmov %vm8694_vm5  ;;  %v1926_v43 = vld [vmem:[#allocation3 + $0x118] sm:$0xff] }
 0x449   : > { %4987 = vmatpush1.bf16.msk.msra.mxu0 %vm6900_vm0, %v4985_v44  ;;  %v5943_v60 = vpop.permute.xlu1 %5942  ;;  %v1894_v10 = vsel %vm8692_vm13, %v5939_v0, %v5934_v54  ;;  %v1895_v20 = vsel %vm8693_vm10, %v5940_v57, %v5935_v49  ;;  %v1890_v25 = vsel %vm8694_vm5, %v5934_v54, %v5939_v0  ;;  %v1891_v51 = vsel %vm8695_vm11, %v5935_v49, %v5940_v57  ;;  %vm8697_vm13 = vmmov %vm8694_vm5 }
 0x44a   : > { %v5948_v61 = vpop.permute.xlu0 %5947  ;;  %4990 = vmatprep.subr.msk.bf16.mxu0 %vm7012_vm4, %v4988_v4  ;;  %v5945_v56 = vunpack.i.h.bf16 %v5943_v60  ;;  %v5944_v13 = vunpack.i.l.bf16 %v5943_v60  ;;  %v4998_v6 = vpack.c.bf16 %v1895_v20, %v1894_v10  ;;  %v5001_v34 = vpack.c.bf16 %v1891_v51, %v1890_v25  ;;  %vm8698_vm10 = vmmov %vm8694_vm5 }
 0x44b   : > { %v5950_v30 = vunpack.i.h.bf16 %v5948_v61  ;;  %v5949_v15 = vunpack.i.l.bf16 %v5948_v61  ;;  %vm8699_vm11 = vcmask 261120  }
 0x44d   : > { %4992 = vmatpush1.bf16.msra.mxu0 %v4991_v3  ;;  %v1896_v7 = vsel %vm8696_vm8, %v5949_v15, %v5944_v13  ;;  %v1897_v17 = vsel %vm8697_vm13, %v5950_v30, %v5945_v56  ;;  %v1892_v12 = vsel %vm8698_vm10, %v5944_v13, %v5949_v15  ;;  %v1893_v22 = vsel %vm8694_vm5, %v5945_v56, %v5950_v30  ;;  %vm8700_vm8 = vmmov %vm8699_vm11 }
 0x44e   : > { %4995 = vmatprep.subr.msk.bf16.mxu0 %vm7012_vm4, %v4993_v53  ;;  %v5004_v24 = vpack.c.bf16 %v1897_v17, %v1896_v7  ;;  %v5007_v21 = vpack.c.bf16 %v1893_v22, %v1892_v12  ;;  %vm8701_vm13 = vmmov %vm8700_vm8 }
 0x44f   : > { %vm8702_vm10 = vmmov %vm8700_vm8 }
 0x451   : > { %4997 = vmatpush1.bf16.msra.mxu0 %v4996_v16 }
 0x452   : > { %5000 = vmatprep.subr.msk.bf16.mxu0 %vm7038_vm3, %v4998_v6 }
 0x454   : > { %2101 = vmatmul.mubr.f32.vlgmr.msra.gmra.mrb[8].mxu0 %v1915_v26 }
 0x455   : > { %5003 = vmatpush1.bf16.msk.msra.mxu0 %vm6944_vm14, %v5001_v34  ;;  %2106 = vmatprep.mubr.f32.mxu0 %v1919_v28 }
 0x456   : > { %5006 = vmatprep.subr.msk.bf16.mxu0 %vm7038_vm3, %v5004_v24 }
 0x458   : > { %2107 = vmatmul.mubr.f32.gmra.mrb[10].mxu0 %v1918_v35 }
 0x459   : > { %5009 = vmatpush1.bf16.msk.msra.mxu0 %vm6944_vm14, %v5007_v21  ;;  %2112 = vmatprep.mubr.f32.mxu0 %v1922_v36 }
 0x45a   : > { %v2007_v44 = vpop.permute.xlu1 %2006 }
 0x45b   : > { %v2012_v54 = vpop.permute.xlu0 %2011 }
 0x45c   : > { %2113 = vmatmul.mubr.f32.gmra.mrb[12].mxu0 %v1921_v37 }
 0x45d   : > { %2118 = vmatprep.mubr.f32.mxu0 %v1925_v38 }
 0x45e   : > { %v2017_v3 = vpop.permute.xlu1 %2016 }
 0x45f   : > { %v2022_v7 = vpop.permute.xlu0 %2021 }
 0x460   : > { %2119 = vmatmul.mubr.f32.gmra.mrb[14].mxu0 %v1924_v39 }
 0x461   : > { %2189 = vmatprep.mubr.f32.mxu0 %v6555_v27 }
 0x464   : > { %4339 = vmatmul.mubr.msk.f32.vlgmr.msra.gmra.mrb[8].mxu0 %vm8699_vm11, %v1917_v8 }
 0x465   : > { %2195 = vmatprep.mubr.f32.mxu0 %v6555_v27 }
 0x468   : > { %4340 = vmatmul.mubr.msk.f32.gmra.mrb[10].mxu0 %vm8700_vm8, %v1920_v9 }
 0x469   : > { %2201 = vmatprep.mubr.f32.mxu0 %v6555_v27 }
 0x46c   : > { %4341 = vmatmul.mubr.msk.f32.gmra.mrb[12].mxu0 %vm8701_vm13, %v1923_v40 }
 0x46d   : > { %2207 = vmatprep.mubr.f32.mxu0 %v6555_v27 }
 0x470   : > { %4342 = vmatmul.mubr.msk.f32.gmra.mrb[14].mxu0 %vm8702_vm10, %v1926_v43 }
 0x537   : > { %v2191_v45 = vpop.f32.mrb[8].mxu0 }
 0x538   : > { %v5326_v48 = vadd.f32 %v2191_v45, %v2007_v44  ;;  %v2193_v4 = vpop.f32.mrb[9].mxu0  ;;  %v4343_v45 = vld [vmem:[%s8542_s2 + $0x60] sm:$0xff] }
 0x539   : > { %v5327_v49 = vadd.f32 %v2193_v4, %v2007_v44  ;;  %v2568_v44 = vld [vmem:[#allocation3 + $0x128] sm:$0xff]  ;;  %v4345_v4 = vld [vmem:[%s8542_s2 + $0x70] sm:$0xff] }
 0x53a   : > { %v2222_v0 = vmul.f32 0.01, %v5326_v48  ;;  %vm2214_vm5 = vcmp.ge.f32.partialorder %v5326_v48, 0.0  ;;  %2752 = vmatprep.mubr.f32.mxu1 %v2568_v44 }
 0x53b   : > { %v2197_v57 = vpop.f32.mrb[10].mxu0  ;;  %v2223_v1 = vmul.f32 0.01, %v5327_v49  ;;  %vm2215_vm11 = vcmp.ge.f32.partialorder %v5327_v49, 0.0 }
 0x53c   : > { %v5328_v58 = vadd.f32 %v2197_v57, %v2012_v54  ;;  %v2199_v60 = vpop.f32.mrb[11].mxu0  ;;  %v7622_v20 = vsel %vm2214_vm5, %v5326_v48, %v2222_v0  ;;  %v4344_v48 = vld [vmem:[%s8542_s2 + $0x68] sm:$0xff] }
 0x53d   : > { %v5329_v61 = vadd.f32 %v2199_v60, %v2012_v54  ;;  %v7624_v53 = vsel %vm2215_vm11, %v5327_v49, %v2223_v1  ;;  %v4346_v49 = vld [vmem:[%s8542_s2 + $0x78] sm:$0xff] }
 0x53e   : > { %vm2216_vm8 = vcmp.ge.f32.partialorder %v5328_v58, 0.0  ;;  %v2224_v62 = vmul.f32 0.01, %v5328_v58 }
 0x53f   : > { %vm2217_vm13 = vcmp.ge.f32.partialorder %v5329_v61, 0.0  ;;  %v2225_v31 = vmul.f32 0.01, %v5329_v61  ;;  %v2203_v10 = vpop.f32.mrb[12].mxu0 }
 0x540   : > { %v7626_v56 = vsel %vm2216_vm8, %v5328_v58, %v2224_v62  ;;  %v5330_v13 = vadd.f32 %v2203_v10, %v2017_v3  ;;  %v2205_v30 = vpop.f32.mrb[13].mxu0 }
 0x541   : > { %v7628_v15 = vsel %vm2217_vm13, %v5329_v61, %v2225_v31  ;;  %v5331_v16 = vadd.f32 %v2205_v30, %v2017_v3  ;;  %v5951_v25 = vpack.i.bf16 %v7626_v56, %v7622_v20  ;;  %v5058_v9 = vpack.c.bf16 %v7626_v56, %v7622_v20 }
 0x542   : > { %vm2218_vm10 = vcmp.ge.f32.partialorder %v5330_v13, 0.0  ;;  %v2226_v51 = vmul.f32 0.01, %v5330_v13  ;;  %v5956_v6 = vpack.i.bf16 %v7628_v15, %v7624_v53  ;;  %v5056_v37 = vpack.c.bf16 %v7628_v15, %v7624_v53 }
 0x543   : > { %vm2219_vm5 = vcmp.ge.f32.partialorder %v5331_v16, 0.0  ;;  %v2227_v17 = vmul.f32 0.01, %v5331_v16  ;;  %v2209_v26 = vpop.f32.mrb[14].mxu0  ;;  %5952 = vrot.lane.b32.xlu1 %v5951_v25, %s6546_s24  ;;  %vm8703_vm13 = vcmp.lt.s32.totalorder %v6744_v19, 16 }
 0x544   : > { %v7635_v28 = vsel %vm2218_vm10, %v5330_v13, %v2226_v51  ;;  %v5332_v34 = vadd.f32 %v2209_v26, %v2022_v7  ;;  %v2211_v12 = vpop.f32.mrb[15].mxu0  ;;  %5957 = vrot.lane.b32.xlu0 %v5956_v6, %s6546_s24  ;;  %vm8704_vm10 = vmmov %vm8703_vm13 }
 0x545   : > { %v7638_v22 = vsel %vm2219_vm5, %v5331_v16, %v2227_v17  ;;  %v5333_v24 = vadd.f32 %v2211_v12, %v2022_v7  ;;  %vm8705_vm5 = vmmov %vm8704_vm10 }
 0x546   : > { %vm2220_vm11 = vcmp.ge.f32.partialorder %v5332_v34, 0.0  ;;  %v2228_v35 = vmul.f32 0.01, %v5332_v34 }
 0x547   : > { %vm2221_vm8 = vcmp.ge.f32.partialorder %v5333_v24, 0.0  ;;  %v2229_v36 = vmul.f32 0.01, %v5333_v24 }
 0x548   : > { %v7640_v21 = vsel %vm2220_vm11, %v5332_v34, %v2228_v35  ;;  %vm8706_vm11 = vmmov %vm8705_vm5 }
 0x549   : > { %v7644_v38 = vsel %vm2221_vm8, %v5333_v24, %v2229_v36  ;;  %v5961_v39 = vpack.i.bf16 %v7640_v21, %v7635_v28  ;;  %v5062_v43 = vpack.c.bf16 %v7640_v21, %v7635_v28  ;;  %vm8707_vm8 = vmmov %vm8705_vm5 }
 0x54a   : > { %v5971_v8 = vpack.i.bf16 %v7644_v38, %v7638_v22  ;;  %v5060_v40 = vpack.c.bf16 %v7644_v38, %v7638_v22 }
 0x54b   : > { %5962 = vrot.lane.b32.xlu1 %v5961_v39, %s6546_s24 }
 0x54c   : > { %5972 = vrot.lane.b32.xlu0 %v5971_v8, %s6546_s24 }
 0x54f   : > { %5967 = vrot.lane.b32.xlu1 %v5951_v25, %s6547_s26 }
 0x550   : > { %5977 = vrot.lane.b32.xlu0 %v5956_v6, %s6547_s26 }
 0x553   : > { %5982 = vrot.lane.b32.xlu1 %v5961_v39, %s6547_s26 }
 0x554   : > { %5992 = vrot.lane.b32.xlu0 %v5971_v8, %s6547_s26 }
 0x557   : > { %5987 = vrot.lane.b32.xlu1 %v5951_v25, %s6548_s29 }
 0x558   : > { %5997 = vrot.lane.b32.xlu0 %v5956_v6, %s6548_s29 }
 0x55b   : > { %6002 = vrot.lane.b32.xlu1 %v5961_v39, %s6548_s29 }
 0x55c   : > { %6012 = vrot.lane.b32.xlu0 %v5971_v8, %s6548_s29 }
 0x55f   : > { %6007 = vrot.lane.b32.xlu1 %v5951_v25, %s6549_s30 }
 0x560   : > { %6017 = vrot.lane.b32.xlu0 %v5956_v6, %s6549_s30 }
 0x563   : > { %6022 = vrot.lane.b32.xlu1 %v5961_v39, %s6549_s30 }
 0x564   : > { %6027 = vrot.lane.b32.xlu0 %v5971_v8, %s6549_s30 }
 0x567   : > { %6032 = vrot.lane.b32.xlu1 %v5951_v25, %s6550_s4 }
 0x568   : > { %6037 = vrot.lane.b32.xlu0 %v5956_v6, %s6550_s4 }
 0x56b   : > { %6042 = vrot.lane.b32.xlu1 %v5961_v39, %s6550_s4 }
 0x56c   : > { %6052 = vrot.lane.b32.xlu0 %v5971_v8, %s6550_s4 }
 0x56f   : > { %6047 = vrot.lane.b32.xlu1 %v5951_v25, %s6551_s5 }
 0x570   : > { %6057 = vrot.lane.b32.xlu0 %v5956_v6, %s6551_s5 }
 0x573   : > { %6062 = vrot.lane.b32.xlu1 %v5961_v39, %s6551_s5 }
 0x574   : > { %6072 = vrot.lane.b32.xlu0 %v5971_v8, %s6551_s5 }
 0x577   : > { %6067 = vrot.lane.b32.xlu1 %v5951_v25, %s6552_s6 }
 0x578   : > { %6077 = vrot.lane.b32.xlu0 %v5956_v6, %s6552_s6 }
 0x57b   : > { %6082 = vrot.lane.b32.xlu1 %v5961_v39, %s6552_s6 }
 0x57c   : > { %6087 = vrot.lane.b32.xlu0 %v5971_v8, %s6552_s6 }
 0x57f   : > { %6092 = vrot.lane.b32.xlu1 %v5951_v25, %s6553_s7 }
 0x580   : > { %6097 = vrot.lane.b32.xlu0 %v5956_v6, %s6553_s7 }
 0x583   : > { %6102 = vrot.lane.b32.xlu1 %v5961_v39, %s6553_s7 }
 0x584   : > { %6107 = vrot.lane.b32.xlu0 %v5971_v8, %s6553_s7 }
 0x587   : > { %2658 = vperm.xlu1 %5630, %v4343_v45  }
 0x588   : > { %2663 = vperm.xlu0 %5629, %v4344_v48  }
 0x58b   : > { %2668 = vperm.xlu1 %5630, %v4345_v4  }
 0x58c   : > { %2673 = vperm.xlu0 %5629, %v4346_v49  }
 0x5b5   : > { %v5953_v54 = vpop.permute.xlu1 %5952 }
 0x5b6   : > { %v5955_v57 = vunpack.i.h.bf16 %v5953_v54  ;;  %v5954_v0 = vunpack.i.l.bf16 %v5953_v54  ;;  %v5958_v1 = vpop.permute.xlu0 %5957 }
 0x5b7   : > { %v5960_v58 = vunpack.i.h.bf16 %v5958_v1  ;;  %v5959_v60 = vunpack.i.l.bf16 %v5958_v1 }
 0x5b9   : > { %v2254_v61 = vsel %vm251_vm2, %v5954_v0, %v5959_v60  ;;  %v2255_v62 = vsel %vm251_vm2, %v5955_v57, %v5960_v58  ;;  %v2258_v3 = vsel %vm251_vm2, %v5959_v60, %v5954_v0  ;;  %v2259_v31 = vsel %vm251_vm2, %v5960_v58, %v5955_v57 }
 0x5ba   : > { %v5013_v10 = vpack.c.bf16 %v2259_v31, %v2258_v3  ;;  %v5010_v13 = vpack.c.bf16 %v2255_v62, %v2254_v61 }
 0x5bc   : > { %5012 = vmatprep.subr.msk.bf16.mxu1 %vm6781_vm6, %v5010_v13 }
 0x5bd   : > { %v5963_v30 = vpop.permute.xlu1 %5962  ;;  %5015 = vmatpush1.bf16.msk.msra.mxu1 %vm6789_vm7, %v5013_v10 }
 0x5be   : > { %v5965_v16 = vunpack.i.h.bf16 %v5963_v30  ;;  %v5964_v25 = vunpack.i.l.bf16 %v5963_v30  ;;  %v5973_v51 = vpop.permute.xlu0 %5972 }
 0x5bf   : > { %v5975_v6 = vunpack.i.h.bf16 %v5973_v51  ;;  %v5974_v7 = vunpack.i.l.bf16 %v5973_v51 }
 0x5c1   : > { %v2256_v17 = vsel %vm251_vm2, %v5964_v25, %v5974_v7  ;;  %v2257_v26 = vsel %vm251_vm2, %v5965_v16, %v5975_v6  ;;  %v2260_v34 = vsel %vm251_vm2, %v5974_v7, %v5964_v25  ;;  %v2261_v12 = vsel %vm251_vm2, %v5975_v6, %v5965_v16  ;;  %v5968_v24 = vpop.permute.xlu1 %5967 }
 0x5c2   : > { %v5019_v35 = vpack.c.bf16 %v2261_v12, %v2260_v34  ;;  %v5970_v36 = vunpack.i.h.bf16 %v5968_v24  ;;  %v5969_v39 = vunpack.i.l.bf16 %v5968_v24  ;;  %v5978_v8 = vpop.permute.xlu0 %5977  ;;  %v5016_v44 = vpack.c.bf16 %v2257_v26, %v2256_v17 }
 0x5c3   : > { %v5980_v45 = vunpack.i.h.bf16 %v5978_v8  ;;  %v5979_v48 = vunpack.i.l.bf16 %v5978_v8 }
 0x5c4   : > { %5018 = vmatprep.subr.msk.bf16.mxu1 %vm6781_vm6, %v5016_v44 }
 0x5c5   : > { %v2298_v4 = vsel %vm8703_vm13, %v5979_v48, %v5969_v39  ;;  %v2299_v49 = vsel %vm8704_vm10, %v5980_v45, %v5970_v36  ;;  %v5983_v54 = vpop.permute.xlu1 %5982  ;;  %5021 = vmatpush1.bf16.msk.msra.mxu1 %vm6789_vm7, %v5019_v35  ;;  %v2294_v57 = vsel %vm8705_vm5, %v5969_v39, %v5979_v48  ;;  %v2295_v0 = vsel %vm8706_vm11, %v5970_v36, %v5980_v45  ;;  %vm8708_vm13 = vmmov %vm8705_vm5 }
 0x5c6   : > { %v5024_v1 = vpack.c.bf16 %v2299_v49, %v2298_v4  ;;  %v5985_v58 = vunpack.i.h.bf16 %v5983_v54  ;;  %v5984_v60 = vunpack.i.l.bf16 %v5983_v54  ;;  %v5993_v61 = vpop.permute.xlu0 %5992  ;;  %v5022_v62 = vpack.c.bf16 %v2295_v0, %v2294_v57  ;;  %vm8709_vm10 = vmmov %vm8705_vm5 }
 0x5c7   : > { %v5995_v3 = vunpack.i.h.bf16 %v5993_v61  ;;  %v5994_v31 = vunpack.i.l.bf16 %v5993_v61  ;;  %vm8710_vm11 = vcmp.lt.s32.totalorder %v6744_v19, 15 }
 0x5c8   : > { %5023 = vmatprep.subr.bf16.mxu1 %v5022_v62 }
 0x5c9   : > { %v2300_v10 = vsel %vm8707_vm8, %v5994_v31, %v5984_v60  ;;  %v2301_v13 = vsel %vm8708_vm13, %v5995_v3, %v5985_v58  ;;  %v5988_v30 = vpop.permute.xlu1 %5987  ;;  %5026 = vmatpush1.bf16.msk.msra.mxu1 %vm6825_vm9, %v5024_v1  ;;  %v2296_v16 = vsel %vm8709_vm10, %v5984_v60, %v5994_v31  ;;  %v2297_v25 = vsel %vm8705_vm5, %v5985_v58, %v5995_v3  ;;  %vm8711_vm8 = vmmov %vm8710_vm11 }
 0x5ca   : > { %v5029_v51 = vpack.c.bf16 %v2301_v13, %v2300_v10  ;;  %v5990_v6 = vunpack.i.h.bf16 %v5988_v30  ;;  %v5989_v7 = vunpack.i.l.bf16 %v5988_v30  ;;  %v5998_v17 = vpop.permute.xlu0 %5997  ;;  %v5027_v26 = vpack.c.bf16 %v2297_v25, %v2296_v16  ;;  %vm8712_vm13 = vmmov %vm8711_vm8 }
 0x5cb   : > { %v6000_v34 = vunpack.i.h.bf16 %v5998_v17  ;;  %v5999_v12 = vunpack.i.l.bf16 %v5998_v17  ;;  %vm8713_vm10 = vmmov %vm8711_vm8 }
 0x5cc   : > { %5028 = vmatprep.subr.bf16.mxu1 %v5027_v26  ;;  %vm8714_vm5 = vmmov %vm8711_vm8 }
 0x5cd   : > { %v2334_v24 = vsel %vm8710_vm11, %v5989_v7, %v5999_v12  ;;  %v2335_v35 = vsel %vm8711_vm8, %v5990_v6, %v6000_v34  ;;  %v2338_v36 = vsel %vm8712_vm13, %v5999_v12, %v5989_v7  ;;  %v2339_v39 = vsel %vm8713_vm10, %v6000_v34, %v5990_v6  ;;  %v6003_v8 = vpop.permute.xlu1 %6002  ;;  %5031 = vmatpush1.bf16.msk.msra.mxu1 %vm6825_vm9, %v5029_v51  ;;  %vm8715_vm11 = vmmov %vm8714_vm5 }
 0x5ce   : > { %v5035_v44 = vpack.c.bf16 %v2339_v39, %v2338_v36  ;;  %v6005_v45 = vunpack.i.h.bf16 %v6003_v8  ;;  %v6004_v48 = vunpack.i.l.bf16 %v6003_v8  ;;  %v6013_v4 = vpop.permute.xlu0 %6012  ;;  %v5032_v49 = vpack.c.bf16 %v2335_v35, %v2334_v24  ;;  %vm8716_vm8 = vmmov %vm8714_vm5 }
 0x5cf   : > { %v6015_v54 = vunpack.i.h.bf16 %v6013_v4  ;;  %v6014_v57 = vunpack.i.l.bf16 %v6013_v4  ;;  %vm8717_vm13 = vmmov %vm8714_vm5  ;;  %vm8718_vm10 = vcmp.lt.s32.totalorder %v6744_v19, 1 }
 0x5d0   : > { %5034 = vmatprep.subr.msk.bf16.mxu1 %vm6854_vm12, %v5032_v49 }
 0x5d1   : > { %v2336_v0 = vsel %vm8714_vm5, %v6004_v48, %v6014_v57  ;;  %v2337_v1 = vsel %vm8715_vm11, %v6005_v45, %v6015_v54  ;;  %v2340_v58 = vsel %vm8716_vm8, %v6014_v57, %v6004_v48  ;;  %v2341_v60 = vsel %vm8717_vm13, %v6015_v54, %v6005_v45  ;;  %v6008_v61 = vpop.permute.xlu1 %6007  ;;  %5037 = vmatpush1.bf16.msk.msra.mxu1 %vm6875_vm15, %v5035_v44  ;;  %vm8719_vm5 = vmmov %vm8718_vm10 }
 0x5d2   : > { %v5038_v62 = vpack.c.bf16 %v2337_v1, %v2336_v0  ;;  %v5041_v3 = vpack.c.bf16 %v2341_v60, %v2340_v58  ;;  %v6010_v31 = vunpack.i.h.bf16 %v6008_v61  ;;  %v6009_v10 = vunpack.i.l.bf16 %v6008_v61  ;;  %v6018_v13 = vpop.permute.xlu0 %6017  ;;  %vm8720_vm11 = vmmov %vm8719_vm5 }
 0x5d3   : > { %v6020_v30 = vunpack.i.h.bf16 %v6018_v13  ;;  %v6019_v16 = vunpack.i.l.bf16 %v6018_v13  ;;  %vm8721_vm8 = vmmov %vm8719_vm5 }
 0x5d4   : > { %5040 = vmatprep.subr.msk.bf16.mxu1 %vm6854_vm12, %v5038_v62  ;;  %vm8722_vm13 = vmmov %vm8719_vm5 }
 0x5d5   : > { %v2374_v25 = vsel %vm8718_vm10, %v6009_v10, %v6019_v16  ;;  %v2375_v51 = vsel %vm8719_vm5, %v6010_v31, %v6020_v30  ;;  %v2378_v6 = vsel %vm8720_vm11, %v6019_v16, %v6009_v10  ;;  %v2379_v7 = vsel %vm8721_vm8, %v6020_v30, %v6010_v31  ;;  %v6023_v17 = vpop.permute.xlu1 %6022  ;;  %5043 = vmatpush1.bf16.msk.msra.mxu1 %vm6875_vm15, %v5041_v3  ;;  %vm8723_vm10 = vmmov %vm8719_vm5 }
 0x5d6   : > { %v5044_v26 = vpack.c.bf16 %v2375_v51, %v2374_v25  ;;  %v5047_v34 = vpack.c.bf16 %v2379_v7, %v2378_v6  ;;  %v6025_v12 = vunpack.i.h.bf16 %v6023_v17  ;;  %v6024_v24 = vunpack.i.l.bf16 %v6023_v17  ;;  %v6028_v35 = vpop.permute.xlu0 %6027  ;;  %vm8724_vm11 = vmmov %vm8719_vm5 }
 0x5d7   : > { %v6030_v36 = vunpack.i.h.bf16 %v6028_v35  ;;  %v6029_v39 = vunpack.i.l.bf16 %v6028_v35  ;;  %vm8725_vm8 = vcmp.lt.s32.totalorder %v6744_v19, 127 }
 0x5d8   : > { %5046 = vmatprep.subr.msk.bf16.mxu1 %vm6781_vm6, %v5044_v26 }
 0x5d9   : > { %v2376_v8 = vsel %vm8722_vm13, %v6024_v24, %v6029_v39  ;;  %v2377_v44 = vsel %vm8723_vm10, %v6025_v12, %v6030_v36  ;;  %v2380_v45 = vsel %vm8719_vm5, %v6029_v39, %v6024_v24  ;;  %v2381_v48 = vsel %vm8724_vm11, %v6030_v36, %v6025_v12  ;;  %v6033_v4 = vpop.permute.xlu1 %6032  ;;  %5049 = vmatpush1.bf16.msk.msra.mxu1 %vm6900_vm0, %v5047_v34  ;;  %vm8726_vm13 = vmmov %vm8725_vm8 }
 0x5da   : > { %v5050_v49 = vpack.c.bf16 %v2377_v44, %v2376_v8  ;;  %v5053_v54 = vpack.c.bf16 %v2381_v48, %v2380_v45  ;;  %v6038_v57 = vpop.permute.xlu0 %6037  ;;  %v6035_v0 = vunpack.i.h.bf16 %v6033_v4  ;;  %v6034_v1 = vunpack.i.l.bf16 %v6033_v4  ;;  %vm8727_vm10 = vmmov %vm8725_vm8 }
 0x5db   : > { %v6040_v58 = vunpack.i.h.bf16 %v6038_v57  ;;  %v6039_v60 = vunpack.i.l.bf16 %v6038_v57  ;;  %vm8728_vm5 = vmmov %vm8725_vm8 }
 0x5dc   : > { %5052 = vmatprep.subr.msk.bf16.mxu1 %vm6781_vm6, %v5050_v49  ;;  %vm8729_vm11 = vmmov %vm8728_vm5 }
 0x5dd   : > { %v6043_v61 = vpop.permute.xlu1 %6042  ;;  %5055 = vmatpush1.bf16.msk.msra.mxu1 %vm6900_vm0, %v5053_v54  ;;  %v2426_v3 = vsel %vm8725_vm8, %v6039_v60, %v6034_v1  ;;  %v2427_v31 = vsel %vm8726_vm13, %v6040_v58, %v6035_v0  ;;  %v2422_v53 = vsel %vm8727_vm10, %v6034_v1, %v6039_v60  ;;  %v2423_v15 = vsel %vm8728_vm5, %v6035_v0, %v6040_v58  ;;  %vm8730_vm8 = vmmov %vm8728_vm5 }
 0x5de   : > { %v6053_v62 = vpop.permute.xlu0 %6052  ;;  %5057 = vmatprep.subr.bf16.mxu1 %v5056_v37  ;;  %v6045_v10 = vunpack.i.h.bf16 %v6043_v61  ;;  %v6044_v13 = vunpack.i.l.bf16 %v6043_v61  ;;  %v5064_v37 = vpack.c.bf16 %v2427_v31, %v2426_v3  ;;  %v5067_v38 = vpack.c.bf16 %v2423_v15, %v2422_v53  ;;  %vm8731_vm13 = vmmov %vm8728_vm5 }
 0x5df   : > { %v6055_v30 = vunpack.i.h.bf16 %v6053_v62  ;;  %v6054_v16 = vunpack.i.l.bf16 %v6053_v62  ;;  %vm8732_vm10 = vmmov %vm8728_vm5  ;;  %vm8733_vm5 = vcmp.lt.s32.totalorder %v6744_v19, 113 }
 0x5e1   : > { %v6048_v25 = vpop.permute.xlu1 %6047  ;;  %5059 = vmatpush1.bf16.msra.mxu1 %v5058_v9  ;;  %v2428_v20 = vsel %vm8729_vm11, %v6054_v16, %v6044_v13  ;;  %v2429_v56 = vsel %vm8730_vm8, %v6055_v30, %v6045_v10  ;;  %v2425_v34 = vsel %vm8732_vm10, %v6045_v10, %v6055_v30  ;;  %vm8734_vm11 = vmmov %vm8733_vm5 }
 0x5e2   : > { %v6058_v51 = vpop.permute.xlu0 %6057  ;;  %5061 = vmatprep.subr.bf16.mxu1 %v5060_v40  ;;  %v6050_v6 = vunpack.i.h.bf16 %v6048_v25  ;;  %v6049_v7 = vunpack.i.l.bf16 %v6048_v25  ;;  %v2424_v40 = vsel %vm8731_vm13, %v6044_v13, %v6054_v16  ;;  %v5070_v12 = vpack.c.bf16 %v2429_v56, %v2428_v20  ;;  %vm8735_vm8 = vmmov %vm8733_vm5 }
 0x5e3   : > { %v6060_v17 = vunpack.i.h.bf16 %v6058_v51  ;;  %v6059_v26 = vunpack.i.l.bf16 %v6058_v51  ;;  %v5073_v44 = vpack.c.bf16 %v2425_v34, %v2424_v40  ;;  %vm8736_vm13 = vmmov %vm8733_vm5 }
 0x5e4   : > { %vm8737_vm10 = vmmov %vm8733_vm5 }
 0x5e5   : > { %v6063_v9 = vpop.permute.xlu1 %6062  ;;  %5063 = vmatpush1.bf16.msra.mxu1 %v5062_v43  ;;  %v2466_v24 = vsel %vm8733_vm5, %v6059_v26, %v6049_v7  ;;  %v2467_v35 = vsel %vm8734_vm11, %v6060_v17, %v6050_v6  ;;  %v2462_v45 = vsel %vm8735_vm8, %v6049_v7, %v6059_v26  ;;  %v2463_v48 = vsel %vm8736_vm13, %v6050_v6, %v6060_v17  ;;  %vm8738_vm11 = vmmov %vm8733_vm5 }
 0x5e6   : > { %v6073_v22 = vpop.permute.xlu0 %6072  ;;  %5066 = vmatprep.subr.msk.bf16.mxu1 %vm6854_vm12, %v5064_v37  ;;  %v6065_v28 = vunpack.i.h.bf16 %v6063_v9  ;;  %v6064_v21 = vunpack.i.l.bf16 %v6063_v9  ;;  %v5076_v4 = vpack.c.bf16 %v2467_v35, %v2466_v24  ;;  %v5079_v62 = vpack.c.bf16 %v2463_v48, %v2462_v45  ;;  %vm8739_vm8 = vmmov %vm8733_vm5 }
 0x5e7   : > { %v6075_v43 = vunpack.i.h.bf16 %v6073_v22  ;;  %v6074_v36 = vunpack.i.l.bf16 %v6073_v22  ;;  %vm8740_vm13 = vcmp.lt.s32.totalorder %v6744_v19, 112 }
 0x5e9   : > { %v6068_v39 = vpop.permute.xlu1 %6067  ;;  %5069 = vmatpush1.bf16.msk.msra.mxu1 %vm6944_vm14, %v5067_v38  ;;  %v2468_v1 = vsel %vm8737_vm10, %v6074_v36, %v6064_v21  ;;  %v2469_v58 = vsel %vm8733_vm5, %v6075_v43, %v6065_v28  ;;  %v2464_v3 = vsel %vm8738_vm11, %v6064_v21, %v6074_v36  ;;  %v2465_v31 = vsel %vm8739_vm8, %v6065_v28, %v6075_v43  ;;  %vm8741_vm10 = vmmov %vm8740_vm13 }
 0x5ea   : > { %v6078_v8 = vpop.permute.xlu0 %6077  ;;  %5072 = vmatprep.subr.msk.bf16.mxu1 %vm6854_vm12, %v5070_v12  ;;  %v6070_v49 = vunpack.i.h.bf16 %v6068_v39  ;;  %v6069_v54 = vunpack.i.l.bf16 %v6068_v39  ;;  %v5082_v10 = vpack.c.bf16 %v2469_v58, %v2468_v1  ;;  %v5085_v6 = vpack.c.bf16 %v2465_v31, %v2464_v3  ;;  %vm8742_vm5 = vmmov %vm8741_vm10  ;;  %v2567_v1 = vld [vmem:[#allocation3 + $0x120] sm:$0xff]  ;;  %v2570_v31 = vld [vmem:[#allocation3 + $0x138] sm:$0xff] }
 0x5eb   : > { %v6080_v57 = vunpack.i.h.bf16 %v6078_v8  ;;  %v6079_v0 = vunpack.i.l.bf16 %v6078_v8  ;;  %vm8743_vm11 = vmmov %vm8742_vm5  ;;  %v2571_v58 = vld [vmem:[#allocation3 + $0x140] sm:$0xff] }
 0x5ec   : > { %vm8744_vm8 = vmmov %vm8742_vm5 }
 0x5ed   : > { %v6083_v60 = vpop.permute.xlu1 %6082  ;;  %5075 = vmatpush1.bf16.msk.msra.mxu1 %vm6944_vm14, %v5073_v44  ;;  %v2506_v13 = vsel %vm8740_vm13, %v6079_v0, %v6069_v54  ;;  %v2507_v30 = vsel %vm8741_vm10, %v6080_v57, %v6070_v49  ;;  %v2502_v7 = vsel %vm8742_vm5, %v6069_v54, %v6079_v0  ;;  %v2503_v17 = vsel %vm8743_vm11, %v6070_v49, %v6080_v57  ;;  %vm8745_vm13 = vmmov %vm8742_vm5 }
 0x5ee   : > { %v6088_v61 = vpop.permute.xlu0 %6087  ;;  %5078 = vmatprep.subr.msk.bf16.mxu1 %vm6980_vm1, %v5076_v4  ;;  %v6085_v16 = vunpack.i.h.bf16 %v6083_v60  ;;  %v6084_v25 = vunpack.i.l.bf16 %v6083_v60  ;;  %v5088_v26 = vpack.c.bf16 %v2507_v30, %v2506_v13  ;;  %v5091_v24 = vpack.c.bf16 %v2503_v17, %v2502_v7  ;;  %vm8746_vm10 = vmmov %vm8742_vm5  ;;  %v2573_v30 = vld [vmem:[#allocation3 + $0x150] sm:$0xff] }
 0x5ef   : > { %v6090_v51 = vunpack.i.h.bf16 %v6088_v61  ;;  %v6089_v53 = vunpack.i.l.bf16 %v6088_v61  ;;  %vm8747_vm11 = vcmp.lt.s32.totalorder %v6744_v19, 111 }
 0x5f1   : > { %v6093_v15 = vpop.permute.xlu1 %6092  ;;  %5081 = vmatpush1.bf16.msk.msra.mxu1 %vm6900_vm0, %v5079_v62  ;;  %v2508_v38 = vsel %vm8744_vm8, %v6089_v53, %v6084_v25  ;;  %v2509_v40 = vsel %vm8745_vm13, %v6090_v51, %v6085_v16  ;;  %v2504_v35 = vsel %vm8746_vm10, %v6084_v25, %v6089_v53  ;;  %v2505_v28 = vsel %vm8742_vm5, %v6085_v16, %v6090_v51  ;;  %vm8748_vm8 = vmmov %vm8747_vm11  ;;  %v2577_v16 = vld [vmem:[#allocation3 + $0x170] sm:$0xff]  ;;  %v2576_v25 = vld [vmem:[#allocation3 + $0x168] sm:$0xff] }
 0x5f2   : > { %v6098_v37 = vpop.permute.xlu0 %6097  ;;  %5084 = vmatprep.subr.msk.bf16.mxu1 %vm6980_vm1, %v5082_v10  ;;  %v6095_v20 = vunpack.i.h.bf16 %v6093_v15  ;;  %v6094_v56 = vunpack.i.l.bf16 %v6093_v15  ;;  %v5093_v21 = vpack.c.bf16 %v2509_v40, %v2508_v38  ;;  %v5096_v48 = vpack.c.bf16 %v2505_v28, %v2504_v35  ;;  %vm8749_vm13 = vmmov %vm8748_vm8  ;;  %v2574_v10 = vld [vmem:[#allocation3 + $0x158] sm:$0xff]  ;;  %v2569_v51 = vld [vmem:[#allocation3 + $0x130] sm:$0xff] }
 0x5f3   : > { %v6100_v9 = vunpack.i.h.bf16 %v6098_v37  ;;  %v6099_v22 = vunpack.i.l.bf16 %v6098_v37  ;;  %vm8750_vm10 = vmmov %vm8748_vm8  ;;  %v2572_v53 = vld [vmem:[#allocation3 + $0x148] sm:$0xff]  ;;  %v2575_v15 = vld [vmem:[#allocation3 + $0x160] sm:$0xff] }
 0x5f4   : > { %vm8751_vm5 = vmmov %vm8748_vm8  ;;  %v2578_v37 = vld [vmem:[#allocation3 + $0x178] sm:$0xff] }
 0x5f5   : > { %5087 = vmatpush1.bf16.msk.msra.mxu1 %vm6900_vm0, %v5085_v6  ;;  %v6103_v34 = vpop.permute.xlu1 %6102  ;;  %v2546_v43 = vsel %vm8747_vm11, %v6099_v22, %v6094_v56  ;;  %v2547_v36 = vsel %vm8748_vm8, %v6100_v9, %v6095_v20  ;;  %v2542_v4 = vsel %vm8749_vm13, %v6094_v56, %v6099_v22  ;;  %v2543_v49 = vsel %vm8750_vm10, %v6095_v20, %v6100_v9  ;;  %vm8752_vm11 = vmmov %vm8751_vm5 }
 0x5f6   : > { %v6108_v12 = vpop.permute.xlu0 %6107  ;;  %5090 = vmatprep.subr.msk.bf16.mxu1 %vm7012_vm4, %v5088_v26  ;;  %v6105_v39 = vunpack.i.h.bf16 %v6103_v34  ;;  %v6104_v8 = vunpack.i.l.bf16 %v6103_v34  ;;  %v5098_v54 = vpack.c.bf16 %v2547_v36, %v2546_v43  ;;  %v5101_v60 = vpack.c.bf16 %v2543_v49, %v2542_v4  ;;  %vm8753_vm8 = vmmov %vm8751_vm5 }
 0x5f7   : > { %v6110_v44 = vunpack.i.h.bf16 %v6108_v12  ;;  %v6109_v45 = vunpack.i.l.bf16 %v6108_v12  ;;  %vm8754_vm13 = vmmov %vm8751_vm5  ;;  %vm8755_vm10 = vcmask 261120  }
 0x5f9   : > { %5092 = vmatpush1.bf16.msra.mxu1 %v5091_v24  ;;  %v2548_v57 = vsel %vm8751_vm5, %v6109_v45, %v6104_v8  ;;  %v2549_v0 = vsel %vm8752_vm11, %v6110_v44, %v6105_v39  ;;  %v2544_v61 = vsel %vm8753_vm8, %v6104_v8, %v6109_v45  ;;  %v2545_v62 = vsel %vm8754_vm13, %v6105_v39, %v6110_v44  ;;  %vm8756_vm5 = vmmov %vm8755_vm10 }
 0x5fa   : > { %5095 = vmatprep.subr.msk.bf16.mxu1 %vm7012_vm4, %v5093_v21  ;;  %v5104_v3 = vpack.c.bf16 %v2549_v0, %v2548_v57  ;;  %v5107_v13 = vpack.c.bf16 %v2545_v62, %v2544_v61  ;;  %vm8757_vm11 = vmmov %vm8756_vm5 }
 0x5fb   : > { %vm8758_vm8 = vmmov %vm8756_vm5 }
 0x5fd   : > { %5097 = vmatpush1.bf16.msra.mxu1 %v5096_v48 }
 0x5fe   : > { %5100 = vmatprep.subr.msk.bf16.mxu1 %vm7038_vm3, %v5098_v54 }
 0x600   : > { %2753 = vmatmul.mubr.f32.vlgmr.msra.gmra.mrb[8].mxu1 %v2567_v1 }
 0x601   : > { %5103 = vmatpush1.bf16.msk.msra.mxu1 %vm6944_vm14, %v5101_v60  ;;  %2758 = vmatprep.mubr.f32.mxu1 %v2571_v58 }
 0x602   : > { %5106 = vmatprep.subr.msk.bf16.mxu1 %vm7038_vm3, %v5104_v3 }
 0x604   : > { %2759 = vmatmul.mubr.f32.gmra.mrb[10].mxu1 %v2570_v31 }
 0x605   : > { %5109 = vmatpush1.bf16.msk.msra.mxu1 %vm6944_vm14, %v5107_v13  ;;  %2764 = vmatprep.mubr.f32.mxu1 %v2574_v10 }
 0x606   : > { %v2659_v6 = vpop.permute.xlu1 %2658 }
 0x607   : > { %v2664_v9 = vpop.permute.xlu0 %2663 }
 0x608   : > { %2765 = vmatmul.mubr.f32.gmra.mrb[12].mxu1 %v2573_v30 }
 0x609   : > { %2770 = vmatprep.mubr.f32.mxu1 %v2577_v16 }
 0x60a   : > { %v2669_v28 = vpop.permute.xlu1 %2668 }
 0x60b   : > { %v2674_v1 = vpop.permute.xlu0 %2673 }
 0x60c   : > { %2771 = vmatmul.mubr.f32.gmra.mrb[14].mxu1 %v2576_v25 }
 0x60d   : > { %2841 = vmatprep.mubr.f32.mxu1 %v6555_v27 }
 0x610   : > { %4347 = vmatmul.mubr.msk.f32.vlgmr.msra.gmra.mrb[8].mxu1 %vm8755_vm10, %v2569_v51 }
 0x611   : > { %2847 = vmatprep.mubr.f32.mxu1 %v6555_v27 }
 0x614   : > { %4348 = vmatmul.mubr.msk.f32.gmra.mrb[10].mxu1 %vm8756_vm5, %v2572_v53 }
 0x615   : > { %2853 = vmatprep.mubr.f32.mxu1 %v6555_v27 }
 0x618   : > { %4349 = vmatmul.mubr.msk.f32.gmra.mrb[12].mxu1 %vm8757_vm11, %v2575_v15 }
 0x619   : > { %2859 = vmatprep.mubr.f32.mxu1 %v6555_v27 }
 0x61c   : > { %4350 = vmatmul.mubr.msk.f32.gmra.mrb[14].mxu1 %vm8758_vm8, %v2578_v37 }
 0x6e3   : > { %v2843_v7 = vpop.f32.mrb[8].mxu1 }
 0x6e4   : > { %v5334_v17 = vadd.f32 %v2843_v7, %v2659_v6  ;;  %v2845_v26 = vpop.f32.mrb[9].mxu1 }
 0x6e5   : > { %v5335_v20 = vadd.f32 %v2845_v26, %v2659_v6  ;;  %v4354_v6 = vld [vmem:[%s8542_s2 + $0x98] sm:$0xff] }
 0x6e6   : > { %v2874_v56 = vmul.f32 0.01, %v5334_v17  ;;  %vm2866_vm13 = vcmp.ge.f32.partialorder %v5334_v17, 0.0 }
 0x6e7   : > { %v2875_v22 = vmul.f32 0.01, %v5335_v20  ;;  %v2849_v38 = vpop.f32.mrb[10].mxu1  ;;  %vm2867_vm10 = vcmp.ge.f32.partialorder %v5335_v20, 0.0 }
 0x6e8   : > { %v5336_v40 = vadd.f32 %v2849_v38, %v2664_v9  ;;  %v2851_v34 = vpop.f32.mrb[11].mxu1  ;;  %v2882_v24 = vsel %vm2866_vm13, %v5334_v17, %v2874_v56 }
 0x6e9   : > { %v5337_v12 = vadd.f32 %v2851_v34, %v2664_v9  ;;  %v2883_v21 = vsel %vm2867_vm10, %v5335_v20, %v2875_v22  ;;  %v7903_v45 = vadd.f32 %v2882_v24, %v7347_v32 }
 0x6ea   : > { %vm2868_vm5 = vcmp.ge.f32.partialorder %v5336_v40, 0.0  ;;  %v2876_v35 = vmul.f32 0.01, %v5336_v40  ;;  %v7909_v54 = vadd.f32 %v2883_v21, %v7353_v29 }
 0x6eb   : > { %vm2869_vm11 = vcmp.ge.f32.partialorder %v5337_v12, 0.0  ;;  %v2877_v43 = vmul.f32 0.01, %v5337_v12  ;;  %v2855_v36 = vpop.f32.mrb[12].mxu1 }
 0x6ec   : > { %v2884_v39 = vsel %vm2868_vm5, %v5336_v40, %v2876_v35  ;;  %v5338_v8 = vadd.f32 %v2855_v36, %v2669_v28  ;;  %v2857_v44 = vpop.f32.mrb[13].mxu1 }
 0x6ed   : > { %v7906_v48 = vadd.f32 %v2884_v39, %v7350_v14  ;;  %v2885_v4 = vsel %vm2869_vm11, %v5337_v12, %v2877_v43  ;;  %v5339_v49 = vadd.f32 %v2857_v44, %v2669_v28  ;;  %vm8759_vm11 = vcmp.lt.s32.totalorder %v6744_v19, 16 }
 0x6ee   : > { %v7912_v57 = vadd.f32 %v2885_v4, %v7356_v63  ;;  %v2878_v0 = vmul.f32 0.01, %v5338_v8  ;;  %vm2870_vm8 = vcmp.ge.f32.partialorder %v5338_v8, 0.0 }
 0x6ef   : > { %v2879_v58 = vmul.f32 0.01, %v5339_v49  ;;  %v2861_v60 = vpop.f32.mrb[14].mxu1  ;;  %v6111_v32 = vpack.i.bf16 %v7906_v48, %v7903_v45  ;;  %vm2871_vm13 = vcmp.ge.f32.partialorder %v5339_v49, 0.0 }
 0x6f0   : > { %v5340_v61 = vadd.f32 %v2861_v60, %v2674_v1  ;;  %v2863_v14 = vpop.f32.mrb[15].mxu1  ;;  %v6116_v62 = vpack.i.bf16 %v7912_v57, %v7909_v54  ;;  %v2886_v29 = vsel %vm2870_vm8, %v5338_v8, %v2878_v0  ;;  %vm8760_vm8 = vmmov %vm8759_vm11 }
 0x6f1   : > { %v5341_v3 = vadd.f32 %v2863_v14, %v2674_v1  ;;  %6112 = vrot.lane.b32.xlu1 %v6111_v32, %s6546_s24  ;;  %v2887_v31 = vsel %vm2871_vm13, %v5339_v49, %v2879_v58  ;;  %v7921_v30 = vadd.f32 %v2886_v29, %v7365_v46  ;;  %v3228_v46 = vld [vmem:[#allocation3 + $0x188] sm:$0xff]  ;;  %vm8761_vm13 = vmmov %vm8760_vm8 }
 0x6f2   : > { %vm2872_vm10 = vcmp.ge.f32.partialorder %v5340_v61, 0.0  ;;  %v2880_v63 = vmul.f32 0.01, %v5340_v61  ;;  %6117 = vrot.lane.b32.xlu0 %v6116_v62, %s6546_s24  ;;  %v7927_v51 = vadd.f32 %v2887_v31, %v7371_v50  ;;  %3412 = vmatprep.mubr.f32.mxu0 %v3228_v46  ;;  %v4352_v50 = vld [vmem:[%s8542_s2 + $0x88] sm:$0xff] }
 0x6f3   : > { %vm2873_vm5 = vcmp.ge.f32.partialorder %v5341_v3, 0.0  ;;  %v2881_v10 = vmul.f32 0.01, %v5341_v3 }
 0x6f4   : > { %v2888_v13 = vsel %vm2872_vm10, %v5340_v61, %v2880_v63  ;;  %vm8762_vm10 = vmmov %vm8760_vm8 }
 0x6f5   : > { %v7924_v16 = vadd.f32 %v2888_v13, %v7368_v2  ;;  %v2889_v25 = vsel %vm2873_vm5, %v5341_v3, %v2881_v10  ;;  %v4351_v2 = vld [vmem:[%s8542_s2 + $0x80] sm:$0xff]  ;;  %vm8763_vm5 = vmmov %vm8760_vm8 }
 0x6f6   : > { %v7930_v53 = vadd.f32 %v2889_v25, %v7374_v55  ;;  %v4353_v55 = vld [vmem:[%s8542_s2 + $0x90] sm:$0xff] }
 0x6f7   : > { %v6121_v15 = vpack.i.bf16 %v7924_v16, %v7921_v30 }
 0x6f8   : > { %v6131_v37 = vpack.i.bf16 %v7930_v53, %v7927_v51 }
 0x6f9   : > { %6122 = vrot.lane.b32.xlu1 %v6121_v15, %s6546_s24 }
 0x6fa   : > { %6132 = vrot.lane.b32.xlu0 %v6131_v37, %s6546_s24 }
 0x6fd   : > { %6127 = vrot.lane.b32.xlu1 %v6111_v32, %s6547_s26 }
 0x6fe   : > { %6137 = vrot.lane.b32.xlu0 %v6116_v62, %s6547_s26 }
 0x701   : > { %6142 = vrot.lane.b32.xlu1 %v6121_v15, %s6547_s26 }
 0x702   : > { %6152 = vrot.lane.b32.xlu0 %v6131_v37, %s6547_s26 }
 0x705   : > { %6147 = vrot.lane.b32.xlu1 %v6111_v32, %s6548_s29 }
 0x706   : > { %6157 = vrot.lane.b32.xlu0 %v6116_v62, %s6548_s29 }
 0x709   : > { %6162 = vrot.lane.b32.xlu1 %v6121_v15, %s6548_s29 }
 0x70a   : > { %6172 = vrot.lane.b32.xlu0 %v6131_v37, %s6548_s29 }
 0x70d   : > { %6167 = vrot.lane.b32.xlu1 %v6111_v32, %s6549_s30 }
 0x70e   : > { %6177 = vrot.lane.b32.xlu0 %v6116_v62, %s6549_s30 }
 0x711   : > { %6182 = vrot.lane.b32.xlu1 %v6121_v15, %s6549_s30 }
 0x712   : > { %6187 = vrot.lane.b32.xlu0 %v6131_v37, %s6549_s30 }
 0x715   : > { %6192 = vrot.lane.b32.xlu1 %v6111_v32, %s6550_s4 }
 0x716   : > { %6197 = vrot.lane.b32.xlu0 %v6116_v62, %s6550_s4 }
 0x719   : > { %6202 = vrot.lane.b32.xlu1 %v6121_v15, %s6550_s4 }
 0x71a   : > { %6212 = vrot.lane.b32.xlu0 %v6131_v37, %s6550_s4 }
 0x71d   : > { %6207 = vrot.lane.b32.xlu1 %v6111_v32, %s6551_s5 }
 0x71e   : > { %6217 = vrot.lane.b32.xlu0 %v6116_v62, %s6551_s5 }
 0x721   : > { %6222 = vrot.lane.b32.xlu1 %v6121_v15, %s6551_s5 }
 0x722   : > { %6232 = vrot.lane.b32.xlu0 %v6131_v37, %s6551_s5 }
 0x725   : > { %6227 = vrot.lane.b32.xlu1 %v6111_v32, %s6552_s6 }
 0x726   : > { %6237 = vrot.lane.b32.xlu0 %v6116_v62, %s6552_s6 }
 0x729   : > { %6242 = vrot.lane.b32.xlu1 %v6121_v15, %s6552_s6 }
 0x72a   : > { %6247 = vrot.lane.b32.xlu0 %v6131_v37, %s6552_s6 }
 0x72d   : > { %6252 = vrot.lane.b32.xlu1 %v6111_v32, %s6553_s7 }
 0x72e   : > { %6257 = vrot.lane.b32.xlu0 %v6116_v62, %s6553_s7 }
 0x731   : > { %6262 = vrot.lane.b32.xlu1 %v6121_v15, %s6553_s7 }
 0x732   : > { %6267 = vrot.lane.b32.xlu0 %v6131_v37, %s6553_s7 }
 0x735   : > { %3318 = vperm.xlu1 %5630, %v4351_v2  }
 0x736   : > { %3323 = vperm.xlu0 %5629, %v4352_v50  }
 0x739   : > { %3328 = vperm.xlu1 %5630, %v4353_v55  }
 0x73a   : > { %3333 = vperm.xlu0 %5629, %v4354_v6  }
 0x763   : > { %v6113_v7 = vpop.permute.xlu1 %6112 }
 0x764   : > { %v6115_v17 = vunpack.i.h.bf16 %v6113_v7  ;;  %v6114_v26 = vunpack.i.l.bf16 %v6113_v7  ;;  %v6118_v20 = vpop.permute.xlu0 %6117 }
 0x765   : > { %v6120_v56 = vunpack.i.h.bf16 %v6118_v20  ;;  %v6119_v9 = vunpack.i.l.bf16 %v6118_v20 }
 0x767   : > { %v2914_v22 = vsel %vm251_vm2, %v6114_v26, %v6119_v9  ;;  %v2915_v38 = vsel %vm251_vm2, %v6115_v17, %v6120_v56  ;;  %v2918_v40 = vsel %vm251_vm2, %v6119_v9, %v6114_v26  ;;  %v2919_v34 = vsel %vm251_vm2, %v6120_v56, %v6115_v17 }
 0x768   : > { %v5110_v12 = vpack.c.bf16 %v2915_v38, %v2914_v22  ;;  %v5113_v24 = vpack.c.bf16 %v2919_v34, %v2918_v40 }
 0x76a   : > { %5112 = vmatprep.subr.msk.bf16.mxu0 %vm6781_vm6, %v5110_v12 }
 0x76b   : > { %v6123_v35 = vpop.permute.xlu1 %6122  ;;  %5115 = vmatpush1.bf16.msk.msra.mxu0 %vm6789_vm7, %v5113_v24 }
 0x76c   : > { %v6125_v28 = vunpack.i.h.bf16 %v6123_v35  ;;  %v6124_v21 = vunpack.i.l.bf16 %v6123_v35  ;;  %v6133_v43 = vpop.permute.xlu0 %6132 }
 0x76d   : > { %v6135_v36 = vunpack.i.h.bf16 %v6133_v43  ;;  %v6134_v39 = vunpack.i.l.bf16 %v6133_v43 }
 0x76f   : > { %v2916_v8 = vsel %vm251_vm2, %v6124_v21, %v6134_v39  ;;  %v2917_v44 = vsel %vm251_vm2, %v6125_v28, %v6135_v36  ;;  %v2920_v4 = vsel %vm251_vm2, %v6134_v39, %v6124_v21  ;;  %v2921_v49 = vsel %vm251_vm2, %v6135_v36, %v6125_v28  ;;  %v6128_v0 = vpop.permute.xlu1 %6127 }
 0x770   : > { %v5116_v1 = vpack.c.bf16 %v2917_v44, %v2916_v8  ;;  %v5119_v58 = vpack.c.bf16 %v2921_v49, %v2920_v4  ;;  %v6130_v60 = vunpack.i.h.bf16 %v6128_v0  ;;  %v6129_v32 = vunpack.i.l.bf16 %v6128_v0  ;;  %v6138_v61 = vpop.permute.xlu0 %6137 }
 0x771   : > { %v6140_v14 = vunpack.i.h.bf16 %v6138_v61  ;;  %v6139_v62 = vunpack.i.l.bf16 %v6138_v61 }
 0x772   : > { %5118 = vmatprep.subr.msk.bf16.mxu0 %vm6781_vm6, %v5116_v1 }
 0x773   : > { %v2958_v3 = vsel %vm8759_vm11, %v6139_v62, %v6129_v32  ;;  %v2959_v29 = vsel %vm8760_vm8, %v6140_v14, %v6130_v60  ;;  %v6143_v63 = vpop.permute.xlu1 %6142  ;;  %5121 = vmatpush1.bf16.msk.msra.mxu0 %vm6789_vm7, %v5119_v58  ;;  %v2954_v31 = vsel %vm8761_vm13, %v6129_v32, %v6139_v62  ;;  %v2955_v10 = vsel %vm8762_vm10, %v6130_v60, %v6140_v14  ;;  %vm8764_vm11 = vmmov %vm8763_vm5 }
 0x774   : > { %v5124_v13 = vpack.c.bf16 %v2959_v29, %v2958_v3  ;;  %v6145_v25 = vunpack.i.h.bf16 %v6143_v63  ;;  %v6144_v15 = vunpack.i.l.bf16 %v6143_v63  ;;  %v6153_v37 = vpop.permute.xlu0 %6152  ;;  %v5122_v46 = vpack.c.bf16 %v2955_v10, %v2954_v31  ;;  %vm8765_vm8 = vmmov %vm8763_vm5 }
 0x775   : > { %v6155_v2 = vunpack.i.h.bf16 %v6153_v37  ;;  %v6154_v50 = vunpack.i.l.bf16 %v6153_v37  ;;  %vm8766_vm13 = vmmov %vm8763_vm5  ;;  %vm8767_vm10 = vcmp.lt.s32.totalorder %v6744_v19, 15 }
 0x776   : > { %5123 = vmatprep.subr.bf16.mxu0 %v5122_v46 }
 0x777   : > { %v2960_v55 = vsel %vm8763_vm5, %v6154_v50, %v6144_v15  ;;  %v2961_v6 = vsel %vm8764_vm11, %v6155_v2, %v6145_v25  ;;  %v6148_v7 = vpop.permute.xlu1 %6147  ;;  %5126 = vmatpush1.bf16.msk.msra.mxu0 %vm6825_vm9, %v5124_v13  ;;  %v2956_v17 = vsel %vm8765_vm8, %v6144_v15, %v6154_v50  ;;  %v2957_v26 = vsel %vm8766_vm13, %v6145_v25, %v6155_v2  ;;  %vm8768_vm5 = vmmov %vm8767_vm10 }
 0x778   : > { %v5129_v20 = vpack.c.bf16 %v2961_v6, %v2960_v55  ;;  %v6150_v56 = vunpack.i.h.bf16 %v6148_v7  ;;  %v6149_v9 = vunpack.i.l.bf16 %v6148_v7  ;;  %v6158_v22 = vpop.permute.xlu0 %6157  ;;  %v5127_v38 = vpack.c.bf16 %v2957_v26, %v2956_v17  ;;  %vm8769_vm11 = vmmov %vm8768_vm5 }
 0x779   : > { %v6160_v40 = vunpack.i.h.bf16 %v6158_v22  ;;  %v6159_v34 = vunpack.i.l.bf16 %v6158_v22  ;;  %vm8770_vm8 = vmmov %vm8768_vm5 }
 0x77a   : > { %5128 = vmatprep.subr.bf16.mxu0 %v5127_v38  ;;  %vm8771_vm13 = vmmov %vm8768_vm5 }
 0x77b   : > { %v2994_v12 = vsel %vm8767_vm10, %v6149_v9, %v6159_v34  ;;  %v2995_v24 = vsel %vm8768_vm5, %v6150_v56, %v6160_v40  ;;  %v2998_v35 = vsel %vm8769_vm11, %v6159_v34, %v6149_v9  ;;  %v2999_v28 = vsel %vm8770_vm8, %v6160_v40, %v6150_v56  ;;  %v6163_v21 = vpop.permute.xlu1 %6162  ;;  %5131 = vmatpush1.bf16.msk.msra.mxu0 %vm6825_vm9, %v5129_v20  ;;  %vm8772_vm10 = vmmov %vm8768_vm5 }
 0x77c   : > { %v5132_v43 = vpack.c.bf16 %v2995_v24, %v2994_v12  ;;  %v5135_v36 = vpack.c.bf16 %v2999_v28, %v2998_v35  ;;  %v6165_v39 = vunpack.i.h.bf16 %v6163_v21  ;;  %v6164_v8 = vunpack.i.l.bf16 %v6163_v21  ;;  %v6173_v44 = vpop.permute.xlu0 %6172  ;;  %vm8773_vm11 = vmmov %vm8768_vm5 }
 0x77d   : > { %v6175_v4 = vunpack.i.h.bf16 %v6173_v44  ;;  %v6174_v49 = vunpack.i.l.bf16 %v6173_v44  ;;  %vm8774_vm8 = vcmp.lt.s32.totalorder %v6744_v19, 1  ;;  %v5156_v12 = vpack.c.bf16 %v7912_v57, %v7909_v54 }
 0x77e   : > { %5134 = vmatprep.subr.msk.bf16.mxu0 %vm6854_vm12, %v5132_v43 }
 0x77f   : > { %v2996_v0 = vsel %vm8771_vm13, %v6164_v8, %v6174_v49  ;;  %v2997_v1 = vsel %vm8772_vm10, %v6165_v39, %v6175_v4  ;;  %v3000_v58 = vsel %vm8768_vm5, %v6174_v49, %v6164_v8  ;;  %v3001_v60 = vsel %vm8773_vm11, %v6175_v4, %v6165_v39  ;;  %v6168_v32 = vpop.permute.xlu1 %6167  ;;  %5137 = vmatpush1.bf16.msk.msra.mxu0 %vm6875_vm15, %v5135_v36  ;;  %vm8775_vm13 = vmmov %vm8774_vm8 }
 0x780   : > { %v5138_v61 = vpack.c.bf16 %v2997_v1, %v2996_v0  ;;  %v5141_v14 = vpack.c.bf16 %v3001_v60, %v3000_v58  ;;  %v6170_v62 = vunpack.i.h.bf16 %v6168_v32  ;;  %v6169_v3 = vunpack.i.l.bf16 %v6168_v32  ;;  %v6178_v29 = vpop.permute.xlu0 %6177  ;;  %vm8776_vm10 = vmmov %vm8774_vm8 }
 0x781   : > { %v6180_v63 = vunpack.i.h.bf16 %v6178_v29  ;;  %v6179_v31 = vunpack.i.l.bf16 %v6178_v29  ;;  %vm8777_vm5 = vmmov %vm8774_vm8  ;;  %v5158_v39 = vpack.c.bf16 %v7906_v48, %v7903_v45  ;;  %v5160_v4 = vpack.c.bf16 %v7930_v53, %v7927_v51 }
 0x782   : > { %5140 = vmatprep.subr.msk.bf16.mxu0 %vm6854_vm12, %v5138_v61  ;;  %vm8778_vm11 = vmmov %vm8777_vm5 }
 0x783   : > { %v3034_v10 = vsel %vm8774_vm8, %v6169_v3, %v6179_v31  ;;  %v3035_v13 = vsel %vm8775_vm13, %v6170_v62, %v6180_v63  ;;  %v3038_v25 = vsel %vm8776_vm10, %v6179_v31, %v6169_v3  ;;  %v3039_v15 = vsel %vm8777_vm5, %v6180_v63, %v6170_v62  ;;  %v6183_v37 = vpop.permute.xlu1 %6182  ;;  %5143 = vmatpush1.bf16.msk.msra.mxu0 %vm6875_vm15, %v5141_v14  ;;  %vm8779_vm8 = vmmov %vm8777_vm5 }
 0x784   : > { %v5144_v46 = vpack.c.bf16 %v3035_v13, %v3034_v10  ;;  %v5147_v2 = vpack.c.bf16 %v3039_v15, %v3038_v25  ;;  %v6185_v50 = vunpack.i.h.bf16 %v6183_v37  ;;  %v6184_v55 = vunpack.i.l.bf16 %v6183_v37  ;;  %v6188_v6 = vpop.permute.xlu0 %6187  ;;  %vm8780_vm13 = vmmov %vm8777_vm5 }
 0x785   : > { %v6190_v7 = vunpack.i.h.bf16 %v6188_v6  ;;  %v6189_v17 = vunpack.i.l.bf16 %v6188_v6  ;;  %vm8781_vm10 = vmmov %vm8777_vm5  ;;  %vm8782_vm5 = vcmp.lt.s32.totalorder %v6744_v19, 127  ;;  %v5162_v3 = vpack.c.bf16 %v7924_v16, %v7921_v30 }
 0x786   : > { %5146 = vmatprep.subr.msk.bf16.mxu0 %vm6781_vm6, %v5144_v46 }
 0x787   : > { %v3036_v26 = vsel %vm8778_vm11, %v6184_v55, %v6189_v17  ;;  %v3037_v20 = vsel %vm8779_vm8, %v6185_v50, %v6190_v7  ;;  %v3040_v56 = vsel %vm8780_vm13, %v6189_v17, %v6184_v55  ;;  %v3041_v9 = vsel %vm8781_vm10, %v6190_v7, %v6185_v50  ;;  %v6193_v22 = vpop.permute.xlu1 %6192  ;;  %5149 = vmatpush1.bf16.msk.msra.mxu0 %vm6900_vm0, %v5147_v2  ;;  %vm8783_vm11 = vmmov %vm8782_vm5 }
 0x788   : > { %v5150_v38 = vpack.c.bf16 %v3037_v20, %v3036_v26  ;;  %v5153_v40 = vpack.c.bf16 %v3041_v9, %v3040_v56  ;;  %v6198_v34 = vpop.permute.xlu0 %6197  ;;  %v6195_v24 = vunpack.i.h.bf16 %v6193_v22  ;;  %v6194_v35 = vunpack.i.l.bf16 %v6193_v22  ;;  %vm8784_vm8 = vmmov %vm8782_vm5 }
 0x789   : > { %v6200_v28 = vunpack.i.h.bf16 %v6198_v34  ;;  %v6199_v21 = vunpack.i.l.bf16 %v6198_v34  ;;  %vm8785_vm13 = vmmov %vm8782_vm5 }
 0x78a   : > { %5152 = vmatprep.subr.msk.bf16.mxu0 %vm6781_vm6, %v5150_v38  ;;  %vm8786_vm10 = vmmov %vm8782_vm5 }
 0x78b   : > { %v6203_v43 = vpop.permute.xlu1 %6202  ;;  %5155 = vmatpush1.bf16.msk.msra.mxu0 %vm6900_vm0, %v5153_v40  ;;  %v3086_v8 = vsel %vm8782_vm5, %v6199_v21, %v6194_v35  ;;  %v3087_v44 = vsel %vm8783_vm11, %v6200_v28, %v6195_v24  ;;  %v3082_v61 = vsel %vm8784_vm8, %v6194_v35, %v6199_v21  ;;  %v3083_v14 = vsel %vm8785_vm13, %v6195_v24, %v6200_v28  ;;  %vm8787_vm11 = vmmov %vm8782_vm5 }
 0x78c   : > { %v6213_v36 = vpop.permute.xlu0 %6212  ;;  %5157 = vmatprep.subr.bf16.mxu0 %v5156_v12  ;;  %v6205_v49 = vunpack.i.h.bf16 %v6203_v43  ;;  %v6204_v0 = vunpack.i.l.bf16 %v6203_v43  ;;  %v5164_v62 = vpack.c.bf16 %v3087_v44, %v3086_v8  ;;  %v5167_v46 = vpack.c.bf16 %v3083_v14, %v3082_v61  ;;  %vm8788_vm8 = vmmov %vm8782_vm5 }
 0x78d   : > { %v6215_v1 = vunpack.i.h.bf16 %v6213_v36  ;;  %v6214_v58 = vunpack.i.l.bf16 %v6213_v36  ;;  %vm8789_vm13 = vcmp.lt.s32.totalorder %v6744_v19, 113 }
 0x78f   : > { %v6208_v60 = vpop.permute.xlu1 %6207  ;;  %5159 = vmatpush1.bf16.msra.mxu0 %v5158_v39  ;;  %v3088_v13 = vsel %vm8786_vm10, %v6214_v58, %v6204_v0  ;;  %v3089_v25 = vsel %vm8782_vm5, %v6215_v1, %v6205_v49  ;;  %v3084_v2 = vsel %vm8787_vm11, %v6204_v0, %v6214_v58  ;;  %v3085_v50 = vsel %vm8788_vm8, %v6205_v49, %v6215_v1  ;;  %vm8790_vm10 = vmmov %vm8789_vm13 }
 0x790   : > { %v6218_v32 = vpop.permute.xlu0 %6217  ;;  %5161 = vmatprep.subr.bf16.mxu0 %v5160_v4  ;;  %v6210_v29 = vunpack.i.h.bf16 %v6208_v60  ;;  %v6209_v63 = vunpack.i.l.bf16 %v6208_v60  ;;  %v5170_v55 = vpack.c.bf16 %v3089_v25, %v3088_v13  ;;  %v5173_v38 = vpack.c.bf16 %v3085_v50, %v3084_v2  ;;  %vm8791_vm5 = vmmov %vm8790_vm10 }
 0x791   : > { %v6220_v31 = vunpack.i.h.bf16 %v6218_v32  ;;  %v6219_v10 = vunpack.i.l.bf16 %v6218_v32  ;;  %vm8792_vm11 = vmmov %vm8791_vm5 }
 0x792   : > { %vm8793_vm8 = vmmov %vm8791_vm5 }
 0x793   : > { %v6223_v15 = vpop.permute.xlu1 %6222  ;;  %5163 = vmatpush1.bf16.msra.mxu0 %v5162_v3  ;;  %v3126_v6 = vsel %vm8789_vm13, %v6219_v10, %v6209_v63  ;;  %v3127_v7 = vsel %vm8790_vm10, %v6220_v31, %v6210_v29  ;;  %v3122_v40 = vsel %vm8791_vm5, %v6209_v63, %v6219_v10  ;;  %v3123_v34 = vsel %vm8792_vm11, %v6210_v29, %v6220_v31  ;;  %vm8794_vm13 = vmmov %vm8791_vm5 }
 0x794   : > { %v6233_v37 = vpop.permute.xlu0 %6232  ;;  %5166 = vmatprep.subr.msk.bf16.mxu0 %vm6854_vm12, %v5164_v62  ;;  %v6225_v17 = vunpack.i.h.bf16 %v6223_v15  ;;  %v6224_v26 = vunpack.i.l.bf16 %v6223_v15  ;;  %v5176_v12 = vpack.c.bf16 %v3127_v7, %v3126_v6  ;;  %v5179_v44 = vpack.c.bf16 %v3123_v34, %v3122_v40  ;;  %vm8795_vm10 = vmmov %vm8791_vm5 }
 0x795   : > { %v6235_v20 = vunpack.i.h.bf16 %v6233_v37  ;;  %v6234_v56 = vunpack.i.l.bf16 %v6233_v37  ;;  %vm8796_vm11 = vcmp.lt.s32.totalorder %v6744_v19, 112 }
 0x797   : > { %v6228_v9 = vpop.permute.xlu1 %6227  ;;  %5169 = vmatpush1.bf16.msk.msra.mxu0 %vm6944_vm14, %v5167_v46  ;;  %v3128_v43 = vsel %vm8793_vm8, %v6234_v56, %v6224_v26  ;;  %v3129_v36 = vsel %vm8794_vm13, %v6235_v20, %v6225_v17  ;;  %v3124_v4 = vsel %vm8795_vm10, %v6224_v26, %v6234_v56  ;;  %v3125_v49 = vsel %vm8791_vm5, %v6225_v17, %v6235_v20  ;;  %vm8797_vm8 = vmmov %vm8796_vm11 }
 0x798   : > { %v6238_v22 = vpop.permute.xlu0 %6237  ;;  %5172 = vmatprep.subr.msk.bf16.mxu0 %vm6854_vm12, %v5170_v55  ;;  %v6230_v24 = vunpack.i.h.bf16 %v6228_v9  ;;  %v6229_v35 = vunpack.i.l.bf16 %v6228_v9  ;;  %v5182_v0 = vpack.c.bf16 %v3129_v36, %v3128_v43  ;;  %v5185_v29 = vpack.c.bf16 %v3125_v49, %v3124_v4  ;;  %vm8798_vm13 = vmmov %vm8797_vm8  ;;  %v3227_v43 = vld [vmem:[#allocation3 + $0x180] sm:$0xff]  ;;  %v3230_v49 = vld [vmem:[#allocation3 + $0x198] sm:$0xff] }
 0x799   : > { %v6240_v28 = vunpack.i.h.bf16 %v6238_v22  ;;  %v6239_v21 = vunpack.i.l.bf16 %v6238_v22  ;;  %vm8799_vm10 = vmmov %vm8797_vm8  ;;  %v3231_v36 = vld [vmem:[#allocation3 + $0x1a0] sm:$0xff] }
 0x79a   : > { %vm8800_vm5 = vmmov %vm8797_vm8 }
 0x79b   : > { %v6243_v39 = vpop.permute.xlu1 %6242  ;;  %5175 = vmatpush1.bf16.msk.msra.mxu0 %vm6944_vm14, %v5173_v38  ;;  %v3166_v1 = vsel %vm8796_vm11, %v6239_v21, %v6229_v35  ;;  %v3167_v58 = vsel %vm8797_vm8, %v6240_v28, %v6230_v24  ;;  %v3162_v63 = vsel %vm8798_vm13, %v6229_v35, %v6239_v21  ;;  %v3163_v31 = vsel %vm8799_vm10, %v6230_v24, %v6240_v28  ;;  %vm8801_vm11 = vmmov %vm8800_vm5 }
 0x79c   : > { %v6248_v8 = vpop.permute.xlu0 %6247  ;;  %5178 = vmatprep.subr.msk.bf16.mxu0 %vm6980_vm1, %v5176_v12  ;;  %v6245_v60 = vunpack.i.h.bf16 %v6243_v39  ;;  %v6244_v32 = vunpack.i.l.bf16 %v6243_v39  ;;  %v5188_v10 = vpack.c.bf16 %v3167_v58, %v3166_v1  ;;  %v5191_v6 = vpack.c.bf16 %v3163_v31, %v3162_v63  ;;  %vm8802_vm8 = vmmov %vm8800_vm5  ;;  %v3233_v58 = vld [vmem:[#allocation3 + $0x1b0] sm:$0xff] }
 0x79d   : > { %v6250_v61 = vunpack.i.h.bf16 %v6248_v8  ;;  %v6249_v14 = vunpack.i.l.bf16 %v6248_v8  ;;  %vm8803_vm13 = vmmov %vm8800_vm5  ;;  %vm8804_vm10 = vcmp.lt.s32.totalorder %v6744_v19, 111 }
 0x79f   : > { %v6253_v62 = vpop.permute.xlu1 %6252  ;;  %5181 = vmatpush1.bf16.msk.msra.mxu0 %vm6900_vm0, %v5179_v44  ;;  %v3168_v46 = vsel %vm8800_vm5, %v6249_v14, %v6244_v32  ;;  %v3169_v2 = vsel %vm8801_vm11, %v6250_v61, %v6245_v60  ;;  %v3164_v7 = vsel %vm8802_vm8, %v6244_v32, %v6249_v14  ;;  %v3165_v17 = vsel %vm8803_vm13, %v6245_v60, %v6250_v61  ;;  %vm8805_vm5 = vmmov %vm8804_vm10  ;;  %v3237_v60 = vld [vmem:[#allocation3 + $0x1d0] sm:$0xff]  ;;  %v3236_v32 = vld [vmem:[#allocation3 + $0x1c8] sm:$0xff] }
 0x7a0   : > { %v6258_v3 = vpop.permute.xlu0 %6257  ;;  %5184 = vmatprep.subr.msk.bf16.mxu0 %vm6980_vm1, %v5182_v0  ;;  %v6255_v13 = vunpack.i.h.bf16 %v6253_v62  ;;  %v6254_v25 = vunpack.i.l.bf16 %v6253_v62  ;;  %v5193_v26 = vpack.c.bf16 %v3169_v2, %v3168_v46  ;;  %v5196_v34 = vpack.c.bf16 %v3165_v17, %v3164_v7  ;;  %vm8806_vm11 = vmmov %vm8805_vm5  ;;  %v3234_v0 = vld [vmem:[#allocation3 + $0x1b8] sm:$0xff]  ;;  %v3229_v61 = vld [vmem:[#allocation3 + $0x190] sm:$0xff] }
 0x7a1   : > { %v6260_v15 = vunpack.i.h.bf16 %v6258_v3  ;;  %v6259_v37 = vunpack.i.l.bf16 %v6258_v3  ;;  %vm8807_vm8 = vmmov %vm8805_vm5  ;;  %v3232_v14 = vld [vmem:[#allocation3 + $0x1a8] sm:$0xff]  ;;  %v3235_v62 = vld [vmem:[#allocation3 + $0x1c0] sm:$0xff] }
 0x7a2   : > { %vm8808_vm13 = vmmov %vm8805_vm5  ;;  %v3238_v3 = vld [vmem:[#allocation3 + $0x1d8] sm:$0xff] }
 0x7a3   : > { %5187 = vmatpush1.bf16.msk.msra.mxu0 %vm6900_vm0, %v5185_v29  ;;  %v6263_v50 = vpop.permute.xlu1 %6262  ;;  %v3206_v20 = vsel %vm8804_vm10, %v6259_v37, %v6254_v25  ;;  %v3207_v56 = vsel %vm8805_vm5, %v6260_v15, %v6255_v13  ;;  %v3202_v12 = vsel %vm8806_vm11, %v6254_v25, %v6259_v37  ;;  %v3203_v24 = vsel %vm8807_vm8, %v6255_v13, %v6260_v15  ;;  %vm8809_vm10 = vmmov %vm8805_vm5 }
 0x7a4   : > { %v6268_v55 = vpop.permute.xlu0 %6267  ;;  %5190 = vmatprep.subr.msk.bf16.mxu0 %vm7012_vm4, %v5188_v10  ;;  %v6265_v9 = vunpack.i.h.bf16 %v6263_v50  ;;  %v6264_v22 = vunpack.i.l.bf16 %v6263_v50  ;;  %v5198_v35 = vpack.c.bf16 %v3207_v56, %v3206_v20  ;;  %v5201_v39 = vpack.c.bf16 %v3203_v24, %v3202_v12  ;;  %vm8810_vm11 = vmmov %vm8805_vm5 }
 0x7a5   : > { %v6270_v38 = vunpack.i.h.bf16 %v6268_v55  ;;  %v6269_v40 = vunpack.i.l.bf16 %v6268_v55  ;;  %vm8811_vm8 = vcmask 261120  }
 0x7a7   : > { %5192 = vmatpush1.bf16.msra.mxu0 %v5191_v6  ;;  %v3208_v28 = vsel %vm8808_vm13, %v6269_v40, %v6264_v22  ;;  %v3209_v21 = vsel %vm8809_vm10, %v6270_v38, %v6265_v9  ;;  %v3204_v8 = vsel %vm8805_vm5, %v6264_v22, %v6269_v40  ;;  %v3205_v44 = vsel %vm8810_vm11, %v6265_v9, %v6270_v38  ;;  %vm8812_vm13 = vmmov %vm8811_vm8 }
 0x7a8   : > { %5195 = vmatprep.subr.msk.bf16.mxu0 %vm7012_vm4, %v5193_v26  ;;  %v5204_v4 = vpack.c.bf16 %v3209_v21, %v3208_v28  ;;  %v5207_v1 = vpack.c.bf16 %v3205_v44, %v3204_v8  ;;  %vm8813_vm10 = vmmov %vm8811_vm8 }
 0x7a9   : > { %vm8814_vm5 = vmmov %vm8811_vm8 }
 0x7ab   : > { %5197 = vmatpush1.bf16.msra.mxu0 %v5196_v34 }
 0x7ac   : > { %5200 = vmatprep.subr.msk.bf16.mxu0 %vm7038_vm3, %v5198_v35 }
 0x7ae   : > { %3413 = vmatmul.mubr.f32.vlgmr.msra.gmra.mrb[16].mxu0 %v3227_v43 }
 0x7af   : > { %5203 = vmatpush1.bf16.msk.msra.mxu0 %vm6944_vm14, %v5201_v39  ;;  %3418 = vmatprep.mubr.f32.mxu0 %v3231_v36 }
 0x7b0   : > { %5206 = vmatprep.subr.msk.bf16.mxu0 %vm7038_vm3, %v5204_v4 }
 0x7b2   : > { %3419 = vmatmul.mubr.f32.gmra.mrb[18].mxu0 %v3230_v49 }
 0x7b3   : > { %5209 = vmatpush1.bf16.msk.msra.mxu0 %vm6944_vm14, %v5207_v1  ;;  %3424 = vmatprep.mubr.f32.mxu0 %v3234_v0 }
 0x7b4   : > { %v3319_v29 = vpop.permute.xlu1 %3318 }
 0x7b5   : > { %v3324_v25 = vpop.permute.xlu0 %3323 }
 0x7b6   : > { %3425 = vmatmul.mubr.f32.gmra.mrb[20].mxu0 %v3233_v58 }
 0x7b7   : > { %3430 = vmatprep.mubr.f32.mxu0 %v3237_v60 }
 0x7b8   : > { %v3329_v7 = vpop.permute.xlu1 %3328 }
 0x7b9   : > { %v3334_v28 = vpop.permute.xlu0 %3333 }
 0x7ba   : > { %3431 = vmatmul.mubr.f32.gmra.mrb[22].mxu0 %v3236_v32 }
 0x7bb   : > { %3501 = vmatprep.mubr.f32.mxu0 %v6555_v27 }
 0x7be   : > { %4355 = vmatmul.mubr.msk.f32.vlgmr.msra.gmra.mrb[16].mxu0 %vm8811_vm8, %v3229_v61 }
 0x7bf   : > { %3507 = vmatprep.mubr.f32.mxu0 %v6555_v27 }
 0x7c2   : > { %4356 = vmatmul.mubr.msk.f32.gmra.mrb[18].mxu0 %vm8812_vm13, %v3232_v14 }
 0x7c3   : > { %3513 = vmatprep.mubr.f32.mxu0 %v6555_v27 }
 0x7c6   : > { %4357 = vmatmul.mubr.msk.f32.gmra.mrb[20].mxu0 %vm8813_vm10, %v3235_v62 }
 0x7c7   : > { %3519 = vmatprep.mubr.f32.mxu0 %v6555_v27 }
 0x7ca   : > { %4358 = vmatmul.mubr.msk.f32.gmra.mrb[22].mxu0 %vm8814_vm5, %v3238_v3 }
 0x891   : > { %v3503_v63 = vpop.f32.mrb[16].mxu0 }
 0x892   : > { %v5342_v31 = vadd.f32 %v3503_v63, %v3319_v29  ;;  %v3505_v10 = vpop.f32.mrb[17].mxu0  ;;  %v4359_v63 = vld [vmem:[%s8542_s2 + $0xa0] sm:$0xff] }
 0x893   : > { %v5343_v13 = vadd.f32 %v3505_v10, %v3319_v29  ;;  %v3880_v29 = vld [vmem:[#allocation3 + $0x1e8] sm:$0xff]  ;;  %v4361_v10 = vld [vmem:[%s8542_s2 + $0xb0] sm:$0xff] }
 0x894   : > { %v3534_v37 = vmul.f32 0.01, %v5342_v31  ;;  %vm3526_vm11 = vcmp.ge.f32.partialorder %v5342_v31, 0.0  ;;  %4064 = vmatprep.mubr.f32.mxu1 %v3880_v29 }
 0x895   : > { %v3509_v15 = vpop.f32.mrb[18].mxu0  ;;  %v3535_v46 = vmul.f32 0.01, %v5343_v13  ;;  %vm3527_vm8 = vcmp.ge.f32.partialorder %v5343_v13, 0.0 }
 0x896   : > { %v5344_v2 = vadd.f32 %v3509_v15, %v3324_v25  ;;  %v3511_v50 = vpop.f32.mrb[19].mxu0  ;;  %v8178_v20 = vsel %vm3526_vm11, %v5342_v31, %v3534_v37  ;;  %v4360_v31 = vld [vmem:[%s8542_s2 + $0xa8] sm:$0xff] }
 0x897   : > { %v5345_v55 = vadd.f32 %v3511_v50, %v3324_v25  ;;  %v8180_v56 = vsel %vm3527_vm8, %v5343_v13, %v3535_v46  ;;  %v4362_v13 = vld [vmem:[%s8542_s2 + $0xb8] sm:$0xff] }
 0x898   : > { %vm3528_vm13 = vcmp.ge.f32.partialorder %v5344_v2, 0.0  ;;  %v3536_v6 = vmul.f32 0.01, %v5344_v2 }
 0x899   : > { %vm3529_vm10 = vcmp.ge.f32.partialorder %v5345_v55, 0.0  ;;  %v3537_v17 = vmul.f32 0.01, %v5345_v55  ;;  %v3515_v26 = vpop.f32.mrb[20].mxu0 }
 0x89a   : > { %v8182_v9 = vsel %vm3528_vm13, %v5344_v2, %v3536_v6  ;;  %v5346_v22 = vadd.f32 %v3515_v26, %v3329_v7  ;;  %v3517_v38 = vpop.f32.mrb[21].mxu0 }
 0x89b   : > { %v8184_v40 = vsel %vm3529_vm10, %v5345_v55, %v3537_v17  ;;  %v5347_v34 = vadd.f32 %v3517_v38, %v3329_v7  ;;  %v6271_v12 = vpack.i.bf16 %v8182_v9, %v8178_v20  ;;  %v5258_v14 = vpack.c.bf16 %v8182_v9, %v8178_v20 }
 0x89c   : > { %vm3530_vm5 = vcmp.ge.f32.partialorder %v5346_v22, 0.0  ;;  %v3538_v24 = vmul.f32 0.01, %v5346_v22  ;;  %v6276_v35 = vpack.i.bf16 %v8184_v40, %v8180_v56  ;;  %v5256_v58 = vpack.c.bf16 %v8184_v40, %v8180_v56 }
 0x89d   : > { %vm3531_vm11 = vcmp.ge.f32.partialorder %v5347_v34, 0.0  ;;  %v3539_v21 = vmul.f32 0.01, %v5347_v34  ;;  %v3521_v43 = vpop.f32.mrb[22].mxu0  ;;  %6272 = vrot.lane.b32.xlu1 %v6271_v12, %s6546_s24  ;;  %vm8815_vm10 = vcmp.lt.s32.totalorder %v6744_v19, 16 }
 0x89e   : > { %v8191_v36 = vsel %vm3530_vm5, %v5346_v22, %v3538_v24  ;;  %v5348_v39 = vadd.f32 %v3521_v43, %v3334_v28  ;;  %v3523_v8 = vpop.f32.mrb[23].mxu0  ;;  %6277 = vrot.lane.b32.xlu0 %v6276_v35, %s6546_s24  ;;  %vm8816_vm5 = vmmov %vm8815_vm10 }
 0x89f   : > { %v8194_v44 = vsel %vm3531_vm11, %v5347_v34, %v3539_v21  ;;  %v5349_v4 = vadd.f32 %v3523_v8, %v3334_v28 }
 0x8a0   : > { %vm3532_vm8 = vcmp.ge.f32.partialorder %v5348_v39, 0.0  ;;  %v3540_v49 = vmul.f32 0.01, %v5348_v39 }
 0x8a1   : > { %vm3533_vm13 = vcmp.ge.f32.partialorder %v5349_v4, 0.0  ;;  %v3541_v0 = vmul.f32 0.01, %v5349_v4 }
 0x8a2   : > { %v8196_v1 = vsel %vm3532_vm8, %v5348_v39, %v3540_v49 }
 0x8a3   : > { %v8200_v60 = vsel %vm3533_vm13, %v5349_v4, %v3541_v0  ;;  %v6281_v32 = vpack.i.bf16 %v8196_v1, %v8191_v36  ;;  %v5262_v3 = vpack.c.bf16 %v8196_v1, %v8191_v36 }
 0x8a4   : > { %v6291_v61 = vpack.i.bf16 %v8200_v60, %v8194_v44  ;;  %v5260_v62 = vpack.c.bf16 %v8200_v60, %v8194_v44 }
 0x8a5   : > { %6282 = vrot.lane.b32.xlu1 %v6281_v32, %s6546_s24 }
 0x8a6   : > { %6292 = vrot.lane.b32.xlu0 %v6291_v61, %s6546_s24 }
 0x8a9   : > { %6287 = vrot.lane.b32.xlu1 %v6271_v12, %s6547_s26 }
 0x8aa   : > { %6297 = vrot.lane.b32.xlu0 %v6276_v35, %s6547_s26 }
 0x8ad   : > { %6302 = vrot.lane.b32.xlu1 %v6281_v32, %s6547_s26 }
 0x8ae   : > { %6312 = vrot.lane.b32.xlu0 %v6291_v61, %s6547_s26 }
 0x8b1   : > { %6307 = vrot.lane.b32.xlu1 %v6271_v12, %s6548_s29 }
 0x8b2   : > { %6317 = vrot.lane.b32.xlu0 %v6276_v35, %s6548_s29 }
 0x8b5   : > { %6322 = vrot.lane.b32.xlu1 %v6281_v32, %s6548_s29 }
 0x8b6   : > { %6332 = vrot.lane.b32.xlu0 %v6291_v61, %s6548_s29  ;;  %s6556_s29 = smov [#allocation6]  }
 0x8b9   : > { %6327 = vrot.lane.b32.xlu1 %v6271_v12, %s6549_s30 }
 0x8ba   : > { %6337 = vrot.lane.b32.xlu0 %v6276_v35, %s6549_s30 }
 0x8bd   : > { %6342 = vrot.lane.b32.xlu1 %v6281_v32, %s6549_s30 }
 0x8be   : > { %6347 = vrot.lane.b32.xlu0 %v6291_v61, %s6549_s30  ;;  %s6479_s30 = sshll.u32 %s6556_s29, 4  ;;  %s6480_s30 = int_to_ptr.vmem [resolvable:$false] %s6479_s30 }
 0x8c1   : > { %6352 = vrot.lane.b32.xlu1 %v6271_v12, %s6550_s4 }
 0x8c2   : > { %6357 = vrot.lane.b32.xlu0 %v6276_v35, %s6550_s4 }
 0x8c5   : > { %6362 = vrot.lane.b32.xlu1 %v6281_v32, %s6550_s4 }
 0x8c6   : > { %6372 = vrot.lane.b32.xlu0 %v6291_v61, %s6550_s4 }
 0x8c9   : > { %6367 = vrot.lane.b32.xlu1 %v6271_v12, %s6551_s5 }
 0x8ca   : > { %6377 = vrot.lane.b32.xlu0 %v6276_v35, %s6551_s5 }
 0x8cd   : > { %6382 = vrot.lane.b32.xlu1 %v6281_v32, %s6551_s5 }
 0x8ce   : > { %6392 = vrot.lane.b32.xlu0 %v6291_v61, %s6551_s5 }
 0x8d1   : > { %6387 = vrot.lane.b32.xlu1 %v6271_v12, %s6552_s6 }
 0x8d2   : > { %6397 = vrot.lane.b32.xlu0 %v6276_v35, %s6552_s6 }
 0x8d5   : > { %6402 = vrot.lane.b32.xlu1 %v6281_v32, %s6552_s6 }
 0x8d6   : > { %6407 = vrot.lane.b32.xlu0 %v6291_v61, %s6552_s6 }
 0x8d9   : > { %6412 = vrot.lane.b32.xlu1 %v6271_v12, %s6553_s7 }
 0x8da   : > { %6417 = vrot.lane.b32.xlu0 %v6276_v35, %s6553_s7 }
 0x8dd   : > { %6422 = vrot.lane.b32.xlu1 %v6281_v32, %s6553_s7 }
 0x8de   : > { %6427 = vrot.lane.b32.xlu0 %v6291_v61, %s6553_s7  ;;  %s176_s7 = sand.u32 1, %s6533_s13  }
 0x8df   : > { %s4320_s20 = sshll.u32 %s176_s7, 6  ;;  %s8498_s16 = scalar_lea.sflag [#allocation5], %s176_s7 }
 0x8e0   : > { %s8465_s25 = scalar_lea.vmem [#allocation6], %s4320_s20 }
 0x8e1   : > { %3970 = vperm.xlu1 %5630, %v4359_v63   ;;  %s4240_s8 = sshll.u32 %s8465_s25, 4  ;;  %s8492_s8 = int_to_ptr.vmem [resolvable:$true] %s4240_s8 }
 0x8e2   : > { %3975 = vperm.xlu0 %5629, %v4360_v31   ;;  %s6475_s24 = scalar_lea.vmem %s8492_s8, 1024  ;;  %p6482_p2 = scmp.lt.s32.totalorder %s8492_s8, %s6480_s30 }
 0x8e3   : > { %p6476_p6 = scmp.ne.s32.totalorder %s8492_s8, %s6475_s24 }
 0x8e5   : > { %3980 = vperm.xlu1 %5630, %v4361_v10   ;;  %p6477_p10 = pnand %p6476_p6, %p8875_p9 }
 0x8e6   : > { %3985 = vperm.xlu0 %5629, %v4362_v13  }
 0x8e7   : > { %p6478_p12 = pneg %p6477_p10 }
 0x90f   : > { %v6273_v25 = vpop.permute.xlu1 %6272 }
 0x910   : > { %v6275_v15 = vunpack.i.h.bf16 %v6273_v25  ;;  %v6274_v37 = vunpack.i.l.bf16 %v6273_v25  ;;  %v6278_v46 = vpop.permute.xlu0 %6277 }
 0x911   : > { %v6280_v2 = vunpack.i.h.bf16 %v6278_v46  ;;  %v6279_v50 = vunpack.i.l.bf16 %v6278_v46 }
 0x913   : > { %v3566_v55 = vsel %vm251_vm2, %v6274_v37, %v6279_v50  ;;  %v3567_v6 = vsel %vm251_vm2, %v6275_v15, %v6280_v2  ;;  %v3570_v7 = vsel %vm251_vm2, %v6279_v50, %v6274_v37  ;;  %v3571_v17 = vsel %vm251_vm2, %v6280_v2, %v6275_v15 }
 0x914   : > { %v5210_v26 = vpack.c.bf16 %v3567_v6, %v3566_v55  ;;  %v5213_v22 = vpack.c.bf16 %v3571_v17, %v3570_v7 }
 0x916   : > { %5212 = vmatprep.subr.msk.bf16.mxu1 %vm6781_vm6, %v5210_v26 }
 0x917   : > { %v6283_v38 = vpop.permute.xlu1 %6282  ;;  %5215 = vmatpush1.bf16.msk.msra.mxu1 %vm6789_vm7, %v5213_v22 }
 0x918   : > { %v6285_v34 = vunpack.i.h.bf16 %v6283_v38  ;;  %v6284_v12 = vunpack.i.l.bf16 %v6283_v38  ;;  %v6293_v24 = vpop.permute.xlu0 %6292 }
 0x919   : > { %v6295_v35 = vunpack.i.h.bf16 %v6293_v24  ;;  %v6294_v28 = vunpack.i.l.bf16 %v6293_v24 }
 0x91b   : > { %v3568_v21 = vsel %vm251_vm2, %v6284_v12, %v6294_v28  ;;  %v3569_v43 = vsel %vm251_vm2, %v6285_v34, %v6295_v35  ;;  %v3572_v39 = vsel %vm251_vm2, %v6294_v28, %v6284_v12  ;;  %v3573_v8 = vsel %vm251_vm2, %v6295_v35, %v6285_v34  ;;  %v6288_v4 = vpop.permute.xlu1 %6287  ;;  %vm8817_vm2 = vmmov %vm8816_vm5 }
 0x91c   : > { %v5216_v49 = vpack.c.bf16 %v3569_v43, %v3568_v21  ;;  %v5219_v0 = vpack.c.bf16 %v3573_v8, %v3572_v39  ;;  %v6290_v32 = vunpack.i.h.bf16 %v6288_v4  ;;  %v6289_v61 = vunpack.i.l.bf16 %v6288_v4  ;;  %v6298_v29 = vpop.permute.xlu0 %6297  ;;  %vm8818_vm11 = vmmov %vm8817_vm2 }
 0x91d   : > { %v6300_v63 = vunpack.i.h.bf16 %v6298_v29  ;;  %v6299_v31 = vunpack.i.l.bf16 %v6298_v29  ;;  %vm8819_vm8 = vmmov %vm8817_vm2 }
 0x91e   : > { %5218 = vmatprep.subr.msk.bf16.mxu1 %vm6781_vm6, %v5216_v49  ;;  %vm8820_vm13 = vmmov %vm8817_vm2 }
 0x91f   : > { %v3610_v10 = vsel %vm8815_vm10, %v6299_v31, %v6289_v61  ;;  %v3611_v13 = vsel %vm8816_vm5, %v6300_v63, %v6290_v32  ;;  %v6303_v25 = vpop.permute.xlu1 %6302  ;;  %5221 = vmatpush1.bf16.msk.msra.mxu1 %vm6789_vm7, %v5219_v0  ;;  %v3606_v15 = vsel %vm8817_vm2, %v6289_v61, %v6299_v31  ;;  %v3607_v37 = vsel %vm8818_vm11, %v6290_v32, %v6300_v63  ;;  %vm8821_vm7 = vmmov %vm8817_vm2 }
 0x920   : > { %v5224_v46 = vpack.c.bf16 %v3611_v13, %v3610_v10  ;;  %v6305_v2 = vunpack.i.h.bf16 %v6303_v25  ;;  %v6304_v50 = vunpack.i.l.bf16 %v6303_v25  ;;  %v6313_v55 = vpop.permute.xlu0 %6312  ;;  %v5222_v6 = vpack.c.bf16 %v3607_v37, %v3606_v15  ;;  %vm8822_vm10 = vmmov %vm8817_vm2 }
 0x921   : > { %v6315_v7 = vunpack.i.h.bf16 %v6313_v55  ;;  %v6314_v17 = vunpack.i.l.bf16 %v6313_v55  ;;  %vm8823_vm5 = vcmp.lt.s32.totalorder %v6744_v19, 15 }
 0x922   : > { %5223 = vmatprep.subr.bf16.mxu1 %v5222_v6  ;;  %vm8824_vm2 = vmmov %vm8823_vm5 }
 0x923   : > { %v3612_v26 = vsel %vm8819_vm8, %v6314_v17, %v6304_v50  ;;  %v3613_v47 = vsel %vm8820_vm13, %v6315_v7, %v6305_v2  ;;  %v6308_v22 = vpop.permute.xlu1 %6307  ;;  %5226 = vmatpush1.bf16.msk.msra.mxu1 %vm6825_vm9, %v5224_v46  ;;  %v3608_v38 = vsel %vm8821_vm7, %v6304_v50, %v6314_v17  ;;  %v3609_v34 = vsel %vm8822_vm10, %v6305_v2, %v6315_v7  ;;  %vm8825_vm11 = vmmov %vm8824_vm2 }
 0x924   : > { %v5229_v12 = vpack.c.bf16 %v3613_v47, %v3612_v26  ;;  %v6310_v24 = vunpack.i.h.bf16 %v6308_v22  ;;  %v6309_v35 = vunpack.i.l.bf16 %v6308_v22  ;;  %v6318_v28 = vpop.permute.xlu0 %6317  ;;  %v5227_v21 = vpack.c.bf16 %v3609_v34, %v3608_v38  ;;  %vm8826_vm8 = vmmov %vm8824_vm2 }
 0x925   : > { %v6320_v43 = vunpack.i.h.bf16 %v6318_v28  ;;  %v6319_v39 = vunpack.i.l.bf16 %v6318_v28  ;;  %vm8827_vm13 = vmmov %vm8824_vm2 }
 0x926   : > { %5228 = vmatprep.subr.bf16.mxu1 %v5227_v21  ;;  %vm8828_vm7 = vmmov %vm8824_vm2 }
 0x927   : > { %v3646_v8 = vsel %vm8823_vm5, %v6309_v35, %v6319_v39  ;;  %v3647_v4 = vsel %vm8824_vm2, %v6310_v24, %v6320_v43  ;;  %v3650_v49 = vsel %vm8825_vm11, %v6319_v39, %v6309_v35  ;;  %v3651_v0 = vsel %vm8826_vm8, %v6320_v43, %v6310_v24  ;;  %v6323_v32 = vpop.permute.xlu1 %6322  ;;  %5231 = vmatpush1.bf16.msk.msra.mxu1 %vm6825_vm9, %v5229_v12  ;;  %vm8829_vm10 = vmmov %vm8824_vm2 }
 0x928   : > { %v5232_v61 = vpack.c.bf16 %v3647_v4, %v3646_v8  ;;  %v5235_v29 = vpack.c.bf16 %v3651_v0, %v3650_v49  ;;  %v6325_v63 = vunpack.i.h.bf16 %v6323_v32  ;;  %v6324_v31 = vunpack.i.l.bf16 %v6323_v32  ;;  %v6333_v10 = vpop.permute.xlu0 %6332  ;;  %vm8830_vm9 = vmmov %vm8824_vm2 }
 0x929   : > { %v6335_v13 = vunpack.i.h.bf16 %v6333_v10  ;;  %v6334_v25 = vunpack.i.l.bf16 %v6333_v10  ;;  %vm8831_vm5 = vcmp.lt.s32.totalorder %v6744_v19, 1 }
 0x92a   : > { %5234 = vmatprep.subr.msk.bf16.mxu1 %vm6854_vm12, %v5232_v61  ;;  %vm8832_vm2 = vmmov %vm8831_vm5 }
 0x92b   : > { %v3648_v15 = vsel %vm8827_vm13, %v6324_v31, %v6334_v25  ;;  %v3649_v37 = vsel %vm8828_vm7, %v6325_v63, %v6335_v13  ;;  %v3652_v18 = vsel %vm8829_vm10, %v6334_v25, %v6324_v31  ;;  %v3653_v46 = vsel %vm8830_vm9, %v6335_v13, %v6325_v63  ;;  %v6328_v2 = vpop.permute.xlu1 %6327  ;;  %5237 = vmatpush1.bf16.msk.msra.mxu1 %vm6875_vm15, %v5235_v29  ;;  %vm8833_vm11 = vmmov %vm8832_vm2 }
 0x92c   : > { %v5238_v50 = vpack.c.bf16 %v3649_v37, %v3648_v15  ;;  %v5241_v55 = vpack.c.bf16 %v3653_v46, %v3652_v18  ;;  %v6330_v6 = vunpack.i.h.bf16 %v6328_v2  ;;  %v6329_v7 = vunpack.i.l.bf16 %v6328_v2  ;;  %v6338_v17 = vpop.permute.xlu0 %6337  ;;  %vm8834_vm8 = vmmov %vm8832_vm2 }
 0x92d   : > { %v6340_v26 = vunpack.i.h.bf16 %v6338_v17  ;;  %v6339_v47 = vunpack.i.l.bf16 %v6338_v17  ;;  %vm8835_vm13 = vmmov %vm8832_vm2  ;;  %vm8839_vm9 = vcmp.lt.s32.totalorder %v6744_v19, 127 }
 0x92e   : > { %5240 = vmatprep.subr.msk.bf16.mxu1 %vm6854_vm12, %v5238_v50  ;;  %vm8836_vm7 = vmmov %vm8832_vm2 }
 0x92f   : > { %v3686_v22 = vsel %vm8831_vm5, %v6329_v7, %v6339_v47  ;;  %v3687_v38 = vsel %vm8832_vm2, %v6330_v6, %v6340_v26  ;;  %v3690_v34 = vsel %vm8833_vm11, %v6339_v47, %v6329_v7  ;;  %v3691_v12 = vsel %vm8834_vm8, %v6340_v26, %v6330_v6  ;;  %v6343_v24 = vpop.permute.xlu1 %6342  ;;  %5243 = vmatpush1.bf16.msk.msra.mxu1 %vm6875_vm15, %v5241_v55  ;;  %vm8837_vm10 = vmmov %vm8832_vm2 }
 0x930   : > { %v5244_v35 = vpack.c.bf16 %v3687_v38, %v3686_v22  ;;  %v5247_v28 = vpack.c.bf16 %v3691_v12, %v3690_v34  ;;  %v6345_v21 = vunpack.i.h.bf16 %v6343_v24  ;;  %v6344_v43 = vunpack.i.l.bf16 %v6343_v24  ;;  %v6348_v39 = vpop.permute.xlu0 %6347  ;;  %vm8838_vm15 = vmmov %vm8832_vm2 }
 0x931   : > { %v6350_v8 = vunpack.i.h.bf16 %v6348_v39  ;;  %v6349_v4 = vunpack.i.l.bf16 %v6348_v39  ;;  %vm8840_vm5 = vmmov %vm8839_vm9 }
 0x932   : > { %5246 = vmatprep.subr.msk.bf16.mxu1 %vm6781_vm6, %v5244_v35  ;;  %vm8842_vm2 = vmmov %vm8840_vm5 }
 0x933   : > { %v3688_v49 = vsel %vm8835_vm13, %v6344_v43, %v6349_v4  ;;  %v3689_v0 = vsel %vm8836_vm7, %v6345_v21, %v6350_v8  ;;  %v3692_v52 = vsel %vm8837_vm10, %v6349_v4, %v6344_v43  ;;  %v3693_v32 = vsel %vm8838_vm15, %v6350_v8, %v6345_v21  ;;  %v6353_v61 = vpop.permute.xlu1 %6352  ;;  %5249 = vmatpush1.bf16.msk.msra.mxu1 %vm6900_vm0, %v5247_v28  ;;  %vm8843_vm11 = vmmov %vm8842_vm2 }
 0x934   : > { %v5250_v29 = vpack.c.bf16 %v3689_v0, %v3688_v49  ;;  %v5253_v63 = vpack.c.bf16 %v3693_v32, %v3692_v52  ;;  %v6358_v31 = vpop.permute.xlu0 %6357  ;;  %v6355_v10 = vunpack.i.h.bf16 %v6353_v61  ;;  %v6354_v13 = vunpack.i.l.bf16 %v6353_v61  ;;  %vm8844_vm8 = vmmov %vm8842_vm2 }
 0x935   : > { %v6360_v25 = vunpack.i.h.bf16 %v6358_v31  ;;  %v6359_v15 = vunpack.i.l.bf16 %v6358_v31  ;;  %vm8845_vm13 = vmmov %vm8842_vm2  ;;  %vm8847_vm10 = vcmp.lt.s32.totalorder %v6744_v19, 113 }
 0x936   : > { %5252 = vmatprep.subr.msk.bf16.mxu1 %vm6781_vm6, %v5250_v29  ;;  %vm8841_vm6 = vmmov %vm8840_vm5 }
 0x937   : > { %v6363_v37 = vpop.permute.xlu1 %6362  ;;  %5255 = vmatpush1.bf16.msk.msra.mxu1 %vm6900_vm0, %v5253_v63  ;;  %v3738_v46 = vsel %vm8839_vm9, %v6359_v15, %v6354_v13  ;;  %v3739_v2 = vsel %vm8840_vm5, %v6360_v25, %v6355_v10  ;;  %v3734_v56 = vsel %vm8841_vm6, %v6354_v13, %v6359_v15  ;;  %v3735_v40 = vsel %vm8842_vm2, %v6355_v10, %v6360_v25  ;;  %vm8846_vm7 = vmmov %vm8842_vm2 }
 0x938   : > { %v6373_v18 = vpop.permute.xlu0 %6372  ;;  %5257 = vmatprep.subr.bf16.mxu1 %v5256_v58  ;;  %v6365_v50 = vunpack.i.h.bf16 %v6363_v37  ;;  %v6364_v55 = vunpack.i.l.bf16 %v6363_v37  ;;  %v5264_v58 = vpack.c.bf16 %v3739_v2, %v3738_v46  ;;  %v5267_v60 = vpack.c.bf16 %v3735_v40, %v3734_v56  ;;  %vm8848_vm15 = vmmov %vm8847_vm10 }
 0x939   : > { %v6375_v6 = vunpack.i.h.bf16 %v6373_v18  ;;  %v6374_v41 = vunpack.i.l.bf16 %v6373_v18  ;;  %vm8849_vm9 = vmmov %vm8847_vm10 }
 0x93a   : > { %vm8850_vm5 = vmmov %vm8849_vm9 }
 0x93b   : > { %v6368_v7 = vpop.permute.xlu1 %6367  ;;  %5259 = vmatpush1.bf16.msra.mxu1 %v5258_v14  ;;  %v3740_v20 = vsel %vm8843_vm11, %v6374_v41, %v6364_v55  ;;  %v3741_v9 = vsel %vm8844_vm8, %v6375_v6, %v6365_v50  ;;  %v3737_v34 = vsel %vm8846_vm7, %v6365_v50, %v6375_v6  ;;  %vm8851_vm6 = vmmov %vm8850_vm5  ;;  %vm8855_vm8 = vcmp.lt.s32.totalorder %v6744_v19, 112 }
 0x93c   : > { %v6378_v17 = vpop.permute.xlu0 %6377  ;;  %5261 = vmatprep.subr.bf16.mxu1 %v5260_v62  ;;  %v6370_v26 = vunpack.i.h.bf16 %v6368_v7  ;;  %v6369_v47 = vunpack.i.l.bf16 %v6368_v7  ;;  %v3736_v62 = vsel %vm8845_vm13, %v6364_v55, %v6374_v41  ;;  %v5270_v12 = vpack.c.bf16 %v3741_v9, %v3740_v20  ;;  %vm8852_vm2 = vmmov %vm8850_vm5 }
 0x93d   : > { %v6380_v22 = vunpack.i.h.bf16 %v6378_v17  ;;  %v6379_v38 = vunpack.i.l.bf16 %v6378_v17  ;;  %v5273_v39 = vpack.c.bf16 %v3737_v34, %v3736_v62  ;;  %vm8854_vm11 = vmmov %vm8852_vm2 }
 0x93e   : > { %vm8856_vm13 = vmmov %vm8855_vm8 }
 0x93f   : > { %v6383_v14 = vpop.permute.xlu1 %6382  ;;  %5263 = vmatpush1.bf16.msra.mxu1 %v5262_v3  ;;  %v3778_v24 = vsel %vm8847_vm10, %v6379_v38, %v6369_v47  ;;  %v3779_v35 = vsel %vm8848_vm15, %v6380_v22, %v6370_v26  ;;  %v3774_v8 = vsel %vm8849_vm9, %v6369_v47, %v6379_v38  ;;  %v3775_v4 = vsel %vm8850_vm5, %v6370_v26, %v6380_v22  ;;  %vm8857_vm7 = vmmov %vm8855_vm8 }
 0x940   : > { %v6393_v44 = vpop.permute.xlu0 %6392  ;;  %5266 = vmatprep.subr.msk.bf16.mxu1 %vm6854_vm12, %v5264_v58  ;;  %v6385_v36 = vunpack.i.h.bf16 %v6383_v14  ;;  %v6384_v1 = vunpack.i.l.bf16 %v6383_v14  ;;  %v5276_v49 = vpack.c.bf16 %v3779_v35, %v3778_v24  ;;  %v5279_v10 = vpack.c.bf16 %v3775_v4, %v3774_v8  ;;  %vm8858_vm10 = vmmov %vm8857_vm7  ;;  %v3879_v8 = vld [vmem:[#allocation3 + $0x1e0] sm:$0xff] }
 0x941   : > { %v6395_v3 = vunpack.i.h.bf16 %v6393_v44  ;;  %v6394_v28 = vunpack.i.l.bf16 %v6393_v44  ;;  %vm8859_vm15 = vmmov %vm8857_vm7 }
 0x942   : > { %vm8860_vm9 = vmmov %vm8857_vm7 }
 0x943   : > { %v6388_v21 = vpop.permute.xlu1 %6387  ;;  %5269 = vmatpush1.bf16.msk.msra.mxu1 %vm6944_vm14, %v5267_v60  ;;  %v3780_v29 = vsel %vm8851_vm6, %v6394_v28, %v6384_v1  ;;  %v3781_v63 = vsel %vm8852_vm2, %v6395_v3, %v6385_v36  ;;  %v3777_v25 = vsel %vm8854_vm11, %v6385_v36, %v6395_v3  ;;  %vm8863_vm6 = vcmp.lt.s32.totalorder %v6744_v19, 111  ;;  %v3889_v19 = vld [vmem:[#allocation3 + $0x230] sm:$0xff] }
 0x944   : > { %v6398_v43 = vpop.permute.xlu0 %6397  ;;  %5272 = vmatprep.subr.msk.bf16.mxu1 %vm6854_vm12, %v5270_v12  ;;  %v6390_v0 = vunpack.i.h.bf16 %v6388_v21  ;;  %v6389_v52 = vunpack.i.l.bf16 %v6388_v21  ;;  %vm8853_vm12 = vmmov %vm8852_vm2  ;;  %v5282_v15 = vpack.c.bf16 %v3781_v63, %v3780_v29  ;;  %v3885_v63 = vld [vmem:[#allocation3 + $0x210] sm:$0xff] }
 0x945   : > { %v6400_v32 = vunpack.i.h.bf16 %v6398_v43  ;;  %v6399_v61 = vunpack.i.l.bf16 %v6398_v43  ;;  %v3776_v13 = vsel %vm8853_vm12, %v6384_v1, %v6394_v28  ;;  %vm8864_vm2 = vmmov %vm8863_vm6 }
 0x946   : > { %v5285_v7 = vpack.c.bf16 %v3777_v25, %v3776_v13 }
 0x947   : > { %v6403_v42 = vpop.permute.xlu1 %6402  ;;  %5275 = vmatpush1.bf16.msk.msra.mxu1 %vm6944_vm14, %v5273_v39  ;;  %v3818_v37 = vsel %vm8855_vm8, %v6399_v61, %v6389_v52  ;;  %v3819_v18 = vsel %vm8856_vm13, %v6400_v32, %v6390_v0  ;;  %v3814_v17 = vsel %vm8857_vm7, %v6389_v52, %v6399_v61  ;;  %v3815_v56 = vsel %vm8858_vm10, %v6390_v0, %v6400_v32  ;;  %v3882_v32 = vld [vmem:[#allocation3 + $0x1f8] sm:$0xff] }
 0x948   : > { %v6408_v31 = vpop.permute.xlu0 %6407  ;;  %5278 = vmatprep.subr.msk.bf16.mxu1 %vm6980_vm1, %v5276_v49  ;;  %v6405_v46 = vunpack.i.h.bf16 %v6403_v42  ;;  %v6404_v2 = vunpack.i.l.bf16 %v6403_v42  ;;  %v5288_v40 = vpack.c.bf16 %v3819_v18, %v3818_v37  ;;  %v5291_v14 = vpack.c.bf16 %v3815_v56, %v3814_v17  ;;  %v3886_v61 = vld [vmem:[#allocation3 + $0x218] sm:$0xff]  ;;  %v3888_v42 = vld [vmem:[#allocation3 + $0x228] sm:$0xff] }
 0x949   : > { %v6410_v50 = vunpack.i.h.bf16 %v6408_v31  ;;  %v6409_v55 = vunpack.i.l.bf16 %v6408_v31  ;;  %v3881_v31 = vld [vmem:[#allocation3 + $0x1f0] sm:$0xff] }
 0x94b   : > { %v6413_v6 = vpop.permute.xlu1 %6412  ;;  %5281 = vmatpush1.bf16.msk.msra.mxu1 %vm6900_vm0, %v5279_v10  ;;  %v3820_v38 = vsel %vm8859_vm15, %v6409_v55, %v6404_v2  ;;  %v3821_v20 = vsel %vm8860_vm9, %v6410_v50, %v6405_v46  ;;  %v3890_v10 = vld [vmem:[#allocation3 + $0x238] sm:$0xff] }
 0x94c   : > { %v6418_v41 = vpop.permute.xlu0 %6417  ;;  %5284 = vmatprep.subr.msk.bf16.mxu1 %vm6980_vm1, %v5282_v15  ;;  %v6415_v58 = vunpack.i.h.bf16 %v6413_v6  ;;  %v6414_v26 = vunpack.i.l.bf16 %v6413_v6  ;;  %vm8861_vm1 = vmmov %vm8857_vm7  ;;  %v5293_v62 = vpack.c.bf16 %v3821_v20, %v3820_v38  ;;  %vm8871_vm7 = vcmask 261120  }
 0x94d   : > { %v6420_v47 = vunpack.i.h.bf16 %v6418_v41  ;;  %v6419_v22 = vunpack.i.l.bf16 %v6418_v41  ;;  %v3816_v44 = vsel %vm8861_vm1, %v6404_v2, %v6409_v55  ;;  %vm8862_vm5 = vmmov %vm8861_vm1 }
 0x94e   : > { %v3817_v60 = vsel %vm8862_vm5, %v6405_v46, %v6410_v50 }
 0x94f   : > { %5287 = vmatpush1.bf16.msk.msra.mxu1 %vm6900_vm0, %v5285_v7  ;;  %v6423_v33 = vpop.permute.xlu1 %6422  ;;  %v3858_v34 = vsel %vm8863_vm6, %v6419_v22, %v6414_v26  ;;  %v3859_v23 = vsel %vm8864_vm2, %v6420_v47, %v6415_v58  ;;  %v5296_v1 = vpack.c.bf16 %v3817_v60, %v3816_v44  ;;  %vm8865_vm0 = vmmov %vm8864_vm2 }
 0x950   : > { %v6428_v9 = vpop.permute.xlu0 %6427  ;;  %5290 = vmatprep.subr.msk.bf16.mxu1 %vm7012_vm4, %v5288_v40  ;;  %v6425_v12 = vunpack.i.h.bf16 %v6423_v33  ;;  %v6424_v24 = vunpack.i.l.bf16 %v6423_v33  ;;  %v3854_v3 = vsel %vm8865_vm0, %v6414_v26, %v6419_v22  ;;  %vm8866_vm12 = vmmov %vm8865_vm0  ;;  %v5298_v21 = vpack.c.bf16 %v3859_v23, %v3858_v34  ;;  %v6440_v33 = vld [vmem:[%s6666_s28 + $0x8] sm:$0xff] }
 0x951   : > { %v6430_v35 = vunpack.i.h.bf16 %v6428_v9  ;;  %v6429_v36 = vunpack.i.l.bf16 %v6428_v9  ;;  %v3855_v28 = vsel %vm8866_vm12, %v6415_v58, %v6420_v47  ;;  %vm8867_vm11 = vmmov %vm8865_vm0  ;;  %v6439_v47 = vld [vmem:[%s6666_s28] sm:$0xff] }
 0x952   : > { %vm8868_vm8 = vmmov %vm8865_vm0  ;;  %v5301_v4 = vpack.c.bf16 %v3855_v28, %v3854_v3  ;;  %v6442_v3 = vld [vmem:[%s6666_s28 + $0x18] sm:$0xff] }
 0x953   : > { %5292 = vmatpush1.bf16.msra.mxu1 %v5291_v14  ;;  %v3860_v43 = vsel %vm8867_vm11, %v6429_v36, %v6424_v24  ;;  %v3861_v39 = vsel %vm8868_vm8, %v6430_v35, %v6425_v12  ;;  %vm8870_vm13 = vmmov %vm8865_vm0 }
 0x954   : > { %5295 = vmatprep.subr.msk.bf16.mxu1 %vm7012_vm4, %v5293_v62  ;;  %vm8869_vm4 = vmmov %vm8865_vm0  ;;  %v3857_v0 = vsel %vm8870_vm13, %v6425_v12, %v6430_v35  ;;  %v5304_v52 = vpack.c.bf16 %v3861_v39, %v3860_v43 }
 0x955   : > { %v3856_v49 = vsel %vm8869_vm4, %v6424_v24, %v6429_v36  ;;  %v6441_v24 = vld [vmem:[%s6666_s28 + $0x10] sm:$0xff] }
 0x956   : > { %v5307_v29 = vpack.c.bf16 %v3857_v0, %v3856_v49  ;;  %v6443_v49 = vld [vmem:[%s6666_s28 + $0x20] sm:$0xff] }
 0x957   : > { %5297 = vmatpush1.bf16.msra.mxu1 %v5296_v1 }
 0x958   : > { %5300 = vmatprep.subr.msk.bf16.mxu1 %vm7038_vm3, %v5298_v21 }
 0x95a   : > { %4065 = vmatmul.mubr.f32.vlgmr.msra.gmra.mrb[16].mxu1 %v3879_v8 }
 0x95b   : > { %5303 = vmatpush1.bf16.msk.msra.mxu1 %vm6944_vm14, %v5301_v4  ;;  %4070 = vmatprep.mubr.f32.mxu1 %v3883_v5 }
 0x95c   : > { %5306 = vmatprep.subr.msk.bf16.mxu1 %vm7038_vm3, %v5304_v52  ;;  %vm8872_vm3 = vmmov %vm8871_vm7 }
 0x95d   : > { %vm8874_vm10 = vmmov %vm8872_vm3 }
 0x95e   : > { %4071 = vmatmul.mubr.f32.gmra.mrb[18].mxu1 %v3882_v32  ;;  %v6444_v32 = vld [vmem:[%s6666_s28 + $0x28] sm:$0xff] }
 0x95f   : > { %5309 = vmatpush1.bf16.msk.msra.mxu1 %vm6944_vm14, %v5307_v29  ;;  %4076 = vmatprep.mubr.f32.mxu1 %v3886_v61  ;;  %vm8873_vm14 = vmmov %vm8872_vm3 }
 0x960   : > { %v3971_v13 = vpop.permute.xlu1 %3970 }
 0x961   : > { %v3976_v2 = vpop.permute.xlu0 %3975 }
 0x962   : > { %4077 = vmatmul.mubr.f32.gmra.mrb[20].mxu1 %v3885_v63 }
 0x963   : > { %4082 = vmatprep.mubr.f32.mxu1 %v3889_v19  ;;  %v6445_v19 = vld [vmem:[%s6666_s28 + $0x30] sm:$0xff] }
 0x964   : > { %v3981_v26 = vpop.permute.xlu1 %3980 }
 0x965   : > { %v3986_v12 = vpop.permute.xlu0 %3985 }
 0x966   : > { %4083 = vmatmul.mubr.f32.gmra.mrb[22].mxu1 %v3888_v42 }
 0x967   : > { %4153 = vmatprep.mubr.f32.mxu1 %v6555_v27 }
 0x96a   : > { %4363 = vmatmul.mubr.msk.f32.vlgmr.msra.gmra.mrb[16].mxu1 %vm8871_vm7, %v3881_v31  ;;  %v6446_v31 = vld [vmem:[%s6666_s28 + $0x38] sm:$0xff]  ;;  %s6481_s28 = scalar_lea.vmem %s6480_s30, 2048 }
 0x96b   : > { %4159 = vmatprep.mubr.f32.mxu1 %v6555_v27  ;;  %p6483_p3 = scmp.lt.s32.totalorder %s6481_s28, %s6475_s24 }
 0x96d   : > { %p6484_p4 = por %p6483_p3, %p6482_p2 }
 0x96e   : > { %4364 = vmatmul.mubr.msk.f32.gmra.mrb[18].mxu1 %vm8872_vm3, %v3884_v11 }
 0x96f   : > { %4165 = vmatprep.mubr.f32.mxu1 %v6555_v27  ;;  %p6485_p7 = pnand %p6484_p4, %p6478_p12 }
 0x972   : > { %4365 = vmatmul.mubr.msk.f32.gmra.mrb[20].mxu1 %vm8873_vm14, %v3887_v59 }
 0x973   : > { %4171 = vmatprep.mubr.f32.mxu1 %v6555_v27 }
 0x976   : > { %4366 = vmatmul.mubr.msk.f32.gmra.mrb[22].mxu1 %vm8874_vm10, %v3890_v10 }
 0xa3d   : > { %v4155_v25 = vpop.f32.mrb[16].mxu1 }
 0xa3e   : > { %v5350_v15 = vadd.f32 %v4155_v25, %v3971_v13  ;;  %v4157_v37 = vpop.f32.mrb[17].mxu1 }
 0xa3f   : > { %v5351_v18 = vadd.f32 %v4157_v37, %v3971_v13 }
 0xa40   : > { %vm4178_vm15 = vcmp.ge.f32.partialorder %v5350_v15, 0.0  ;;  %v4186_v46 = vmul.f32 0.01, %v5350_v15 }
 0xa41   : > { %vm4179_vm9 = vcmp.ge.f32.partialorder %v5351_v18, 0.0  ;;  %v4187_v50 = vmul.f32 0.01, %v5351_v18  ;;  %v4161_v55 = vpop.f32.mrb[18].mxu1 }
 0xa42   : > { %v4194_v27 = vsel %vm4178_vm15, %v5350_v15, %v4186_v46  ;;  %v5352_v6 = vadd.f32 %v4161_v55, %v3976_v2  ;;  %v4163_v41 = vpop.f32.mrb[19].mxu1 }
 0xa43   : > { %v4202_v7 = vadd.f32 %v4194_v27, %v7903_v45  ;;  %v4195_v17 = vsel %vm4179_vm9, %v5351_v18, %v4187_v50  ;;  %v5353_v56 = vadd.f32 %v4163_v41, %v3976_v2 }
 0xa44   : > { %v4203_v40 = vadd.f32 %v4195_v17, %v7909_v54  ;;  %vm4180_vm1 = vcmp.ge.f32.partialorder %v5352_v6, 0.0  ;;  %v4188_v58 = vmul.f32 0.01, %v5352_v6 }
 0xa45   : > { %v4210_v22 = vadd.f32 %v6439_v47, %v4202_v7  ;;  %vm4181_vm5 = vcmp.ge.f32.partialorder %v5353_v56, 0.0  ;;  %v4189_v38 = vmul.f32 0.01, %v5353_v56  ;;  %v4167_v20 = vpop.f32.mrb[20].mxu1 }
 0xa46   : > { %v4211_v9 = vadd.f32 %v6440_v33, %v4203_v40  ;;  %v4196_v14 = vsel %vm4180_vm1, %v5352_v6, %v4188_v58  ;;  %v5354_v44 = vadd.f32 %v4167_v20, %v3981_v26  ;;  %v4169_v60 = vpop.f32.mrb[21].mxu1 }
 0xa47   : > { %4218 = vst [vmem:[%s8465_s25] sm:$0xff] %v4210_v22  ;;  %v4204_v45 = vadd.f32 %v4196_v14, %v7906_v48  ;;  %v4197_v54 = vsel %vm4181_vm5, %v5353_v56, %v4189_v38  ;;  %v5355_v62 = vadd.f32 %v4169_v60, %v3981_v26 }
 0xa48   : > { %4219 = vst [vmem:[%s8465_s25 + $0x8] sm:$0xff] %v4211_v9  ;;  %v4205_v34 = vadd.f32 %v4197_v54, %v7912_v57  ;;  %vm4182_vm6 = vcmp.ge.f32.partialorder %v5354_v44, 0.0  ;;  %v4190_v23 = vmul.f32 0.01, %v5354_v44 }
 0xa49   : > { %v4212_v35 = vadd.f32 %v6441_v24, %v4204_v45  ;;  %vm4183_vm2 = vcmp.ge.f32.partialorder %v5355_v62, 0.0  ;;  %v4191_v36 = vmul.f32 0.01, %v5355_v62  ;;  %v4173_v1 = vpop.f32.mrb[22].mxu1 }
 0xa4a   : > { %v4213_v28 = vadd.f32 %v6442_v3, %v4205_v34  ;;  %v4198_v48 = vsel %vm4182_vm6, %v5354_v44, %v4190_v23  ;;  %v5356_v21 = vadd.f32 %v4173_v1, %v3986_v12  ;;  %v4175_v43 = vpop.f32.mrb[23].mxu1 }
 0xa4b   : > { %4220 = vst [vmem:[%s8465_s25 + $0x10] sm:$0xff] %v4212_v35  ;;  %v4206_v57 = vadd.f32 %v4198_v48, %v7921_v30  ;;  %v4199_v39 = vsel %vm4183_vm2, %v5355_v62, %v4191_v36  ;;  %v5357_v8 = vadd.f32 %v4175_v43, %v3986_v12 }
 0xa4c   : > { %4221 = vst [vmem:[%s8465_s25 + $0x18] sm:$0xff] %v4213_v28  ;;  %v4207_v5 = vadd.f32 %v4199_v39, %v7927_v51  ;;  %vm4184_vm0 = vcmp.ge.f32.partialorder %v5356_v21, 0.0  ;;  %v4192_v4 = vmul.f32 0.01, %v5356_v21 }
 0xa4d   : > { %v4214_v0 = vadd.f32 %v6443_v49, %v4206_v57  ;;  %vm4185_vm12 = vcmp.ge.f32.partialorder %v5357_v8, 0.0  ;;  %v4193_v52 = vmul.f32 0.01, %v5357_v8 }
 0xa4e   : > { %v4215_v61 = vadd.f32 %v6444_v32, %v4207_v5  ;;  %v4200_v30 = vsel %vm4184_vm0, %v5356_v21, %v4192_v4 }
 0xa4f   : > { %4222 = vst [vmem:[%s8465_s25 + $0x20] sm:$0xff] %v4214_v0  ;;  %v4208_v29 = vadd.f32 %v4200_v30, %v7924_v16  ;;  %v4201_v51 = vsel %vm4185_vm12, %v5357_v8, %v4193_v52 }
 0xa50   : > { %4223 = vst [vmem:[%s8465_s25 + $0x28] sm:$0xff] %v4215_v61  ;;  %v4209_v63 = vadd.f32 %v4201_v51, %v7930_v53 }
 0xa51   : > { %v4216_v42 = vadd.f32 %v6445_v19, %v4208_v29 }
 0xa52   : > { %v4217_v11 = vadd.f32 %v6446_v31, %v4209_v63 }
 0xa53   : > { %4224 = vst [vmem:[%s8465_s25 + $0x30] sm:$0xff] %v4216_v42 }
 0xa54   : > { %4225 = vst [vmem:[%s8465_s25 + $0x38] sm:$0xff] %v4217_v11 }
 0xa55   : > { %6488 = shalt.err (!%p6485_p7)
}
 0xa56   : > { %s6489_s4 = scalar_lea.hbm %s8489_s11, 1024  ;;  %s6493_s17 = scalar_lea.hbm %s8543_s3, 2048 }
 0xa57   : > { %p6490_p8 = scmp.ne.s32.totalorder %s8489_s11, %s6489_s4  ;;  %p6494_p1 = scmp.lt.u32.totalorder %s8489_s11, %s8543_s3 }
 0xa58   : > { %p6495_p0 = scmp.lt.u32.totalorder %s6493_s17, %s6489_s4  ;;  %p6497_p6 = scmp.lt.u32.totalorder %s6489_s4, %s8489_s11 }
 0xa59   : > { %p6491_p11 = pnand %p6490_p8, %p8875_p9 }
 0xa5a   : > { %p6496_p5 = por %p6495_p0, %p6494_p1 }
 0xa5b   : > { %p6492_p13 = pneg %p6491_p11 }
 0xa5c   : > { %p6498_p10 = por %p6497_p6, %p6496_p5 }
 0xa5e   : > { %p6499_p12 = pnand %p6498_p10, %p6492_p13 }
 0xa60   : > { %6502 = shalt.err (!%p6499_p12)
}
 0xa61   : > { %s6557_s20 = smov 256  }
 0xa62   : > { %5410 = dma.vmem_to_hbm [thread:$0]  (%p8875_p9), %s8492_s8, 1024, %s8489_s11, %s8498_s16, %s6557_s20, %s6557_s20, %s6547_s26  }
 0xa63 PF: > { %p5422_p2 = scmp.ge.s32.totalorder %s6541_s15, 2  ;;  %s4255_s25 = sand.u32 1, %s6529_s12  }
 0xa64   : > { %p8876_p3 = scmp.ne.s32.totalorder %s8556_s23, 0  ;;  %s4256_s27 = scalar_lea.sflag [#allocation5], %s4255_s25 }
 0xa66   : > { %p5417_p4 = pnand %p5422_p2, %p8876_p3 }
 0xa68   : > { %6524 = dma.done.wait (!%p5417_p4), %s4256_s27, 1024  }
 0xa69   : > { %6526 = vsyncadd (!%p5417_p4), %s4256_s27, 4294966272  ;;  %p14_p7 = scmp.ge.s32.totalorder %s6603_s18, 4   ;;  %s8877_s12 = smov %s6533_s13 }
 0xa6a   : > { %s8878_s13 = smov %s6537_s14  ;;  %s8879_s14 = smov %s6614_s21 }
 0xa6b   : > { %s8880_s15 = smov %s6603_s18  ;;  %16 = sbr.rel (!%p14_p7) target bundleno = 4 (0x4), region = 82 }
 0xa72   :  { %4261 = vsyncpa [#allocation4], 1 }
 0xa73   :  { %4263 = vsyncpa [#allocation4 + $0x1], 1 }
 0xa74   :  { %4264 = vsyncpa [#allocation5], 1 }
 0xa75   :  { %4266 = vsyncpa [#allocation5 + $0x1], 1 }

</bundles_post_ra>
